<compile_context>
chip_gen: v6e
topology: v6e:2x2x1
jax: 0.10.0
libtpu: 0.0.40
codegen_flags: <defaults>
</compile_context>

<pallas_src>
import functools

import jax
import jax.numpy as jnp
from jax.experimental import pallas as pl
from jax.experimental.pallas import tpu as pltpu


# -----------------------------------------------------------------------------
# Fused kernel: token gather -> 3 LSTM layers -> fc head, all in VMEM/SMEM.
# -----------------------------------------------------------------------------
def _char_lstm_kernel(tok_ref, h0_ref, c0_ref, embp_ref,
                      wih_ref, whh_ref, b_ref, wfc_ref, bfc_ref,
                      logits_ref, hn_ref, cn_ref,
                      zx_sc, seq_sc, fcin_sc,
                      *, n_layers, seq_len, batch, hidden):
    T, B, H, L = seq_len, batch, hidden, n_layers

    # ---- Layer-0 input projection = row gather of the pre-folded table -----
    # emb_proj[v] = emb[v] @ W_ih0^T + (b_ih0 + b_hh0); one row per (t, b),
    # written straight into the zx scratch (time-major row t*B + b).
    for t in range(T):                                   # static unroll
        for bi in range(B):
            tok = tok_ref[bi, t]                         # scalar read from SMEM
            zx_sc[pl.ds(t * B + bi, 1), :] = embp_ref[pl.ds(tok, 1), :]

    for layer in range(L):                               # static unroll over layers
        w_hh = whh_ref[layer]                            # (H, 4H) bf16

        if layer > 0:
            # Hoisted input projection for the whole sequence, written to the
            # zx scratch so its live range is bounded by the ref (re-read per
            # step below) instead of occupying vregs across the recurrence.
            zx_sc[...] = (jnp.dot(seq_sc[...], wih_ref[layer - 1],
                                  preferred_element_type=jnp.float32)
                          + b_ref[layer - 1])

        h = h0_ref[layer]                                # (B, H) f32
        c = c0_ref[layer]                                # (B, H) f32
        h_b16 = h.astype(jnp.bfloat16)                   # reused by first step

        for t in range(T):                               # static unrolled recurrence
            z = zx_sc[pl.ds(t * B, B), :] + jnp.dot(
                h_b16, w_hh, preferred_element_type=jnp.float32)     # (B, 4H) f32
            # Gate columns are pre-ordered (i, f, o | g): one sigmoid stream
            # over 3H lanes, one tanh stream over H lanes.
            s = jax.nn.sigmoid(z[:, :3 * H])
            g = jnp.tanh(z[:, 3 * H:])
            c = s[:, H:2 * H] * c + s[:, :H] * g
            h = s[:, 2 * H:3 * H] * jnp.tanh(c)
            h_b16 = h.astype(jnp.bfloat16)               # single cast; feeds next matmul
            if layer < L - 1:
                # inter-layer dropout: identity in eval mode.
                seq_sc[pl.ds(t * B, B), :] = h_b16       # next layer's input (bf16)
            else:
                # Last layer: stage the fc inputs directly in PyTorch's
                # batch-first (b, t) row order -> no post-kernel re-layout.
                for bi in range(B):
                    fcin_sc[pl.ds(bi * T + t, 1), :] = h[bi:bi + 1, :]

        hn_ref[layer] = h
        cn_ref[layer] = c

    # ---- fc head (self.dropout: identity in eval mode) ----------------------
    logits_ref[...] = (jnp.dot(fcin_sc[...].astype(jnp.bfloat16), wfc_ref[...],
                               preferred_element_type=jnp.float32)
                       + bfc_ref[...])


def char_lstm_fused(tokens, h0, c0, emb_proj, wih, whh, b, wfc, bfc,
                    *, n_layers, seq_len, batch, hidden, vocab):
    T, B, H, L, V = seq_len, batch, hidden, n_layers, vocab
    kernel = functools.partial(_char_lstm_kernel, n_layers=L, seq_len=T,
                               batch=B, hidden=H)
    return pl.pallas_call(
        kernel,
        out_shape=(
            jax.ShapeDtypeStruct((B * T, V), jnp.float32),   # logits, (b, t) row order
            jax.ShapeDtypeStruct((L, B, H), jnp.float32),    # h_n
            jax.ShapeDtypeStruct((L, B, H), jnp.float32),    # c_n
        ),
        in_specs=[
            pl.BlockSpec(memory_space=pltpu.MemorySpace.SMEM),   # tokens (B, T) int32
            pl.BlockSpec((L, B, H), lambda: (0, 0, 0)),          # h0 (f32)
            pl.BlockSpec((L, B, H), lambda: (0, 0, 0)),          # c0 (f32)
            pl.BlockSpec((V, 4 * H), lambda: (0, 0)),            # emb @ W_ih0^T + b0 (f32)
            pl.BlockSpec((L - 1, H, 4 * H), lambda: (0, 0, 0)),  # W_ih^T layers 1.. (bf16)
            pl.BlockSpec((L, H, 4 * H), lambda: (0, 0, 0)),      # W_hh^T all layers (bf16)
            pl.BlockSpec((L - 1, 1, 4 * H), lambda: (0, 0, 0)),  # biases layers 1.. (f32)
            pl.BlockSpec((H, V), lambda: (0, 0)),                # fc weight^T (bf16)
            pl.BlockSpec((1, V), lambda: (0, 0)),                # fc bias (f32)
        ],
        out_specs=(
            pl.BlockSpec((B * T, V), lambda: (0, 0)),
            pl.BlockSpec((L, B, H), lambda: (0, 0, 0)),
            pl.BlockSpec((L, B, H), lambda: (0, 0, 0)),
        ),
        scratch_shapes=[
            pltpu.VMEM((T * B, 4 * H), jnp.float32),    # zx: hoisted input projection
            pltpu.VMEM((T * B, H), jnp.bfloat16),       # inter-layer output sequence
            pltpu.VMEM((B * T, H), jnp.float32),        # fc input, batch-first rows
        ],
    )(tokens, h0, c0, emb_proj, wih, whh, b, wfc, bfc)


# -----------------------------------------------------------------------------
# Full CharLSTM forward.  No pre/post XLA glue: the kernel consumes raw token
# ids and emits logits already in PyTorch's (B*T, vocab) layout.
# -----------------------------------------------------------------------------
def char_lstm_forward(tokens, h0, c0, params, *, n_layers, n_hidden, vocab_size):
    B, T = tokens.shape
    logits, hn, cn = char_lstm_fused(
        tokens, h0, c0,
        params["emb_proj"], params["w_ih_t"], params["w_hh_t"], params["b"],
        params["w_fc_t"], params["b_fc"],
        n_layers=n_layers, seq_len=T, batch=B, hidden=n_hidden, vocab=vocab_size)
    return logits, (hn, cn)


def make_params(key, vocab_size, emb_dim, n_hidden, n_layers):
    H = n_hidden
    keys = jax.random.split(key, 3 + 3 * n_layers)
    scale = 0.05

    emb = scale * jax.random.normal(keys[0], (vocab_size, emb_dim), jnp.float32)
    w_fc = scale * jax.random.normal(keys[1], (H, vocab_size), jnp.float32)
    b_fc = scale * jax.random.normal(keys[2], (1, vocab_size), jnp.float32)

    # Per-layer weights, pre-transposed, gate columns ordered (i, f, o, g).
    w_ih_list, w_hh_list, b_list = [], [], []
    for layer in range(n_layers):
        d_in = emb_dim if layer == 0 else H
        k0, k1, k2 = keys[3 + 3 * layer: 6 + 3 * layer]
        w_ih_t = scale * jax.random.normal(k0, (d_in, 4 * H), jnp.float32)
        w_hh_t = scale * jax.random.normal(k1, (H, 4 * H), jnp.float32)
        bias = scale * jax.random.normal(k2, (1, 4 * H), jnp.float32)  # b_ih + b_hh
        w_ih_list.append(w_ih_t)
        w_hh_list.append(w_hh_t)
        b_list.append(bias)

    # Fold the embedding table through layer 0's input projection (+ bias):
    # exact f32 precompute done once at parameter-prep time, so the kernel's
    # layer-0 "input matmul" is just a row gather of this (V, 4H) table.
    emb_proj = emb @ w_ih_list[0] + b_list[0]

    return {
        "emb_proj": emb_proj,                                     # (V, 4H) f32
        "w_ih_t": jnp.stack(w_ih_list[1:]).astype(jnp.bfloat16),  # (L-1, H, 4H)
        "w_hh_t": jnp.stack(w_hh_list).astype(jnp.bfloat16),      # (L, H, 4H)
        "b": jnp.stack(b_list[1:]),                               # (L-1, 1, 4H) f32
        "w_fc_t": w_fc.astype(jnp.bfloat16),                      # (H, V)
        "b_fc": b_fc,                                             # (1, V) f32
    }


if __name__ == "__main__":
    VOCAB = 32
    EMB = 512          # fixed by the module (nn.Embedding(vocab_size, 512))
    HIDDEN = 128
    LAYERS = 3
    B, T = 2, 8

    key = jax.random.PRNGKey(0)
    k_par, k_tok = jax.random.split(key)
    params = make_params(k_par, VOCAB, EMB, HIDDEN, LAYERS)

    tokens = jax.random.randint(k_tok, (B, T), 0, VOCAB, dtype=jnp.int32)
    h0 = jnp.zeros((LAYERS, B, HIDDEN), jnp.float32)   # init_hidden
    c0 = jnp.zeros((LAYERS, B, HIDDEN), jnp.float32)

    fwd = jax.jit(functools.partial(
        char_lstm_forward, n_layers=LAYERS, n_hidden=HIDDEN, vocab_size=VOCAB))
    logits, (hn, cn) = fwd(tokens, h0, c0, params)
    jax.block_until_ready((logits, hn, cn))

    assert logits.shape == (B * T, VOCAB)
    assert hn.shape == (LAYERS, B, HIDDEN)
    assert cn.shape == (LAYERS, B, HIDDEN)
    assert bool(jnp.isfinite(logits).all())
    print("KERNEL_OK")
</pallas_src>

<mosaic_0001>
module attributes {stable_mosaic.version = 11 : i64} {
  func.func @_char_lstm_kernel(%arg0: memref<2x8xi32, #tpu.memory_space<smem>>, %arg1: memref<3x2x128xf32, #tpu.memory_space<vmem>>, %arg2: memref<3x2x128xf32, #tpu.memory_space<vmem>>, %arg3: memref<32x512xf32, #tpu.memory_space<vmem>>, %arg4: memref<2x128x512xbf16, #tpu.memory_space<vmem>>, %arg5: memref<3x128x512xbf16, #tpu.memory_space<vmem>>, %arg6: memref<2x1x512xf32, #tpu.memory_space<vmem>>, %arg7: memref<128x32xbf16, #tpu.memory_space<vmem>>, %arg8: memref<1x32xf32, #tpu.memory_space<vmem>>, %arg9: memref<16x32xf32, #tpu.memory_space<vmem>>, %arg10: memref<3x2x128xf32, #tpu.memory_space<vmem>>, %arg11: memref<3x2x128xf32, #tpu.memory_space<vmem>>, %arg12: memref<16x512xf32, #tpu.memory_space<vmem>>, %arg13: memref<16x128xbf16, #tpu.memory_space<vmem>>, %arg14: memref<16x128xf32, #tpu.memory_space<vmem>>) attributes {dimension_semantics = [], scalar_prefetch = 0 : i64, scratch_operands = 3 : i64, tpu.core_type = #tpu.core_type<tc>} {
    %c0 = arith.constant 0 : index
    %c0_0 = arith.constant 0 : index
    %0 = memref.load %arg0[%c0, %c0_0] : memref<2x8xi32, #tpu.memory_space<smem>>
    %1 = arith.index_cast %0 : i32 to index
    %c0_1 = arith.constant 0 : index
    %2 = vector.load %arg3[%1, %c0_1] : memref<32x512xf32, #tpu.memory_space<vmem>>, vector<1x512xf32>
    %c0_2 = arith.constant 0 : index
    %c0_3 = arith.constant 0 : index
    %3 = vector.load %arg12[%c0_2, %c0_3] : memref<16x512xf32, #tpu.memory_space<vmem>>, vector<1x512xf32>
    tpu.vector_store %arg12[%c0_2, %c0_3], %2 {strides = array<i32>} : memref<16x512xf32, #tpu.memory_space<vmem>>, vector<1x512xf32>,
    %c1 = arith.constant 1 : index
    %c0_4 = arith.constant 0 : index
    %4 = memref.load %arg0[%c1, %c0_4] : memref<2x8xi32, #tpu.memory_space<smem>>
    %5 = arith.index_cast %4 : i32 to index
    %c0_5 = arith.constant 0 : index
    %6 = vector.load %arg3[%5, %c0_5] : memref<32x512xf32, #tpu.memory_space<vmem>>, vector<1x512xf32>
    %c1_6 = arith.constant 1 : index
    %c0_7 = arith.constant 0 : index
    %7 = vector.load %arg12[%c1_6, %c0_7] : memref<16x512xf32, #tpu.memory_space<vmem>>, vector<1x512xf32>
    tpu.vector_store %arg12[%c1_6, %c0_7], %6 {strides = array<i32>} : memref<16x512xf32, #tpu.memory_space<vmem>>, vector<1x512xf32>,
    %c0_8 = arith.constant 0 : index
    %c1_9 = arith.constant 1 : index
    %8 = memref.load %arg0[%c0_8, %c1_9] : memref<2x8xi32, #tpu.memory_space<smem>>
    %9 = arith.index_cast %8 : i32 to index
    %c0_10 = arith.constant 0 : index
    %10 = vector.load %arg3[%9, %c0_10] : memref<32x512xf32, #tpu.memory_space<vmem>>, vector<1x512xf32>
    %c2 = arith.constant 2 : index
    %c0_11 = arith.constant 0 : index
    %11 = vector.load %arg12[%c2, %c0_11] : memref<16x512xf32, #tpu.memory_space<vmem>>, vector<1x512xf32>
    tpu.vector_store %arg12[%c2, %c0_11], %10 {strides = array<i32>} : memref<16x512xf32, #tpu.memory_space<vmem>>, vector<1x512xf32>,
    %c1_12 = arith.constant 1 : index
    %c1_13 = arith.constant 1 : index
    %12 = memref.load %arg0[%c1_12, %c1_13] : memref<2x8xi32, #tpu.memory_space<smem>>
    %13 = arith.index_cast %12 : i32 to index
    %c0_14 = arith.constant 0 : index
    %14 = vector.load %arg3[%13, %c0_14] : memref<32x512xf32, #tpu.memory_space<vmem>>, vector<1x512xf32>
    %c3 = arith.constant 3 : index
    %c0_15 = arith.constant 0 : index
    %15 = vector.load %arg12[%c3, %c0_15] : memref<16x512xf32, #tpu.memory_space<vmem>>, vector<1x512xf32>
    tpu.vector_store %arg12[%c3, %c0_15], %14 {strides = array<i32>} : memref<16x512xf32, #tpu.memory_space<vmem>>, vector<1x512xf32>,
    %c0_16 = arith.constant 0 : index
    %c2_17 = arith.constant 2 : index
    %16 = memref.load %arg0[%c0_16, %c2_17] : memref<2x8xi32, #tpu.memory_space<smem>>
    %17 = arith.index_cast %16 : i32 to index
    %c0_18 = arith.constant 0 : index
    %18 = vector.load %arg3[%17, %c0_18] : memref<32x512xf32, #tpu.memory_space<vmem>>, vector<1x512xf32>
    %c4 = arith.constant 4 : index
    %c0_19 = arith.constant 0 : index
    %19 = vector.load %arg12[%c4, %c0_19] : memref<16x512xf32, #tpu.memory_space<vmem>>, vector<1x512xf32>
    tpu.vector_store %arg12[%c4, %c0_19], %18 {strides = array<i32>} : memref<16x512xf32, #tpu.memory_space<vmem>>, vector<1x512xf32>,
    %c1_20 = arith.constant 1 : index
    %c2_21 = arith.constant 2 : index
    %20 = memref.load %arg0[%c1_20, %c2_21] : memref<2x8xi32, #tpu.memory_space<smem>>
    %21 = arith.index_cast %20 : i32 to index
    %c0_22 = arith.constant 0 : index
    %22 = vector.load %arg3[%21, %c0_22] : memref<32x512xf32, #tpu.memory_space<vmem>>, vector<1x512xf32>
    %c5 = arith.constant 5 : index
    %c0_23 = arith.constant 0 : index
    %23 = vector.load %arg12[%c5, %c0_23] : memref<16x512xf32, #tpu.memory_space<vmem>>, vector<1x512xf32>
    tpu.vector_store %arg12[%c5, %c0_23], %22 {strides = array<i32>} : memref<16x512xf32, #tpu.memory_space<vmem>>, vector<1x512xf32>,
    %c0_24 = arith.constant 0 : index
    %c3_25 = arith.constant 3 : index
    %24 = memref.load %arg0[%c0_24, %c3_25] : memref<2x8xi32, #tpu.memory_space<smem>>
    %25 = arith.index_cast %24 : i32 to index
    %c0_26 = arith.constant 0 : index
    %26 = vector.load %arg3[%25, %c0_26] : memref<32x512xf32, #tpu.memory_space<vmem>>, vector<1x512xf32>
    %c6 = arith.constant 6 : index
    %c0_27 = arith.constant 0 : index
    %27 = vector.load %arg12[%c6, %c0_27] : memref<16x512xf32, #tpu.memory_space<vmem>>, vector<1x512xf32>
    tpu.vector_store %arg12[%c6, %c0_27], %26 {strides = array<i32>} : memref<16x512xf32, #tpu.memory_space<vmem>>, vector<1x512xf32>,
    %c1_28 = arith.constant 1 : index
    %c3_29 = arith.constant 3 : index
    %28 = memref.load %arg0[%c1_28, %c3_29] : memref<2x8xi32, #tpu.memory_space<smem>>
    %29 = arith.index_cast %28 : i32 to index
    %c0_30 = arith.constant 0 : index
    %30 = vector.load %arg3[%29, %c0_30] : memref<32x512xf32, #tpu.memory_space<vmem>>, vector<1x512xf32>
    %c7 = arith.constant 7 : index
    %c0_31 = arith.constant 0 : index
    %31 = vector.load %arg12[%c7, %c0_31] : memref<16x512xf32, #tpu.memory_space<vmem>>, vector<1x512xf32>
    tpu.vector_store %arg12[%c7, %c0_31], %30 {strides = array<i32>} : memref<16x512xf32, #tpu.memory_space<vmem>>, vector<1x512xf32>,
    %c0_32 = arith.constant 0 : index
    %c4_33 = arith.constant 4 : index
    %32 = memref.load %arg0[%c0_32, %c4_33] : memref<2x8xi32, #tpu.memory_space<smem>>
    %33 = arith.index_cast %32 : i32 to index
    %c0_34 = arith.constant 0 : index
    %34 = vector.load %arg3[%33, %c0_34] : memref<32x512xf32, #tpu.memory_space<vmem>>, vector<1x512xf32>
    %c8 = arith.constant 8 : index
    %c0_35 = arith.constant 0 : index
    %35 = vector.load %arg12[%c8, %c0_35] : memref<16x512xf32, #tpu.memory_space<vmem>>, vector<1x512xf32>
    tpu.vector_store %arg12[%c8, %c0_35], %34 {strides = array<i32>} : memref<16x512xf32, #tpu.memory_space<vmem>>, vector<1x512xf32>,
    %c1_36 = arith.constant 1 : index
    %c4_37 = arith.constant 4 : index
    %36 = memref.load %arg0[%c1_36, %c4_37] : memref<2x8xi32, #tpu.memory_space<smem>>
    %37 = arith.index_cast %36 : i32 to index
    %c0_38 = arith.constant 0 : index
    %38 = vector.load %arg3[%37, %c0_38] : memref<32x512xf32, #tpu.memory_space<vmem>>, vector<1x512xf32>
    %c9 = arith.constant 9 : index
    %c0_39 = arith.constant 0 : index
    %39 = vector.load %arg12[%c9, %c0_39] : memref<16x512xf32, #tpu.memory_space<vmem>>, vector<1x512xf32>
    tpu.vector_store %arg12[%c9, %c0_39], %38 {strides = array<i32>} : memref<16x512xf32, #tpu.memory_space<vmem>>, vector<1x512xf32>,
    %c0_40 = arith.constant 0 : index
    %c5_41 = arith.constant 5 : index
    %40 = memref.load %arg0[%c0_40, %c5_41] : memref<2x8xi32, #tpu.memory_space<smem>>
    %41 = arith.index_cast %40 : i32 to index
    %c0_42 = arith.constant 0 : index
    %42 = vector.load %arg3[%41, %c0_42] : memref<32x512xf32, #tpu.memory_space<vmem>>, vector<1x512xf32>
    %c10 = arith.constant 10 : index
    %c0_43 = arith.constant 0 : index
    %43 = vector.load %arg12[%c10, %c0_43] : memref<16x512xf32, #tpu.memory_space<vmem>>, vector<1x512xf32>
    tpu.vector_store %arg12[%c10, %c0_43], %42 {strides = array<i32>} : memref<16x512xf32, #tpu.memory_space<vmem>>, vector<1x512xf32>,
    %c1_44 = arith.constant 1 : index
    %c5_45 = arith.constant 5 : index
    %44 = memref.load %arg0[%c1_44, %c5_45] : memref<2x8xi32, #tpu.memory_space<smem>>
    %45 = arith.index_cast %44 : i32 to index
    %c0_46 = arith.constant 0 : index
    %46 = vector.load %arg3[%45, %c0_46] : memref<32x512xf32, #tpu.memory_space<vmem>>, vector<1x512xf32>
    %c11 = arith.constant 11 : index
    %c0_47 = arith.constant 0 : index
    %47 = vector.load %arg12[%c11, %c0_47] : memref<16x512xf32, #tpu.memory_space<vmem>>, vector<1x512xf32>
    tpu.vector_store %arg12[%c11, %c0_47], %46 {strides = array<i32>} : memref<16x512xf32, #tpu.memory_space<vmem>>, vector<1x512xf32>,
    %c0_48 = arith.constant 0 : index
    %c6_49 = arith.constant 6 : index
    %48 = memref.load %arg0[%c0_48, %c6_49] : memref<2x8xi32, #tpu.memory_space<smem>>
    %49 = arith.index_cast %48 : i32 to index
    %c0_50 = arith.constant 0 : index
    %50 = vector.load %arg3[%49, %c0_50] : memref<32x512xf32, #tpu.memory_space<vmem>>, vector<1x512xf32>
    %c12 = arith.constant 12 : index
    %c0_51 = arith.constant 0 : index
    %51 = vector.load %arg12[%c12, %c0_51] : memref<16x512xf32, #tpu.memory_space<vmem>>, vector<1x512xf32>
    tpu.vector_store %arg12[%c12, %c0_51], %50 {strides = array<i32>} : memref<16x512xf32, #tpu.memory_space<vmem>>, vector<1x512xf32>,
    %c1_52 = arith.constant 1 : index
    %c6_53 = arith.constant 6 : index
    %52 = memref.load %arg0[%c1_52, %c6_53] : memref<2x8xi32, #tpu.memory_space<smem>>
    %53 = arith.index_cast %52 : i32 to index
    %c0_54 = arith.constant 0 : index
    %54 = vector.load %arg3[%53, %c0_54] : memref<32x512xf32, #tpu.memory_space<vmem>>, vector<1x512xf32>
    %c13 = arith.constant 13 : index
    %c0_55 = arith.constant 0 : index
    %55 = vector.load %arg12[%c13, %c0_55] : memref<16x512xf32, #tpu.memory_space<vmem>>, vector<1x512xf32>
    tpu.vector_store %arg12[%c13, %c0_55], %54 {strides = array<i32>} : memref<16x512xf32, #tpu.memory_space<vmem>>, vector<1x512xf32>,
    %c0_56 = arith.constant 0 : index
    %c7_57 = arith.constant 7 : index
    %56 = memref.load %arg0[%c0_56, %c7_57] : memref<2x8xi32, #tpu.memory_space<smem>>
    %57 = arith.index_cast %56 : i32 to index
    %c0_58 = arith.constant 0 : index
    %58 = vector.load %arg3[%57, %c0_58] : memref<32x512xf32, #tpu.memory_space<vmem>>, vector<1x512xf32>
    %c14 = arith.constant 14 : index
    %c0_59 = arith.constant 0 : index
    %59 = vector.load %arg12[%c14, %c0_59] : memref<16x512xf32, #tpu.memory_space<vmem>>, vector<1x512xf32>
    tpu.vector_store %arg12[%c14, %c0_59], %58 {strides = array<i32>} : memref<16x512xf32, #tpu.memory_space<vmem>>, vector<1x512xf32>,
    %c1_60 = arith.constant 1 : index
    %c7_61 = arith.constant 7 : index
    %60 = memref.load %arg0[%c1_60, %c7_61] : memref<2x8xi32, #tpu.memory_space<smem>>
    %61 = arith.index_cast %60 : i32 to index
    %c0_62 = arith.constant 0 : index
    %62 = vector.load %arg3[%61, %c0_62] : memref<32x512xf32, #tpu.memory_space<vmem>>, vector<1x512xf32>
    %c15 = arith.constant 15 : index
    %c0_63 = arith.constant 0 : index
    %63 = vector.load %arg12[%c15, %c0_63] : memref<16x512xf32, #tpu.memory_space<vmem>>, vector<1x512xf32>
    tpu.vector_store %arg12[%c15, %c0_63], %62 {strides = array<i32>} : memref<16x512xf32, #tpu.memory_space<vmem>>, vector<1x512xf32>,
    %c0_64 = arith.constant 0 : index
    %c0_65 = arith.constant 0 : index
    %c0_66 = arith.constant 0 : index
    %64 = vector.load %arg5[%c0_64, %c0_65, %c0_66] : memref<3x128x512xbf16, #tpu.memory_space<vmem>>, vector<1x128x512xbf16>
    %65 = vector.shape_cast %64 : vector<1x128x512xbf16> to vector<128x512xbf16>
    %c0_67 = arith.constant 0 : index
    %c0_68 = arith.constant 0 : index
    %c0_69 = arith.constant 0 : index
    %66 = vector.load %arg1[%c0_67, %c0_68, %c0_69] : memref<3x2x128xf32, #tpu.memory_space<vmem>>, vector<1x2x128xf32>
    %67 = vector.shape_cast %66 : vector<1x2x128xf32> to vector<2x128xf32>
    %c0_70 = arith.constant 0 : index
    %c0_71 = arith.constant 0 : index
    %c0_72 = arith.constant 0 : index
    %68 = vector.load %arg2[%c0_70, %c0_71, %c0_72] : memref<3x2x128xf32, #tpu.memory_space<vmem>>, vector<1x2x128xf32>
    %69 = vector.shape_cast %68 : vector<1x2x128xf32> to vector<2x128xf32>
    %70 = arith.truncf %67 : vector<2x128xf32> to vector<2x128xbf16>
    %c0_73 = arith.constant 0 : index
    %c0_74 = arith.constant 0 : index
    %71 = vector.load %arg12[%c0_73, %c0_74] : memref<16x512xf32, #tpu.memory_space<vmem>>, vector<2x512xf32>
    %cst = arith.constant dense<0.000000e+00> : vector<2x512xf32>
    %72 = tpu.matmul %70, %65, %cst {dimension_numbers = #tpu.dot_dimension_numbers<[1], [0], [0], [1], [0, 0, 1, 1], [], []>} : vector<2x128xbf16>, vector<128x512xbf16>, vector<2x512xf32> -> vector<2x512xf32>
    %73 = arith.addf %71, %72 : vector<2x512xf32>
    %74 = vector.extract_strided_slice %73 {offsets = [0, 0], sizes = [2, 384], strides = [1, 1]} : vector<2x512xf32> to vector<2x384xf32>
    %75 = arith.negf %74 : vector<2x384xf32>
    %76 = math.exp %75 : vector<2x384xf32>
    %cst_75 = arith.constant 1.000000e+00 : f32
    %77 = vector.broadcast %cst_75 : f32 to vector<2x384xf32>
    %78 = arith.addf %77, %76 : vector<2x384xf32>
    %79 = arith.divf %77, %78 : vector<2x384xf32>
    %80 = vector.extract_strided_slice %73 {offsets = [0, 384], sizes = [2, 128], strides = [1, 1]} : vector<2x512xf32> to vector<2x128xf32>
    %81 = math.tanh %80 : vector<2x128xf32>
    %82 = vector.extract_strided_slice %79 {offsets = [0, 128], sizes = [2, 128], strides = [1, 1]} : vector<2x384xf32> to vector<2x128xf32>
    %83 = arith.mulf %82, %69 : vector<2x128xf32>
    %84 = vector.extract_strided_slice %79 {offsets = [0, 0], sizes = [2, 128], strides = [1, 1]} : vector<2x384xf32> to vector<2x128xf32>
    %85 = arith.mulf %84, %81 : vector<2x128xf32>
    %86 = arith.addf %83, %85 : vector<2x128xf32>
    %87 = vector.extract_strided_slice %79 {offsets = [0, 256], sizes = [2, 128], strides = [1, 1]} : vector<2x384xf32> to vector<2x128xf32>
    %88 = math.tanh %86 : vector<2x128xf32>
    %89 = arith.mulf %87, %88 : vector<2x128xf32>
    %90 = arith.truncf %89 : vector<2x128xf32> to vector<2x128xbf16>
    %c0_76 = arith.constant 0 : index
    %c0_77 = arith.constant 0 : index
    %91 = vector.load %arg13[%c0_76, %c0_77] : memref<16x128xbf16, #tpu.memory_space<vmem>>, vector<2x128xbf16>
    tpu.vector_store %arg13[%c0_76, %c0_77], %90 {strides = array<i32>} : memref<16x128xbf16, #tpu.memory_space<vmem>>, vector<2x128xbf16>,
    %c2_78 = arith.constant 2 : index
    %c0_79 = arith.constant 0 : index
    %92 = vector.load %arg12[%c2_78, %c0_79] : memref<16x512xf32, #tpu.memory_space<vmem>>, vector<2x512xf32>
    %cst_80 = arith.constant dense<0.000000e+00> : vector<2x512xf32>
    %93 = tpu.matmul %90, %65, %cst_80 {dimension_numbers = #tpu.dot_dimension_numbers<[1], [0], [0], [1], [0, 0, 1, 1], [], []>} : vector<2x128xbf16>, vector<128x512xbf16>, vector<2x512xf32> -> vector<2x512xf32>
    %94 = arith.addf %92, %93 : vector<2x512xf32>
    %95 = vector.extract_strided_slice %94 {offsets = [0, 0], sizes = [2, 384], strides = [1, 1]} : vector<2x512xf32> to vector<2x384xf32>
    %96 = arith.negf %95 : vector<2x384xf32>
    %97 = math.exp %96 : vector<2x384xf32>
    %cst_81 = arith.constant 1.000000e+00 : f32
    %98 = vector.broadcast %cst_81 : f32 to vector<2x384xf32>
    %99 = arith.addf %98, %97 : vector<2x384xf32>
    %100 = arith.divf %98, %99 : vector<2x384xf32>
    %101 = vector.extract_strided_slice %94 {offsets = [0, 384], sizes = [2, 128], strides = [1, 1]} : vector<2x512xf32> to vector<2x128xf32>
    %102 = math.tanh %101 : vector<2x128xf32>
    %103 = vector.extract_strided_slice %100 {offsets = [0, 128], sizes = [2, 128], strides = [1, 1]} : vector<2x384xf32> to vector<2x128xf32>
    %104 = arith.mulf %103, %86 : vector<2x128xf32>
    %105 = vector.extract_strided_slice %100 {offsets = [0, 0], sizes = [2, 128], strides = [1, 1]} : vector<2x384xf32> to vector<2x128xf32>
    %106 = arith.mulf %105, %102 : vector<2x128xf32>
    %107 = arith.addf %104, %106 : vector<2x128xf32>
    %108 = vector.extract_strided_slice %100 {offsets = [0, 256], sizes = [2, 128], strides = [1, 1]} : vector<2x384xf32> to vector<2x128xf32>
    %109 = math.tanh %107 : vector<2x128xf32>
    %110 = arith.mulf %108, %109 : vector<2x128xf32>
    %111 = arith.truncf %110 : vector<2x128xf32> to vector<2x128xbf16>
    %c2_82 = arith.constant 2 : index
    %c0_83 = arith.constant 0 : index
    %112 = vector.load %arg13[%c2_82, %c0_83] : memref<16x128xbf16, #tpu.memory_space<vmem>>, vector<2x128xbf16>
    tpu.vector_store %arg13[%c2_82, %c0_83], %111 {strides = array<i32>} : memref<16x128xbf16, #tpu.memory_space<vmem>>, vector<2x128xbf16>,
    %c4_84 = arith.constant 4 : index
    %c0_85 = arith.constant 0 : index
    %113 = vector.load %arg12[%c4_84, %c0_85] : memref<16x512xf32, #tpu.memory_space<vmem>>, vector<2x512xf32>
    %cst_86 = arith.constant dense<0.000000e+00> : vector<2x512xf32>
    %114 = tpu.matmul %111, %65, %cst_86 {dimension_numbers = #tpu.dot_dimension_numbers<[1], [0], [0], [1], [0, 0, 1, 1], [], []>} : vector<2x128xbf16>, vector<128x512xbf16>, vector<2x512xf32> -> vector<2x512xf32>
    %115 = arith.addf %113, %114 : vector<2x512xf32>
    %116 = vector.extract_strided_slice %115 {offsets = [0, 0], sizes = [2, 384], strides = [1, 1]} : vector<2x512xf32> to vector<2x384xf32>
    %117 = arith.negf %116 : vector<2x384xf32>
    %118 = math.exp %117 : vector<2x384xf32>
    %cst_87 = arith.constant 1.000000e+00 : f32
    %119 = vector.broadcast %cst_87 : f32 to vector<2x384xf32>
    %120 = arith.addf %119, %118 : vector<2x384xf32>
    %121 = arith.divf %119, %120 : vector<2x384xf32>
    %122 = vector.extract_strided_slice %115 {offsets = [0, 384], sizes = [2, 128], strides = [1, 1]} : vector<2x512xf32> to vector<2x128xf32>
    %123 = math.tanh %122 : vector<2x128xf32>
    %124 = vector.extract_strided_slice %121 {offsets = [0, 128], sizes = [2, 128], strides = [1, 1]} : vector<2x384xf32> to vector<2x128xf32>
    %125 = arith.mulf %124, %107 : vector<2x128xf32>
    %126 = vector.extract_strided_slice %121 {offsets = [0, 0], sizes = [2, 128], strides = [1, 1]} : vector<2x384xf32> to vector<2x128xf32>
    %127 = arith.mulf %126, %123 : vector<2x128xf32>
    %128 = arith.addf %125, %127 : vector<2x128xf32>
    %129 = vector.extract_strided_slice %121 {offsets = [0, 256], sizes = [2, 128], strides = [1, 1]} : vector<2x384xf32> to vector<2x128xf32>
    %130 = math.tanh %128 : vector<2x128xf32>
    %131 = arith.mulf %129, %130 : vector<2x128xf32>
    %132 = arith.truncf %131 : vector<2x128xf32> to vector<2x128xbf16>
    %c4_88 = arith.constant 4 : index
    %c0_89 = arith.constant 0 : index
    %133 = vector.load %arg13[%c4_88, %c0_89] : memref<16x128xbf16, #tpu.memory_space<vmem>>, vector<2x128xbf16>
    tpu.vector_store %arg13[%c4_88, %c0_89], %132 {strides = array<i32>} : memref<16x128xbf16, #tpu.memory_space<vmem>>, vector<2x128xbf16>,
    %c6_90 = arith.constant 6 : index
    %c0_91 = arith.constant 0 : index
    %134 = vector.load %arg12[%c6_90, %c0_91] : memref<16x512xf32, #tpu.memory_space<vmem>>, vector<2x512xf32>
    %cst_92 = arith.constant dense<0.000000e+00> : vector<2x512xf32>
    %135 = tpu.matmul %132, %65, %cst_92 {dimension_numbers = #tpu.dot_dimension_numbers<[1], [0], [0], [1], [0, 0, 1, 1], [], []>} : vector<2x128xbf16>, vector<128x512xbf16>, vector<2x512xf32> -> vector<2x512xf32>
    %136 = arith.addf %134, %135 : vector<2x512xf32>
    %137 = vector.extract_strided_slice %136 {offsets = [0, 0], sizes = [2, 384], strides = [1, 1]} : vector<2x512xf32> to vector<2x384xf32>
    %138 = arith.negf %137 : vector<2x384xf32>
    %139 = math.exp %138 : vector<2x384xf32>
    %cst_93 = arith.constant 1.000000e+00 : f32
    %140 = vector.broadcast %cst_93 : f32 to vector<2x384xf32>
    %141 = arith.addf %140, %139 : vector<2x384xf32>
    %142 = arith.divf %140, %141 : vector<2x384xf32>
    %143 = vector.extract_strided_slice %136 {offsets = [0, 384], sizes = [2, 128], strides = [1, 1]} : vector<2x512xf32> to vector<2x128xf32>
    %144 = math.tanh %143 : vector<2x128xf32>
    %145 = vector.extract_strided_slice %142 {offsets = [0, 128], sizes = [2, 128], strides = [1, 1]} : vector<2x384xf32> to vector<2x128xf32>
    %146 = arith.mulf %145, %128 : vector<2x128xf32>
    %147 = vector.extract_strided_slice %142 {offsets = [0, 0], sizes = [2, 128], strides = [1, 1]} : vector<2x384xf32> to vector<2x128xf32>
    %148 = arith.mulf %147, %144 : vector<2x128xf32>
    %149 = arith.addf %146, %148 : vector<2x128xf32>
    %150 = vector.extract_strided_slice %142 {offsets = [0, 256], sizes = [2, 128], strides = [1, 1]} : vector<2x384xf32> to vector<2x128xf32>
    %151 = math.tanh %149 : vector<2x128xf32>
    %152 = arith.mulf %150, %151 : vector<2x128xf32>
    %153 = arith.truncf %152 : vector<2x128xf32> to vector<2x128xbf16>
    %c6_94 = arith.constant 6 : index
    %c0_95 = arith.constant 0 : index
    %154 = vector.load %arg13[%c6_94, %c0_95] : memref<16x128xbf16, #tpu.memory_space<vmem>>, vector<2x128xbf16>
    tpu.vector_store %arg13[%c6_94, %c0_95], %153 {strides = array<i32>} : memref<16x128xbf16, #tpu.memory_space<vmem>>, vector<2x128xbf16>,
    %c8_96 = arith.constant 8 : index
    %c0_97 = arith.constant 0 : index
    %155 = vector.load %arg12[%c8_96, %c0_97] : memref<16x512xf32, #tpu.memory_space<vmem>>, vector<2x512xf32>
    %cst_98 = arith.constant dense<0.000000e+00> : vector<2x512xf32>
    %156 = tpu.matmul %153, %65, %cst_98 {dimension_numbers = #tpu.dot_dimension_numbers<[1], [0], [0], [1], [0, 0, 1, 1], [], []>} : vector<2x128xbf16>, vector<128x512xbf16>, vector<2x512xf32> -> vector<2x512xf32>
    %157 = arith.addf %155, %156 : vector<2x512xf32>
    %158 = vector.extract_strided_slice %157 {offsets = [0, 0], sizes = [2, 384], strides = [1, 1]} : vector<2x512xf32> to vector<2x384xf32>
    %159 = arith.negf %158 : vector<2x384xf32>
    %160 = math.exp %159 : vector<2x384xf32>
    %cst_99 = arith.constant 1.000000e+00 : f32
    %161 = vector.broadcast %cst_99 : f32 to vector<2x384xf32>
    %162 = arith.addf %161, %160 : vector<2x384xf32>
    %163 = arith.divf %161, %162 : vector<2x384xf32>
    %164 = vector.extract_strided_slice %157 {offsets = [0, 384], sizes = [2, 128], strides = [1, 1]} : vector<2x512xf32> to vector<2x128xf32>
    %165 = math.tanh %164 : vector<2x128xf32>
    %166 = vector.extract_strided_slice %163 {offsets = [0, 128], sizes = [2, 128], strides = [1, 1]} : vector<2x384xf32> to vector<2x128xf32>
    %167 = arith.mulf %166, %149 : vector<2x128xf32>
    %168 = vector.extract_strided_slice %163 {offsets = [0, 0], sizes = [2, 128], strides = [1, 1]} : vector<2x384xf32> to vector<2x128xf32>
    %169 = arith.mulf %168, %165 : vector<2x128xf32>
    %170 = arith.addf %167, %169 : vector<2x128xf32>
    %171 = vector.extract_strided_slice %163 {offsets = [0, 256], sizes = [2, 128], strides = [1, 1]} : vector<2x384xf32> to vector<2x128xf32>
    %172 = math.tanh %170 : vector<2x128xf32>
    %173 = arith.mulf %171, %172 : vector<2x128xf32>
    %174 = arith.truncf %173 : vector<2x128xf32> to vector<2x128xbf16>
    %c8_100 = arith.constant 8 : index
    %c0_101 = arith.constant 0 : index
    %175 = vector.load %arg13[%c8_100, %c0_101] : memref<16x128xbf16, #tpu.memory_space<vmem>>, vector<2x128xbf16>
    tpu.vector_store %arg13[%c8_100, %c0_101], %174 {strides = array<i32>} : memref<16x128xbf16, #tpu.memory_space<vmem>>, vector<2x128xbf16>,
    %c10_102 = arith.constant 10 : index
    %c0_103 = arith.constant 0 : index
    %176 = vector.load %arg12[%c10_102, %c0_103] : memref<16x512xf32, #tpu.memory_space<vmem>>, vector<2x512xf32>
    %cst_104 = arith.constant dense<0.000000e+00> : vector<2x512xf32>
    %177 = tpu.matmul %174, %65, %cst_104 {dimension_numbers = #tpu.dot_dimension_numbers<[1], [0], [0], [1], [0, 0, 1, 1], [], []>} : vector<2x128xbf16>, vector<128x512xbf16>, vector<2x512xf32> -> vector<2x512xf32>
    %178 = arith.addf %176, %177 : vector<2x512xf32>
    %179 = vector.extract_strided_slice %178 {offsets = [0, 0], sizes = [2, 384], strides = [1, 1]} : vector<2x512xf32> to vector<2x384xf32>
    %180 = arith.negf %179 : vector<2x384xf32>
    %181 = math.exp %180 : vector<2x384xf32>
    %cst_105 = arith.constant 1.000000e+00 : f32
    %182 = vector.broadcast %cst_105 : f32 to vector<2x384xf32>
    %183 = arith.addf %182, %181 : vector<2x384xf32>
    %184 = arith.divf %182, %183 : vector<2x384xf32>
    %185 = vector.extract_strided_slice %178 {offsets = [0, 384], sizes = [2, 128], strides = [1, 1]} : vector<2x512xf32> to vector<2x128xf32>
    %186 = math.tanh %185 : vector<2x128xf32>
    %187 = vector.extract_strided_slice %184 {offsets = [0, 128], sizes = [2, 128], strides = [1, 1]} : vector<2x384xf32> to vector<2x128xf32>
    %188 = arith.mulf %187, %170 : vector<2x128xf32>
    %189 = vector.extract_strided_slice %184 {offsets = [0, 0], sizes = [2, 128], strides = [1, 1]} : vector<2x384xf32> to vector<2x128xf32>
    %190 = arith.mulf %189, %186 : vector<2x128xf32>
    %191 = arith.addf %188, %190 : vector<2x128xf32>
    %192 = vector.extract_strided_slice %184 {offsets = [0, 256], sizes = [2, 128], strides = [1, 1]} : vector<2x384xf32> to vector<2x128xf32>
    %193 = math.tanh %191 : vector<2x128xf32>
    %194 = arith.mulf %192, %193 : vector<2x128xf32>
    %195 = arith.truncf %194 : vector<2x128xf32> to vector<2x128xbf16>
    %c10_106 = arith.constant 10 : index
    %c0_107 = arith.constant 0 : index
    %196 = vector.load %arg13[%c10_106, %c0_107] : memref<16x128xbf16, #tpu.memory_space<vmem>>, vector<2x128xbf16>
    tpu.vector_store %arg13[%c10_106, %c0_107], %195 {strides = array<i32>} : memref<16x128xbf16, #tpu.memory_space<vmem>>, vector<2x128xbf16>,
    %c12_108 = arith.constant 12 : index
    %c0_109 = arith.constant 0 : index
    %197 = vector.load %arg12[%c12_108, %c0_109] : memref<16x512xf32, #tpu.memory_space<vmem>>, vector<2x512xf32>
    %cst_110 = arith.constant dense<0.000000e+00> : vector<2x512xf32>
    %198 = tpu.matmul %195, %65, %cst_110 {dimension_numbers = #tpu.dot_dimension_numbers<[1], [0], [0], [1], [0, 0, 1, 1], [], []>} : vector<2x128xbf16>, vector<128x512xbf16>, vector<2x512xf32> -> vector<2x512xf32>
    %199 = arith.addf %197, %198 : vector<2x512xf32>
    %200 = vector.extract_strided_slice %199 {offsets = [0, 0], sizes = [2, 384], strides = [1, 1]} : vector<2x512xf32> to vector<2x384xf32>
    %201 = arith.negf %200 : vector<2x384xf32>
    %202 = math.exp %201 : vector<2x384xf32>
    %cst_111 = arith.constant 1.000000e+00 : f32
    %203 = vector.broadcast %cst_111 : f32 to vector<2x384xf32>
    %204 = arith.addf %203, %202 : vector<2x384xf32>
    %205 = arith.divf %203, %204 : vector<2x384xf32>
    %206 = vector.extract_strided_slice %199 {offsets = [0, 384], sizes = [2, 128], strides = [1, 1]} : vector<2x512xf32> to vector<2x128xf32>
    %207 = math.tanh %206 : vector<2x128xf32>
    %208 = vector.extract_strided_slice %205 {offsets = [0, 128], sizes = [2, 128], strides = [1, 1]} : vector<2x384xf32> to vector<2x128xf32>
    %209 = arith.mulf %208, %191 : vector<2x128xf32>
    %210 = vector.extract_strided_slice %205 {offsets = [0, 0], sizes = [2, 128], strides = [1, 1]} : vector<2x384xf32> to vector<2x128xf32>
    %211 = arith.mulf %210, %207 : vector<2x128xf32>
    %212 = arith.addf %209, %211 : vector<2x128xf32>
    %213 = vector.extract_strided_slice %205 {offsets = [0, 256], sizes = [2, 128], strides = [1, 1]} : vector<2x384xf32> to vector<2x128xf32>
    %214 = math.tanh %212 : vector<2x128xf32>
    %215 = arith.mulf %213, %214 : vector<2x128xf32>
    %216 = arith.truncf %215 : vector<2x128xf32> to vector<2x128xbf16>
    %c12_112 = arith.constant 12 : index
    %c0_113 = arith.constant 0 : index
    %217 = vector.load %arg13[%c12_112, %c0_113] : memref<16x128xbf16, #tpu.memory_space<vmem>>, vector<2x128xbf16>
    tpu.vector_store %arg13[%c12_112, %c0_113], %216 {strides = array<i32>} : memref<16x128xbf16, #tpu.memory_space<vmem>>, vector<2x128xbf16>,
    %c14_114 = arith.constant 14 : index
    %c0_115 = arith.constant 0 : index
    %218 = vector.load %arg12[%c14_114, %c0_115] : memref<16x512xf32, #tpu.memory_space<vmem>>, vector<2x512xf32>
    %cst_116 = arith.constant dense<0.000000e+00> : vector<2x512xf32>
    %219 = tpu.matmul %216, %65, %cst_116 {dimension_numbers = #tpu.dot_dimension_numbers<[1], [0], [0], [1], [0, 0, 1, 1], [], []>} : vector<2x128xbf16>, vector<128x512xbf16>, vector<2x512xf32> -> vector<2x512xf32>
    %220 = arith.addf %218, %219 : vector<2x512xf32>
    %221 = vector.extract_strided_slice %220 {offsets = [0, 0], sizes = [2, 384], strides = [1, 1]} : vector<2x512xf32> to vector<2x384xf32>
    %222 = arith.negf %221 : vector<2x384xf32>
    %223 = math.exp %222 : vector<2x384xf32>
    %cst_117 = arith.constant 1.000000e+00 : f32
    %224 = vector.broadcast %cst_117 : f32 to vector<2x384xf32>
    %225 = arith.addf %224, %223 : vector<2x384xf32>
    %226 = arith.divf %224, %225 : vector<2x384xf32>
    %227 = vector.extract_strided_slice %220 {offsets = [0, 384], sizes = [2, 128], strides = [1, 1]} : vector<2x512xf32> to vector<2x128xf32>
    %228 = math.tanh %227 : vector<2x128xf32>
    %229 = vector.extract_strided_slice %226 {offsets = [0, 128], sizes = [2, 128], strides = [1, 1]} : vector<2x384xf32> to vector<2x128xf32>
    %230 = arith.mulf %229, %212 : vector<2x128xf32>
    %231 = vector.extract_strided_slice %226 {offsets = [0, 0], sizes = [2, 128], strides = [1, 1]} : vector<2x384xf32> to vector<2x128xf32>
    %232 = arith.mulf %231, %228 : vector<2x128xf32>
    %233 = arith.addf %230, %232 : vector<2x128xf32>
    %234 = vector.extract_strided_slice %226 {offsets = [0, 256], sizes = [2, 128], strides = [1, 1]} : vector<2x384xf32> to vector<2x128xf32>
    %235 = math.tanh %233 : vector<2x128xf32>
    %236 = arith.mulf %234, %235 : vector<2x128xf32>
    %237 = arith.truncf %236 : vector<2x128xf32> to vector<2x128xbf16>
    %c14_118 = arith.constant 14 : index
    %c0_119 = arith.constant 0 : index
    %238 = vector.load %arg13[%c14_118, %c0_119] : memref<16x128xbf16, #tpu.memory_space<vmem>>, vector<2x128xbf16>
    tpu.vector_store %arg13[%c14_118, %c0_119], %237 {strides = array<i32>} : memref<16x128xbf16, #tpu.memory_space<vmem>>, vector<2x128xbf16>,
    %c0_120 = arith.constant 0 : index
    %c0_121 = arith.constant 0 : index
    %c0_122 = arith.constant 0 : index
    %239 = vector.load %arg10[%c0_120, %c0_121, %c0_122] : memref<3x2x128xf32, #tpu.memory_space<vmem>>, vector<1x2x128xf32>
    %240 = vector.shape_cast %239 : vector<1x2x128xf32> to vector<2x128xf32>
    %241 = vector.shape_cast %236 : vector<2x128xf32> to vector<1x2x128xf32>
    tpu.vector_store %arg10[%c0_120, %c0_121, %c0_122], %241 {strides = array<i32>} : memref<3x2x128xf32, #tpu.memory_space<vmem>>, vector<1x2x128xf32>,
    %c0_123 = arith.constant 0 : index
    %c0_124 = arith.constant 0 : index
    %c0_125 = arith.constant 0 : index
    %242 = vector.load %arg11[%c0_123, %c0_124, %c0_125] : memref<3x2x128xf32, #tpu.memory_space<vmem>>, vector<1x2x128xf32>
    %243 = vector.shape_cast %242 : vector<1x2x128xf32> to vector<2x128xf32>
    %244 = vector.shape_cast %233 : vector<2x128xf32> to vector<1x2x128xf32>
    tpu.vector_store %arg11[%c0_123, %c0_124, %c0_125], %244 {strides = array<i32>} : memref<3x2x128xf32, #tpu.memory_space<vmem>>, vector<1x2x128xf32>,
    %c1_126 = arith.constant 1 : index
    %c0_127 = arith.constant 0 : index
    %c0_128 = arith.constant 0 : index
    %245 = vector.load %arg5[%c1_126, %c0_127, %c0_128] : memref<3x128x512xbf16, #tpu.memory_space<vmem>>, vector<1x128x512xbf16>
    %246 = vector.shape_cast %245 : vector<1x128x512xbf16> to vector<128x512xbf16>
    %c0_129 = arith.constant 0 : index
    %c0_130 = arith.constant 0 : index
    %247 = vector.load %arg13[%c0_129, %c0_130] : memref<16x128xbf16, #tpu.memory_space<vmem>>, vector<16x128xbf16>
    %c0_131 = arith.constant 0 : index
    %c0_132 = arith.constant 0 : index
    %c0_133 = arith.constant 0 : index
    %248 = vector.load %arg4[%c0_131, %c0_132, %c0_133] : memref<2x128x512xbf16, #tpu.memory_space<vmem>>, vector<1x128x512xbf16>
    %249 = vector.shape_cast %248 : vector<1x128x512xbf16> to vector<128x512xbf16>
    %cst_134 = arith.constant dense<0.000000e+00> : vector<16x512xf32>
    %250 = tpu.matmul %247, %249, %cst_134 {dimension_numbers = #tpu.dot_dimension_numbers<[1], [0], [0], [1], [0, 0, 1, 1], [], []>} : vector<16x128xbf16>, vector<128x512xbf16>, vector<16x512xf32> -> vector<16x512xf32>
    %c0_135 = arith.constant 0 : index
    %c0_136 = arith.constant 0 : index
    %c0_137 = arith.constant 0 : index
    %251 = vector.load %arg6[%c0_135, %c0_136, %c0_137] : memref<2x1x512xf32, #tpu.memory_space<vmem>>, vector<1x1x512xf32>
    %252 = vector.shape_cast %251 : vector<1x1x512xf32> to vector<1x512xf32>
    %253 = vector.broadcast %252 : vector<1x512xf32> to vector<16x512xf32>
    %254 = arith.addf %250, %253 : vector<16x512xf32>
    %c0_138 = arith.constant 0 : index
    %c0_139 = arith.constant 0 : index
    %255 = vector.load %arg12[%c0_138, %c0_139] : memref<16x512xf32, #tpu.memory_space<vmem>>, vector<16x512xf32>
    tpu.vector_store %arg12[%c0_138, %c0_139], %254 {strides = array<i32>} : memref<16x512xf32, #tpu.memory_space<vmem>>, vector<16x512xf32>,
    %c1_140 = arith.constant 1 : index
    %c0_141 = arith.constant 0 : index
    %c0_142 = arith.constant 0 : index
    %256 = vector.load %arg1[%c1_140, %c0_141, %c0_142] : memref<3x2x128xf32, #tpu.memory_space<vmem>>, vector<1x2x128xf32>
    %257 = vector.shape_cast %256 : vector<1x2x128xf32> to vector<2x128xf32>
    %c1_143 = arith.constant 1 : index
    %c0_144 = arith.constant 0 : index
    %c0_145 = arith.constant 0 : index
    %258 = vector.load %arg2[%c1_143, %c0_144, %c0_145] : memref<3x2x128xf32, #tpu.memory_space<vmem>>, vector<1x2x128xf32>
    %259 = vector.shape_cast %258 : vector<1x2x128xf32> to vector<2x128xf32>
    %260 = arith.truncf %257 : vector<2x128xf32> to vector<2x128xbf16>
    %c0_146 = arith.constant 0 : index
    %c0_147 = arith.constant 0 : index
    %261 = vector.load %arg12[%c0_146, %c0_147] : memref<16x512xf32, #tpu.memory_space<vmem>>, vector<2x512xf32>
    %cst_148 = arith.constant dense<0.000000e+00> : vector<2x512xf32>
    %262 = tpu.matmul %260, %246, %cst_148 {dimension_numbers = #tpu.dot_dimension_numbers<[1], [0], [0], [1], [0, 0, 1, 1], [], []>} : vector<2x128xbf16>, vector<128x512xbf16>, vector<2x512xf32> -> vector<2x512xf32>
    %263 = arith.addf %261, %262 : vector<2x512xf32>
    %264 = vector.extract_strided_slice %263 {offsets = [0, 0], sizes = [2, 384], strides = [1, 1]} : vector<2x512xf32> to vector<2x384xf32>
    %265 = arith.negf %264 : vector<2x384xf32>
    %266 = math.exp %265 : vector<2x384xf32>
    %cst_149 = arith.constant 1.000000e+00 : f32
    %267 = vector.broadcast %cst_149 : f32 to vector<2x384xf32>
    %268 = arith.addf %267, %266 : vector<2x384xf32>
    %269 = arith.divf %267, %268 : vector<2x384xf32>
    %270 = vector.extract_strided_slice %263 {offsets = [0, 384], sizes = [2, 128], strides = [1, 1]} : vector<2x512xf32> to vector<2x128xf32>
    %271 = math.tanh %270 : vector<2x128xf32>
    %272 = vector.extract_strided_slice %269 {offsets = [0, 128], sizes = [2, 128], strides = [1, 1]} : vector<2x384xf32> to vector<2x128xf32>
    %273 = arith.mulf %272, %259 : vector<2x128xf32>
    %274 = vector.extract_strided_slice %269 {offsets = [0, 0], sizes = [2, 128], strides = [1, 1]} : vector<2x384xf32> to vector<2x128xf32>
    %275 = arith.mulf %274, %271 : vector<2x128xf32>
    %276 = arith.addf %273, %275 : vector<2x128xf32>
    %277 = vector.extract_strided_slice %269 {offsets = [0, 256], sizes = [2, 128], strides = [1, 1]} : vector<2x384xf32> to vector<2x128xf32>
    %278 = math.tanh %276 : vector<2x128xf32>
    %279 = arith.mulf %277, %278 : vector<2x128xf32>
    %280 = arith.truncf %279 : vector<2x128xf32> to vector<2x128xbf16>
    %c0_150 = arith.constant 0 : index
    %c0_151 = arith.constant 0 : index
    %281 = vector.load %arg13[%c0_150, %c0_151] : memref<16x128xbf16, #tpu.memory_space<vmem>>, vector<2x128xbf16>
    tpu.vector_store %arg13[%c0_150, %c0_151], %280 {strides = array<i32>} : memref<16x128xbf16, #tpu.memory_space<vmem>>, vector<2x128xbf16>,
    %c2_152 = arith.constant 2 : index
    %c0_153 = arith.constant 0 : index
    %282 = vector.load %arg12[%c2_152, %c0_153] : memref<16x512xf32, #tpu.memory_space<vmem>>, vector<2x512xf32>
    %cst_154 = arith.constant dense<0.000000e+00> : vector<2x512xf32>
    %283 = tpu.matmul %280, %246, %cst_154 {dimension_numbers = #tpu.dot_dimension_numbers<[1], [0], [0], [1], [0, 0, 1, 1], [], []>} : vector<2x128xbf16>, vector<128x512xbf16>, vector<2x512xf32> -> vector<2x512xf32>
    %284 = arith.addf %282, %283 : vector<2x512xf32>
    %285 = vector.extract_strided_slice %284 {offsets = [0, 0], sizes = [2, 384], strides = [1, 1]} : vector<2x512xf32> to vector<2x384xf32>
    %286 = arith.negf %285 : vector<2x384xf32>
    %287 = math.exp %286 : vector<2x384xf32>
    %cst_155 = arith.constant 1.000000e+00 : f32
    %288 = vector.broadcast %cst_155 : f32 to vector<2x384xf32>
    %289 = arith.addf %288, %287 : vector<2x384xf32>
    %290 = arith.divf %288, %289 : vector<2x384xf32>
    %291 = vector.extract_strided_slice %284 {offsets = [0, 384], sizes = [2, 128], strides = [1, 1]} : vector<2x512xf32> to vector<2x128xf32>
    %292 = math.tanh %291 : vector<2x128xf32>
    %293 = vector.extract_strided_slice %290 {offsets = [0, 128], sizes = [2, 128], strides = [1, 1]} : vector<2x384xf32> to vector<2x128xf32>
    %294 = arith.mulf %293, %276 : vector<2x128xf32>
    %295 = vector.extract_strided_slice %290 {offsets = [0, 0], sizes = [2, 128], strides = [1, 1]} : vector<2x384xf32> to vector<2x128xf32>
    %296 = arith.mulf %295, %292 : vector<2x128xf32>
    %297 = arith.addf %294, %296 : vector<2x128xf32>
    %298 = vector.extract_strided_slice %290 {offsets = [0, 256], sizes = [2, 128], strides = [1, 1]} : vector<2x384xf32> to vector<2x128xf32>
    %299 = math.tanh %297 : vector<2x128xf32>
    %300 = arith.mulf %298, %299 : vector<2x128xf32>
    %301 = arith.truncf %300 : vector<2x128xf32> to vector<2x128xbf16>
    %c2_156 = arith.constant 2 : index
    %c0_157 = arith.constant 0 : index
    %302 = vector.load %arg13[%c2_156, %c0_157] : memref<16x128xbf16, #tpu.memory_space<vmem>>, vector<2x128xbf16>
    tpu.vector_store %arg13[%c2_156, %c0_157], %301 {strides = array<i32>} : memref<16x128xbf16, #tpu.memory_space<vmem>>, vector<2x128xbf16>,
    %c4_158 = arith.constant 4 : index
    %c0_159 = arith.constant 0 : index
    %303 = vector.load %arg12[%c4_158, %c0_159] : memref<16x512xf32, #tpu.memory_space<vmem>>, vector<2x512xf32>
    %cst_160 = arith.constant dense<0.000000e+00> : vector<2x512xf32>
    %304 = tpu.matmul %301, %246, %cst_160 {dimension_numbers = #tpu.dot_dimension_numbers<[1], [0], [0], [1], [0, 0, 1, 1], [], []>} : vector<2x128xbf16>, vector<128x512xbf16>, vector<2x512xf32> -> vector<2x512xf32>
    %305 = arith.addf %303, %304 : vector<2x512xf32>
    %306 = vector.extract_strided_slice %305 {offsets = [0, 0], sizes = [2, 384], strides = [1, 1]} : vector<2x512xf32> to vector<2x384xf32>
    %307 = arith.negf %306 : vector<2x384xf32>
    %308 = math.exp %307 : vector<2x384xf32>
    %cst_161 = arith.constant 1.000000e+00 : f32
    %309 = vector.broadcast %cst_161 : f32 to vector<2x384xf32>
    %310 = arith.addf %309, %308 : vector<2x384xf32>
    %311 = arith.divf %309, %310 : vector<2x384xf32>
    %312 = vector.extract_strided_slice %305 {offsets = [0, 384], sizes = [2, 128], strides = [1, 1]} : vector<2x512xf32> to vector<2x128xf32>
    %313 = math.tanh %312 : vector<2x128xf32>
    %314 = vector.extract_strided_slice %311 {offsets = [0, 128], sizes = [2, 128], strides = [1, 1]} : vector<2x384xf32> to vector<2x128xf32>
    %315 = arith.mulf %314, %297 : vector<2x128xf32>
    %316 = vector.extract_strided_slice %311 {offsets = [0, 0], sizes = [2, 128], strides = [1, 1]} : vector<2x384xf32> to vector<2x128xf32>
    %317 = arith.mulf %316, %313 : vector<2x128xf32>
    %318 = arith.addf %315, %317 : vector<2x128xf32>
    %319 = vector.extract_strided_slice %311 {offsets = [0, 256], sizes = [2, 128], strides = [1, 1]} : vector<2x384xf32> to vector<2x128xf32>
    %320 = math.tanh %318 : vector<2x128xf32>
    %321 = arith.mulf %319, %320 : vector<2x128xf32>
    %322 = arith.truncf %321 : vector<2x128xf32> to vector<2x128xbf16>
    %c4_162 = arith.constant 4 : index
    %c0_163 = arith.constant 0 : index
    %323 = vector.load %arg13[%c4_162, %c0_163] : memref<16x128xbf16, #tpu.memory_space<vmem>>, vector<2x128xbf16>
    tpu.vector_store %arg13[%c4_162, %c0_163], %322 {strides = array<i32>} : memref<16x128xbf16, #tpu.memory_space<vmem>>, vector<2x128xbf16>,
    %c6_164 = arith.constant 6 : index
    %c0_165 = arith.constant 0 : index
    %324 = vector.load %arg12[%c6_164, %c0_165] : memref<16x512xf32, #tpu.memory_space<vmem>>, vector<2x512xf32>
    %cst_166 = arith.constant dense<0.000000e+00> : vector<2x512xf32>
    %325 = tpu.matmul %322, %246, %cst_166 {dimension_numbers = #tpu.dot_dimension_numbers<[1], [0], [0], [1], [0, 0, 1, 1], [], []>} : vector<2x128xbf16>, vector<128x512xbf16>, vector<2x512xf32> -> vector<2x512xf32>
    %326 = arith.addf %324, %325 : vector<2x512xf32>
    %327 = vector.extract_strided_slice %326 {offsets = [0, 0], sizes = [2, 384], strides = [1, 1]} : vector<2x512xf32> to vector<2x384xf32>
    %328 = arith.negf %327 : vector<2x384xf32>
    %329 = math.exp %328 : vector<2x384xf32>
    %cst_167 = arith.constant 1.000000e+00 : f32
    %330 = vector.broadcast %cst_167 : f32 to vector<2x384xf32>
    %331 = arith.addf %330, %329 : vector<2x384xf32>
    %332 = arith.divf %330, %331 : vector<2x384xf32>
    %333 = vector.extract_strided_slice %326 {offsets = [0, 384], sizes = [2, 128], strides = [1, 1]} : vector<2x512xf32> to vector<2x128xf32>
    %334 = math.tanh %333 : vector<2x128xf32>
    %335 = vector.extract_strided_slice %332 {offsets = [0, 128], sizes = [2, 128], strides = [1, 1]} : vector<2x384xf32> to vector<2x128xf32>
    %336 = arith.mulf %335, %318 : vector<2x128xf32>
    %337 = vector.extract_strided_slice %332 {offsets = [0, 0], sizes = [2, 128], strides = [1, 1]} : vector<2x384xf32> to vector<2x128xf32>
    %338 = arith.mulf %337, %334 : vector<2x128xf32>
    %339 = arith.addf %336, %338 : vector<2x128xf32>
    %340 = vector.extract_strided_slice %332 {offsets = [0, 256], sizes = [2, 128], strides = [1, 1]} : vector<2x384xf32> to vector<2x128xf32>
    %341 = math.tanh %339 : vector<2x128xf32>
    %342 = arith.mulf %340, %341 : vector<2x128xf32>
    %343 = arith.truncf %342 : vector<2x128xf32> to vector<2x128xbf16>
    %c6_168 = arith.constant 6 : index
    %c0_169 = arith.constant 0 : index
    %344 = vector.load %arg13[%c6_168, %c0_169] : memref<16x128xbf16, #tpu.memory_space<vmem>>, vector<2x128xbf16>
    tpu.vector_store %arg13[%c6_168, %c0_169], %343 {strides = array<i32>} : memref<16x128xbf16, #tpu.memory_space<vmem>>, vector<2x128xbf16>,
    %c8_170 = arith.constant 8 : index
    %c0_171 = arith.constant 0 : index
    %345 = vector.load %arg12[%c8_170, %c0_171] : memref<16x512xf32, #tpu.memory_space<vmem>>, vector<2x512xf32>
    %cst_172 = arith.constant dense<0.000000e+00> : vector<2x512xf32>
    %346 = tpu.matmul %343, %246, %cst_172 {dimension_numbers = #tpu.dot_dimension_numbers<[1], [0], [0], [1], [0, 0, 1, 1], [], []>} : vector<2x128xbf16>, vector<128x512xbf16>, vector<2x512xf32> -> vector<2x512xf32>
    %347 = arith.addf %345, %346 : vector<2x512xf32>
    %348 = vector.extract_strided_slice %347 {offsets = [0, 0], sizes = [2, 384], strides = [1, 1]} : vector<2x512xf32> to vector<2x384xf32>
    %349 = arith.negf %348 : vector<2x384xf32>
    %350 = math.exp %349 : vector<2x384xf32>
    %cst_173 = arith.constant 1.000000e+00 : f32
    %351 = vector.broadcast %cst_173 : f32 to vector<2x384xf32>
    %352 = arith.addf %351, %350 : vector<2x384xf32>
    %353 = arith.divf %351, %352 : vector<2x384xf32>
    %354 = vector.extract_strided_slice %347 {offsets = [0, 384], sizes = [2, 128], strides = [1, 1]} : vector<2x512xf32> to vector<2x128xf32>
    %355 = math.tanh %354 : vector<2x128xf32>
    %356 = vector.extract_strided_slice %353 {offsets = [0, 128], sizes = [2, 128], strides = [1, 1]} : vector<2x384xf32> to vector<2x128xf32>
    %357 = arith.mulf %356, %339 : vector<2x128xf32>
    %358 = vector.extract_strided_slice %353 {offsets = [0, 0], sizes = [2, 128], strides = [1, 1]} : vector<2x384xf32> to vector<2x128xf32>
    %359 = arith.mulf %358, %355 : vector<2x128xf32>
    %360 = arith.addf %357, %359 : vector<2x128xf32>
    %361 = vector.extract_strided_slice %353 {offsets = [0, 256], sizes = [2, 128], strides = [1, 1]} : vector<2x384xf32> to vector<2x128xf32>
    %362 = math.tanh %360 : vector<2x128xf32>
    %363 = arith.mulf %361, %362 : vector<2x128xf32>
    %364 = arith.truncf %363 : vector<2x128xf32> to vector<2x128xbf16>
    %c8_174 = arith.constant 8 : index
    %c0_175 = arith.constant 0 : index
    %365 = vector.load %arg13[%c8_174, %c0_175] : memref<16x128xbf16, #tpu.memory_space<vmem>>, vector<2x128xbf16>
    tpu.vector_store %arg13[%c8_174, %c0_175], %364 {strides = array<i32>} : memref<16x128xbf16, #tpu.memory_space<vmem>>, vector<2x128xbf16>,
    %c10_176 = arith.constant 10 : index
    %c0_177 = arith.constant 0 : index
    %366 = vector.load %arg12[%c10_176, %c0_177] : memref<16x512xf32, #tpu.memory_space<vmem>>, vector<2x512xf32>
    %cst_178 = arith.constant dense<0.000000e+00> : vector<2x512xf32>
    %367 = tpu.matmul %364, %246, %cst_178 {dimension_numbers = #tpu.dot_dimension_numbers<[1], [0], [0], [1], [0, 0, 1, 1], [], []>} : vector<2x128xbf16>, vector<128x512xbf16>, vector<2x512xf32> -> vector<2x512xf32>
    %368 = arith.addf %366, %367 : vector<2x512xf32>
    %369 = vector.extract_strided_slice %368 {offsets = [0, 0], sizes = [2, 384], strides = [1, 1]} : vector<2x512xf32> to vector<2x384xf32>
    %370 = arith.negf %369 : vector<2x384xf32>
    %371 = math.exp %370 : vector<2x384xf32>
    %cst_179 = arith.constant 1.000000e+00 : f32
    %372 = vector.broadcast %cst_179 : f32 to vector<2x384xf32>
    %373 = arith.addf %372, %371 : vector<2x384xf32>
    %374 = arith.divf %372, %373 : vector<2x384xf32>
    %375 = vector.extract_strided_slice %368 {offsets = [0, 384], sizes = [2, 128], strides = [1, 1]} : vector<2x512xf32> to vector<2x128xf32>
    %376 = math.tanh %375 : vector<2x128xf32>
    %377 = vector.extract_strided_slice %374 {offsets = [0, 128], sizes = [2, 128], strides = [1, 1]} : vector<2x384xf32> to vector<2x128xf32>
    %378 = arith.mulf %377, %360 : vector<2x128xf32>
    %379 = vector.extract_strided_slice %374 {offsets = [0, 0], sizes = [2, 128], strides = [1, 1]} : vector<2x384xf32> to vector<2x128xf32>
    %380 = arith.mulf %379, %376 : vector<2x128xf32>
    %381 = arith.addf %378, %380 : vector<2x128xf32>
    %382 = vector.extract_strided_slice %374 {offsets = [0, 256], sizes = [2, 128], strides = [1, 1]} : vector<2x384xf32> to vector<2x128xf32>
    %383 = math.tanh %381 : vector<2x128xf32>
    %384 = arith.mulf %382, %383 : vector<2x128xf32>
    %385 = arith.truncf %384 : vector<2x128xf32> to vector<2x128xbf16>
    %c10_180 = arith.constant 10 : index
    %c0_181 = arith.constant 0 : index
    %386 = vector.load %arg13[%c10_180, %c0_181] : memref<16x128xbf16, #tpu.memory_space<vmem>>, vector<2x128xbf16>
    tpu.vector_store %arg13[%c10_180, %c0_181], %385 {strides = array<i32>} : memref<16x128xbf16, #tpu.memory_space<vmem>>, vector<2x128xbf16>,
    %c12_182 = arith.constant 12 : index
    %c0_183 = arith.constant 0 : index
    %387 = vector.load %arg12[%c12_182, %c0_183] : memref<16x512xf32, #tpu.memory_space<vmem>>, vector<2x512xf32>
    %cst_184 = arith.constant dense<0.000000e+00> : vector<2x512xf32>
    %388 = tpu.matmul %385, %246, %cst_184 {dimension_numbers = #tpu.dot_dimension_numbers<[1], [0], [0], [1], [0, 0, 1, 1], [], []>} : vector<2x128xbf16>, vector<128x512xbf16>, vector<2x512xf32> -> vector<2x512xf32>
    %389 = arith.addf %387, %388 : vector<2x512xf32>
    %390 = vector.extract_strided_slice %389 {offsets = [0, 0], sizes = [2, 384], strides = [1, 1]} : vector<2x512xf32> to vector<2x384xf32>
    %391 = arith.negf %390 : vector<2x384xf32>
    %392 = math.exp %391 : vector<2x384xf32>
    %cst_185 = arith.constant 1.000000e+00 : f32
    %393 = vector.broadcast %cst_185 : f32 to vector<2x384xf32>
    %394 = arith.addf %393, %392 : vector<2x384xf32>
    %395 = arith.divf %393, %394 : vector<2x384xf32>
    %396 = vector.extract_strided_slice %389 {offsets = [0, 384], sizes = [2, 128], strides = [1, 1]} : vector<2x512xf32> to vector<2x128xf32>
    %397 = math.tanh %396 : vector<2x128xf32>
    %398 = vector.extract_strided_slice %395 {offsets = [0, 128], sizes = [2, 128], strides = [1, 1]} : vector<2x384xf32> to vector<2x128xf32>
    %399 = arith.mulf %398, %381 : vector<2x128xf32>
    %400 = vector.extract_strided_slice %395 {offsets = [0, 0], sizes = [2, 128], strides = [1, 1]} : vector<2x384xf32> to vector<2x128xf32>
    %401 = arith.mulf %400, %397 : vector<2x128xf32>
    %402 = arith.addf %399, %401 : vector<2x128xf32>
    %403 = vector.extract_strided_slice %395 {offsets = [0, 256], sizes = [2, 128], strides = [1, 1]} : vector<2x384xf32> to vector<2x128xf32>
    %404 = math.tanh %402 : vector<2x128xf32>
    %405 = arith.mulf %403, %404 : vector<2x128xf32>
    %406 = arith.truncf %405 : vector<2x128xf32> to vector<2x128xbf16>
    %c12_186 = arith.constant 12 : index
    %c0_187 = arith.constant 0 : index
    %407 = vector.load %arg13[%c12_186, %c0_187] : memref<16x128xbf16, #tpu.memory_space<vmem>>, vector<2x128xbf16>
    tpu.vector_store %arg13[%c12_186, %c0_187], %406 {strides = array<i32>} : memref<16x128xbf16, #tpu.memory_space<vmem>>, vector<2x128xbf16>,
    %c14_188 = arith.constant 14 : index
    %c0_189 = arith.constant 0 : index
    %408 = vector.load %arg12[%c14_188, %c0_189] : memref<16x512xf32, #tpu.memory_space<vmem>>, vector<2x512xf32>
    %cst_190 = arith.constant dense<0.000000e+00> : vector<2x512xf32>
    %409 = tpu.matmul %406, %246, %cst_190 {dimension_numbers = #tpu.dot_dimension_numbers<[1], [0], [0], [1], [0, 0, 1, 1], [], []>} : vector<2x128xbf16>, vector<128x512xbf16>, vector<2x512xf32> -> vector<2x512xf32>
    %410 = arith.addf %408, %409 : vector<2x512xf32>
    %411 = vector.extract_strided_slice %410 {offsets = [0, 0], sizes = [2, 384], strides = [1, 1]} : vector<2x512xf32> to vector<2x384xf32>
    %412 = arith.negf %411 : vector<2x384xf32>
    %413 = math.exp %412 : vector<2x384xf32>
    %cst_191 = arith.constant 1.000000e+00 : f32
    %414 = vector.broadcast %cst_191 : f32 to vector<2x384xf32>
    %415 = arith.addf %414, %413 : vector<2x384xf32>
    %416 = arith.divf %414, %415 : vector<2x384xf32>
    %417 = vector.extract_strided_slice %410 {offsets = [0, 384], sizes = [2, 128], strides = [1, 1]} : vector<2x512xf32> to vector<2x128xf32>
    %418 = math.tanh %417 : vector<2x128xf32>
    %419 = vector.extract_strided_slice %416 {offsets = [0, 128], sizes = [2, 128], strides = [1, 1]} : vector<2x384xf32> to vector<2x128xf32>
    %420 = arith.mulf %419, %402 : vector<2x128xf32>
    %421 = vector.extract_strided_slice %416 {offsets = [0, 0], sizes = [2, 128], strides = [1, 1]} : vector<2x384xf32> to vector<2x128xf32>
    %422 = arith.mulf %421, %418 : vector<2x128xf32>
    %423 = arith.addf %420, %422 : vector<2x128xf32>
    %424 = vector.extract_strided_slice %416 {offsets = [0, 256], sizes = [2, 128], strides = [1, 1]} : vector<2x384xf32> to vector<2x128xf32>
    %425 = math.tanh %423 : vector<2x128xf32>
    %426 = arith.mulf %424, %425 : vector<2x128xf32>
    %427 = arith.truncf %426 : vector<2x128xf32> to vector<2x128xbf16>
    %c14_192 = arith.constant 14 : index
    %c0_193 = arith.constant 0 : index
    %428 = vector.load %arg13[%c14_192, %c0_193] : memref<16x128xbf16, #tpu.memory_space<vmem>>, vector<2x128xbf16>
    tpu.vector_store %arg13[%c14_192, %c0_193], %427 {strides = array<i32>} : memref<16x128xbf16, #tpu.memory_space<vmem>>, vector<2x128xbf16>,
    %c1_194 = arith.constant 1 : index
    %c0_195 = arith.constant 0 : index
    %c0_196 = arith.constant 0 : index
    %429 = vector.load %arg10[%c1_194, %c0_195, %c0_196] : memref<3x2x128xf32, #tpu.memory_space<vmem>>, vector<1x2x128xf32>
    %430 = vector.shape_cast %429 : vector<1x2x128xf32> to vector<2x128xf32>
    %431 = vector.shape_cast %426 : vector<2x128xf32> to vector<1x2x128xf32>
    tpu.vector_store %arg10[%c1_194, %c0_195, %c0_196], %431 {strides = array<i32>} : memref<3x2x128xf32, #tpu.memory_space<vmem>>, vector<1x2x128xf32>,
    %c1_197 = arith.constant 1 : index
    %c0_198 = arith.constant 0 : index
    %c0_199 = arith.constant 0 : index
    %432 = vector.load %arg11[%c1_197, %c0_198, %c0_199] : memref<3x2x128xf32, #tpu.memory_space<vmem>>, vector<1x2x128xf32>
    %433 = vector.shape_cast %432 : vector<1x2x128xf32> to vector<2x128xf32>
    %434 = vector.shape_cast %423 : vector<2x128xf32> to vector<1x2x128xf32>
    tpu.vector_store %arg11[%c1_197, %c0_198, %c0_199], %434 {strides = array<i32>} : memref<3x2x128xf32, #tpu.memory_space<vmem>>, vector<1x2x128xf32>,
    %c2_200 = arith.constant 2 : index
    %c0_201 = arith.constant 0 : index
    %c0_202 = arith.constant 0 : index
    %435 = vector.load %arg5[%c2_200, %c0_201, %c0_202] : memref<3x128x512xbf16, #tpu.memory_space<vmem>>, vector<1x128x512xbf16>
    %436 = vector.shape_cast %435 : vector<1x128x512xbf16> to vector<128x512xbf16>
    %c0_203 = arith.constant 0 : index
    %c0_204 = arith.constant 0 : index
    %437 = vector.load %arg13[%c0_203, %c0_204] : memref<16x128xbf16, #tpu.memory_space<vmem>>, vector<16x128xbf16>
    %c1_205 = arith.constant 1 : index
    %c0_206 = arith.constant 0 : index
    %c0_207 = arith.constant 0 : index
    %438 = vector.load %arg4[%c1_205, %c0_206, %c0_207] : memref<2x128x512xbf16, #tpu.memory_space<vmem>>, vector<1x128x512xbf16>
    %439 = vector.shape_cast %438 : vector<1x128x512xbf16> to vector<128x512xbf16>
    %cst_208 = arith.constant dense<0.000000e+00> : vector<16x512xf32>
    %440 = tpu.matmul %437, %439, %cst_208 {dimension_numbers = #tpu.dot_dimension_numbers<[1], [0], [0], [1], [0, 0, 1, 1], [], []>} : vector<16x128xbf16>, vector<128x512xbf16>, vector<16x512xf32> -> vector<16x512xf32>
    %c1_209 = arith.constant 1 : index
    %c0_210 = arith.constant 0 : index
    %c0_211 = arith.constant 0 : index
    %441 = vector.load %arg6[%c1_209, %c0_210, %c0_211] : memref<2x1x512xf32, #tpu.memory_space<vmem>>, vector<1x1x512xf32>
    %442 = vector.shape_cast %441 : vector<1x1x512xf32> to vector<1x512xf32>
    %443 = vector.broadcast %442 : vector<1x512xf32> to vector<16x512xf32>
    %444 = arith.addf %440, %443 : vector<16x512xf32>
    %c0_212 = arith.constant 0 : index
    %c0_213 = arith.constant 0 : index
    %445 = vector.load %arg12[%c0_212, %c0_213] : memref<16x512xf32, #tpu.memory_space<vmem>>, vector<16x512xf32>
    tpu.vector_store %arg12[%c0_212, %c0_213], %444 {strides = array<i32>} : memref<16x512xf32, #tpu.memory_space<vmem>>, vector<16x512xf32>,
    %c2_214 = arith.constant 2 : index
    %c0_215 = arith.constant 0 : index
    %c0_216 = arith.constant 0 : index
    %446 = vector.load %arg1[%c2_214, %c0_215, %c0_216] : memref<3x2x128xf32, #tpu.memory_space<vmem>>, vector<1x2x128xf32>
    %447 = vector.shape_cast %446 : vector<1x2x128xf32> to vector<2x128xf32>
    %c2_217 = arith.constant 2 : index
    %c0_218 = arith.constant 0 : index
    %c0_219 = arith.constant 0 : index
    %448 = vector.load %arg2[%c2_217, %c0_218, %c0_219] : memref<3x2x128xf32, #tpu.memory_space<vmem>>, vector<1x2x128xf32>
    %449 = vector.shape_cast %448 : vector<1x2x128xf32> to vector<2x128xf32>
    %450 = arith.truncf %447 : vector<2x128xf32> to vector<2x128xbf16>
    %c0_220 = arith.constant 0 : index
    %c0_221 = arith.constant 0 : index
    %451 = vector.load %arg12[%c0_220, %c0_221] : memref<16x512xf32, #tpu.memory_space<vmem>>, vector<2x512xf32>
    %cst_222 = arith.constant dense<0.000000e+00> : vector<2x512xf32>
    %452 = tpu.matmul %450, %436, %cst_222 {dimension_numbers = #tpu.dot_dimension_numbers<[1], [0], [0], [1], [0, 0, 1, 1], [], []>} : vector<2x128xbf16>, vector<128x512xbf16>, vector<2x512xf32> -> vector<2x512xf32>
    %453 = arith.addf %451, %452 : vector<2x512xf32>
    %454 = vector.extract_strided_slice %453 {offsets = [0, 0], sizes = [2, 384], strides = [1, 1]} : vector<2x512xf32> to vector<2x384xf32>
    %455 = arith.negf %454 : vector<2x384xf32>
    %456 = math.exp %455 : vector<2x384xf32>
    %cst_223 = arith.constant 1.000000e+00 : f32
    %457 = vector.broadcast %cst_223 : f32 to vector<2x384xf32>
    %458 = arith.addf %457, %456 : vector<2x384xf32>
    %459 = arith.divf %457, %458 : vector<2x384xf32>
    %460 = vector.extract_strided_slice %453 {offsets = [0, 384], sizes = [2, 128], strides = [1, 1]} : vector<2x512xf32> to vector<2x128xf32>
    %461 = math.tanh %460 : vector<2x128xf32>
    %462 = vector.extract_strided_slice %459 {offsets = [0, 128], sizes = [2, 128], strides = [1, 1]} : vector<2x384xf32> to vector<2x128xf32>
    %463 = arith.mulf %462, %449 : vector<2x128xf32>
    %464 = vector.extract_strided_slice %459 {offsets = [0, 0], sizes = [2, 128], strides = [1, 1]} : vector<2x384xf32> to vector<2x128xf32>
    %465 = arith.mulf %464, %461 : vector<2x128xf32>
    %466 = arith.addf %463, %465 : vector<2x128xf32>
    %467 = vector.extract_strided_slice %459 {offsets = [0, 256], sizes = [2, 128], strides = [1, 1]} : vector<2x384xf32> to vector<2x128xf32>
    %468 = math.tanh %466 : vector<2x128xf32>
    %469 = arith.mulf %467, %468 : vector<2x128xf32>
    %470 = arith.truncf %469 : vector<2x128xf32> to vector<2x128xbf16>
    %471 = vector.extract_strided_slice %469 {offsets = [0, 0], sizes = [1, 128], strides = [1, 1]} : vector<2x128xf32> to vector<1x128xf32>
    %c0_224 = arith.constant 0 : index
    %c0_225 = arith.constant 0 : index
    %472 = vector.load %arg14[%c0_224, %c0_225] : memref<16x128xf32, #tpu.memory_space<vmem>>, vector<1x128xf32>
    tpu.vector_store %arg14[%c0_224, %c0_225], %471 {strides = array<i32>} : memref<16x128xf32, #tpu.memory_space<vmem>>, vector<1x128xf32>,
    %473 = vector.extract_strided_slice %469 {offsets = [1, 0], sizes = [1, 128], strides = [1, 1]} : vector<2x128xf32> to vector<1x128xf32>
    %c8_226 = arith.constant 8 : index
    %c0_227 = arith.constant 0 : index
    %474 = vector.load %arg14[%c8_226, %c0_227] : memref<16x128xf32, #tpu.memory_space<vmem>>, vector<1x128xf32>
    tpu.vector_store %arg14[%c8_226, %c0_227], %473 {strides = array<i32>} : memref<16x128xf32, #tpu.memory_space<vmem>>, vector<1x128xf32>,
    %c2_228 = arith.constant 2 : index
    %c0_229 = arith.constant 0 : index
    %475 = vector.load %arg12[%c2_228, %c0_229] : memref<16x512xf32, #tpu.memory_space<vmem>>, vector<2x512xf32>
    %cst_230 = arith.constant dense<0.000000e+00> : vector<2x512xf32>
    %476 = tpu.matmul %470, %436, %cst_230 {dimension_numbers = #tpu.dot_dimension_numbers<[1], [0], [0], [1], [0, 0, 1, 1], [], []>} : vector<2x128xbf16>, vector<128x512xbf16>, vector<2x512xf32> -> vector<2x512xf32>
    %477 = arith.addf %475, %476 : vector<2x512xf32>
    %478 = vector.extract_strided_slice %477 {offsets = [0, 0], sizes = [2, 384], strides = [1, 1]} : vector<2x512xf32> to vector<2x384xf32>
    %479 = arith.negf %478 : vector<2x384xf32>
    %480 = math.exp %479 : vector<2x384xf32>
    %cst_231 = arith.constant 1.000000e+00 : f32
    %481 = vector.broadcast %cst_231 : f32 to vector<2x384xf32>
    %482 = arith.addf %481, %480 : vector<2x384xf32>
    %483 = arith.divf %481, %482 : vector<2x384xf32>
    %484 = vector.extract_strided_slice %477 {offsets = [0, 384], sizes = [2, 128], strides = [1, 1]} : vector<2x512xf32> to vector<2x128xf32>
    %485 = math.tanh %484 : vector<2x128xf32>
    %486 = vector.extract_strided_slice %483 {offsets = [0, 128], sizes = [2, 128], strides = [1, 1]} : vector<2x384xf32> to vector<2x128xf32>
    %487 = arith.mulf %486, %466 : vector<2x128xf32>
    %488 = vector.extract_strided_slice %483 {offsets = [0, 0], sizes = [2, 128], strides = [1, 1]} : vector<2x384xf32> to vector<2x128xf32>
    %489 = arith.mulf %488, %485 : vector<2x128xf32>
    %490 = arith.addf %487, %489 : vector<2x128xf32>
    %491 = vector.extract_strided_slice %483 {offsets = [0, 256], sizes = [2, 128], strides = [1, 1]} : vector<2x384xf32> to vector<2x128xf32>
    %492 = math.tanh %490 : vector<2x128xf32>
    %493 = arith.mulf %491, %492 : vector<2x128xf32>
    %494 = arith.truncf %493 : vector<2x128xf32> to vector<2x128xbf16>
    %495 = vector.extract_strided_slice %493 {offsets = [0, 0], sizes = [1, 128], strides = [1, 1]} : vector<2x128xf32> to vector<1x128xf32>
    %c1_232 = arith.constant 1 : index
    %c0_233 = arith.constant 0 : index
    %496 = vector.load %arg14[%c1_232, %c0_233] : memref<16x128xf32, #tpu.memory_space<vmem>>, vector<1x128xf32>
    tpu.vector_store %arg14[%c1_232, %c0_233], %495 {strides = array<i32>} : memref<16x128xf32, #tpu.memory_space<vmem>>, vector<1x128xf32>,
    %497 = vector.extract_strided_slice %493 {offsets = [1, 0], sizes = [1, 128], strides = [1, 1]} : vector<2x128xf32> to vector<1x128xf32>
    %c9_234 = arith.constant 9 : index
    %c0_235 = arith.constant 0 : index
    %498 = vector.load %arg14[%c9_234, %c0_235] : memref<16x128xf32, #tpu.memory_space<vmem>>, vector<1x128xf32>
    tpu.vector_store %arg14[%c9_234, %c0_235], %497 {strides = array<i32>} : memref<16x128xf32, #tpu.memory_space<vmem>>, vector<1x128xf32>,
    %c4_236 = arith.constant 4 : index
    %c0_237 = arith.constant 0 : index
    %499 = vector.load %arg12[%c4_236, %c0_237] : memref<16x512xf32, #tpu.memory_space<vmem>>, vector<2x512xf32>
    %cst_238 = arith.constant dense<0.000000e+00> : vector<2x512xf32>
    %500 = tpu.matmul %494, %436, %cst_238 {dimension_numbers = #tpu.dot_dimension_numbers<[1], [0], [0], [1], [0, 0, 1, 1], [], []>} : vector<2x128xbf16>, vector<128x512xbf16>, vector<2x512xf32> -> vector<2x512xf32>
    %501 = arith.addf %499, %500 : vector<2x512xf32>
    %502 = vector.extract_strided_slice %501 {offsets = [0, 0], sizes = [2, 384], strides = [1, 1]} : vector<2x512xf32> to vector<2x384xf32>
    %503 = arith.negf %502 : vector<2x384xf32>
    %504 = math.exp %503 : vector<2x384xf32>
    %cst_239 = arith.constant 1.000000e+00 : f32
    %505 = vector.broadcast %cst_239 : f32 to vector<2x384xf32>
    %506 = arith.addf %505, %504 : vector<2x384xf32>
    %507 = arith.divf %505, %506 : vector<2x384xf32>
    %508 = vector.extract_strided_slice %501 {offsets = [0, 384], sizes = [2, 128], strides = [1, 1]} : vector<2x512xf32> to vector<2x128xf32>
    %509 = math.tanh %508 : vector<2x128xf32>
    %510 = vector.extract_strided_slice %507 {offsets = [0, 128], sizes = [2, 128], strides = [1, 1]} : vector<2x384xf32> to vector<2x128xf32>
    %511 = arith.mulf %510, %490 : vector<2x128xf32>
    %512 = vector.extract_strided_slice %507 {offsets = [0, 0], sizes = [2, 128], strides = [1, 1]} : vector<2x384xf32> to vector<2x128xf32>
    %513 = arith.mulf %512, %509 : vector<2x128xf32>
    %514 = arith.addf %511, %513 : vector<2x128xf32>
    %515 = vector.extract_strided_slice %507 {offsets = [0, 256], sizes = [2, 128], strides = [1, 1]} : vector<2x384xf32> to vector<2x128xf32>
    %516 = math.tanh %514 : vector<2x128xf32>
    %517 = arith.mulf %515, %516 : vector<2x128xf32>
    %518 = arith.truncf %517 : vector<2x128xf32> to vector<2x128xbf16>
    %519 = vector.extract_strided_slice %517 {offsets = [0, 0], sizes = [1, 128], strides = [1, 1]} : vector<2x128xf32> to vector<1x128xf32>
    %c2_240 = arith.constant 2 : index
    %c0_241 = arith.constant 0 : index
    %520 = vector.load %arg14[%c2_240, %c0_241] : memref<16x128xf32, #tpu.memory_space<vmem>>, vector<1x128xf32>
    tpu.vector_store %arg14[%c2_240, %c0_241], %519 {strides = array<i32>} : memref<16x128xf32, #tpu.memory_space<vmem>>, vector<1x128xf32>,
    %521 = vector.extract_strided_slice %517 {offsets = [1, 0], sizes = [1, 128], strides = [1, 1]} : vector<2x128xf32> to vector<1x128xf32>
    %c10_242 = arith.constant 10 : index
    %c0_243 = arith.constant 0 : index
    %522 = vector.load %arg14[%c10_242, %c0_243] : memref<16x128xf32, #tpu.memory_space<vmem>>, vector<1x128xf32>
    tpu.vector_store %arg14[%c10_242, %c0_243], %521 {strides = array<i32>} : memref<16x128xf32, #tpu.memory_space<vmem>>, vector<1x128xf32>,
    %c6_244 = arith.constant 6 : index
    %c0_245 = arith.constant 0 : index
    %523 = vector.load %arg12[%c6_244, %c0_245] : memref<16x512xf32, #tpu.memory_space<vmem>>, vector<2x512xf32>
    %cst_246 = arith.constant dense<0.000000e+00> : vector<2x512xf32>
    %524 = tpu.matmul %518, %436, %cst_246 {dimension_numbers = #tpu.dot_dimension_numbers<[1], [0], [0], [1], [0, 0, 1, 1], [], []>} : vector<2x128xbf16>, vector<128x512xbf16>, vector<2x512xf32> -> vector<2x512xf32>
    %525 = arith.addf %523, %524 : vector<2x512xf32>
    %526 = vector.extract_strided_slice %525 {offsets = [0, 0], sizes = [2, 384], strides = [1, 1]} : vector<2x512xf32> to vector<2x384xf32>
    %527 = arith.negf %526 : vector<2x384xf32>
    %528 = math.exp %527 : vector<2x384xf32>
    %cst_247 = arith.constant 1.000000e+00 : f32
    %529 = vector.broadcast %cst_247 : f32 to vector<2x384xf32>
    %530 = arith.addf %529, %528 : vector<2x384xf32>
    %531 = arith.divf %529, %530 : vector<2x384xf32>
    %532 = vector.extract_strided_slice %525 {offsets = [0, 384], sizes = [2, 128], strides = [1, 1]} : vector<2x512xf32> to vector<2x128xf32>
    %533 = math.tanh %532 : vector<2x128xf32>
    %534 = vector.extract_strided_slice %531 {offsets = [0, 128], sizes = [2, 128], strides = [1, 1]} : vector<2x384xf32> to vector<2x128xf32>
    %535 = arith.mulf %534, %514 : vector<2x128xf32>
    %536 = vector.extract_strided_slice %531 {offsets = [0, 0], sizes = [2, 128], strides = [1, 1]} : vector<2x384xf32> to vector<2x128xf32>
    %537 = arith.mulf %536, %533 : vector<2x128xf32>
    %538 = arith.addf %535, %537 : vector<2x128xf32>
    %539 = vector.extract_strided_slice %531 {offsets = [0, 256], sizes = [2, 128], strides = [1, 1]} : vector<2x384xf32> to vector<2x128xf32>
    %540 = math.tanh %538 : vector<2x128xf32>
    %541 = arith.mulf %539, %540 : vector<2x128xf32>
    %542 = arith.truncf %541 : vector<2x128xf32> to vector<2x128xbf16>
    %543 = vector.extract_strided_slice %541 {offsets = [0, 0], sizes = [1, 128], strides = [1, 1]} : vector<2x128xf32> to vector<1x128xf32>
    %c3_248 = arith.constant 3 : index
    %c0_249 = arith.constant 0 : index
    %544 = vector.load %arg14[%c3_248, %c0_249] : memref<16x128xf32, #tpu.memory_space<vmem>>, vector<1x128xf32>
    tpu.vector_store %arg14[%c3_248, %c0_249], %543 {strides = array<i32>} : memref<16x128xf32, #tpu.memory_space<vmem>>, vector<1x128xf32>,
    %545 = vector.extract_strided_slice %541 {offsets = [1, 0], sizes = [1, 128], strides = [1, 1]} : vector<2x128xf32> to vector<1x128xf32>
    %c11_250 = arith.constant 11 : index
    %c0_251 = arith.constant 0 : index
    %546 = vector.load %arg14[%c11_250, %c0_251] : memref<16x128xf32, #tpu.memory_space<vmem>>, vector<1x128xf32>
    tpu.vector_store %arg14[%c11_250, %c0_251], %545 {strides = array<i32>} : memref<16x128xf32, #tpu.memory_space<vmem>>, vector<1x128xf32>,
    %c8_252 = arith.constant 8 : index
    %c0_253 = arith.constant 0 : index
    %547 = vector.load %arg12[%c8_252, %c0_253] : memref<16x512xf32, #tpu.memory_space<vmem>>, vector<2x512xf32>
    %cst_254 = arith.constant dense<0.000000e+00> : vector<2x512xf32>
    %548 = tpu.matmul %542, %436, %cst_254 {dimension_numbers = #tpu.dot_dimension_numbers<[1], [0], [0], [1], [0, 0, 1, 1], [], []>} : vector<2x128xbf16>, vector<128x512xbf16>, vector<2x512xf32> -> vector<2x512xf32>
    %549 = arith.addf %547, %548 : vector<2x512xf32>
    %550 = vector.extract_strided_slice %549 {offsets = [0, 0], sizes = [2, 384], strides = [1, 1]} : vector<2x512xf32> to vector<2x384xf32>
    %551 = arith.negf %550 : vector<2x384xf32>
    %552 = math.exp %551 : vector<2x384xf32>
    %cst_255 = arith.constant 1.000000e+00 : f32
    %553 = vector.broadcast %cst_255 : f32 to vector<2x384xf32>
    %554 = arith.addf %553, %552 : vector<2x384xf32>
    %555 = arith.divf %553, %554 : vector<2x384xf32>
    %556 = vector.extract_strided_slice %549 {offsets = [0, 384], sizes = [2, 128], strides = [1, 1]} : vector<2x512xf32> to vector<2x128xf32>
    %557 = math.tanh %556 : vector<2x128xf32>
    %558 = vector.extract_strided_slice %555 {offsets = [0, 128], sizes = [2, 128], strides = [1, 1]} : vector<2x384xf32> to vector<2x128xf32>
    %559 = arith.mulf %558, %538 : vector<2x128xf32>
    %560 = vector.extract_strided_slice %555 {offsets = [0, 0], sizes = [2, 128], strides = [1, 1]} : vector<2x384xf32> to vector<2x128xf32>
    %561 = arith.mulf %560, %557 : vector<2x128xf32>
    %562 = arith.addf %559, %561 : vector<2x128xf32>
    %563 = vector.extract_strided_slice %555 {offsets = [0, 256], sizes = [2, 128], strides = [1, 1]} : vector<2x384xf32> to vector<2x128xf32>
    %564 = math.tanh %562 : vector<2x128xf32>
    %565 = arith.mulf %563, %564 : vector<2x128xf32>
    %566 = arith.truncf %565 : vector<2x128xf32> to vector<2x128xbf16>
    %567 = vector.extract_strided_slice %565 {offsets = [0, 0], sizes = [1, 128], strides = [1, 1]} : vector<2x128xf32> to vector<1x128xf32>
    %c4_256 = arith.constant 4 : index
    %c0_257 = arith.constant 0 : index
    %568 = vector.load %arg14[%c4_256, %c0_257] : memref<16x128xf32, #tpu.memory_space<vmem>>, vector<1x128xf32>
    tpu.vector_store %arg14[%c4_256, %c0_257], %567 {strides = array<i32>} : memref<16x128xf32, #tpu.memory_space<vmem>>, vector<1x128xf32>,
    %569 = vector.extract_strided_slice %565 {offsets = [1, 0], sizes = [1, 128], strides = [1, 1]} : vector<2x128xf32> to vector<1x128xf32>
    %c12_258 = arith.constant 12 : index
    %c0_259 = arith.constant 0 : index
    %570 = vector.load %arg14[%c12_258, %c0_259] : memref<16x128xf32, #tpu.memory_space<vmem>>, vector<1x128xf32>
    tpu.vector_store %arg14[%c12_258, %c0_259], %569 {strides = array<i32>} : memref<16x128xf32, #tpu.memory_space<vmem>>, vector<1x128xf32>,
    %c10_260 = arith.constant 10 : index
    %c0_261 = arith.constant 0 : index
    %571 = vector.load %arg12[%c10_260, %c0_261] : memref<16x512xf32, #tpu.memory_space<vmem>>, vector<2x512xf32>
    %cst_262 = arith.constant dense<0.000000e+00> : vector<2x512xf32>
    %572 = tpu.matmul %566, %436, %cst_262 {dimension_numbers = #tpu.dot_dimension_numbers<[1], [0], [0], [1], [0, 0, 1, 1], [], []>} : vector<2x128xbf16>, vector<128x512xbf16>, vector<2x512xf32> -> vector<2x512xf32>
    %573 = arith.addf %571, %572 : vector<2x512xf32>
    %574 = vector.extract_strided_slice %573 {offsets = [0, 0], sizes = [2, 384], strides = [1, 1]} : vector<2x512xf32> to vector<2x384xf32>
    %575 = arith.negf %574 : vector<2x384xf32>
    %576 = math.exp %575 : vector<2x384xf32>
    %cst_263 = arith.constant 1.000000e+00 : f32
    %577 = vector.broadcast %cst_263 : f32 to vector<2x384xf32>
    %578 = arith.addf %577, %576 : vector<2x384xf32>
    %579 = arith.divf %577, %578 : vector<2x384xf32>
    %580 = vector.extract_strided_slice %573 {offsets = [0, 384], sizes = [2, 128], strides = [1, 1]} : vector<2x512xf32> to vector<2x128xf32>
    %581 = math.tanh %580 : vector<2x128xf32>
    %582 = vector.extract_strided_slice %579 {offsets = [0, 128], sizes = [2, 128], strides = [1, 1]} : vector<2x384xf32> to vector<2x128xf32>
    %583 = arith.mulf %582, %562 : vector<2x128xf32>
    %584 = vector.extract_strided_slice %579 {offsets = [0, 0], sizes = [2, 128], strides = [1, 1]} : vector<2x384xf32> to vector<2x128xf32>
    %585 = arith.mulf %584, %581 : vector<2x128xf32>
    %586 = arith.addf %583, %585 : vector<2x128xf32>
    %587 = vector.extract_strided_slice %579 {offsets = [0, 256], sizes = [2, 128], strides = [1, 1]} : vector<2x384xf32> to vector<2x128xf32>
    %588 = math.tanh %586 : vector<2x128xf32>
    %589 = arith.mulf %587, %588 : vector<2x128xf32>
    %590 = arith.truncf %589 : vector<2x128xf32> to vector<2x128xbf16>
    %591 = vector.extract_strided_slice %589 {offsets = [0, 0], sizes = [1, 128], strides = [1, 1]} : vector<2x128xf32> to vector<1x128xf32>
    %c5_264 = arith.constant 5 : index
    %c0_265 = arith.constant 0 : index
    %592 = vector.load %arg14[%c5_264, %c0_265] : memref<16x128xf32, #tpu.memory_space<vmem>>, vector<1x128xf32>
    tpu.vector_store %arg14[%c5_264, %c0_265], %591 {strides = array<i32>} : memref<16x128xf32, #tpu.memory_space<vmem>>, vector<1x128xf32>,
    %593 = vector.extract_strided_slice %589 {offsets = [1, 0], sizes = [1, 128], strides = [1, 1]} : vector<2x128xf32> to vector<1x128xf32>
    %c13_266 = arith.constant 13 : index
    %c0_267 = arith.constant 0 : index
    %594 = vector.load %arg14[%c13_266, %c0_267] : memref<16x128xf32, #tpu.memory_space<vmem>>, vector<1x128xf32>
    tpu.vector_store %arg14[%c13_266, %c0_267], %593 {strides = array<i32>} : memref<16x128xf32, #tpu.memory_space<vmem>>, vector<1x128xf32>,
    %c12_268 = arith.constant 12 : index
    %c0_269 = arith.constant 0 : index
    %595 = vector.load %arg12[%c12_268, %c0_269] : memref<16x512xf32, #tpu.memory_space<vmem>>, vector<2x512xf32>
    %cst_270 = arith.constant dense<0.000000e+00> : vector<2x512xf32>
    %596 = tpu.matmul %590, %436, %cst_270 {dimension_numbers = #tpu.dot_dimension_numbers<[1], [0], [0], [1], [0, 0, 1, 1], [], []>} : vector<2x128xbf16>, vector<128x512xbf16>, vector<2x512xf32> -> vector<2x512xf32>
    %597 = arith.addf %595, %596 : vector<2x512xf32>
    %598 = vector.extract_strided_slice %597 {offsets = [0, 0], sizes = [2, 384], strides = [1, 1]} : vector<2x512xf32> to vector<2x384xf32>
    %599 = arith.negf %598 : vector<2x384xf32>
    %600 = math.exp %599 : vector<2x384xf32>
    %cst_271 = arith.constant 1.000000e+00 : f32
    %601 = vector.broadcast %cst_271 : f32 to vector<2x384xf32>
    %602 = arith.addf %601, %600 : vector<2x384xf32>
    %603 = arith.divf %601, %602 : vector<2x384xf32>
    %604 = vector.extract_strided_slice %597 {offsets = [0, 384], sizes = [2, 128], strides = [1, 1]} : vector<2x512xf32> to vector<2x128xf32>
    %605 = math.tanh %604 : vector<2x128xf32>
    %606 = vector.extract_strided_slice %603 {offsets = [0, 128], sizes = [2, 128], strides = [1, 1]} : vector<2x384xf32> to vector<2x128xf32>
    %607 = arith.mulf %606, %586 : vector<2x128xf32>
    %608 = vector.extract_strided_slice %603 {offsets = [0, 0], sizes = [2, 128], strides = [1, 1]} : vector<2x384xf32> to vector<2x128xf32>
    %609 = arith.mulf %608, %605 : vector<2x128xf32>
    %610 = arith.addf %607, %609 : vector<2x128xf32>
    %611 = vector.extract_strided_slice %603 {offsets = [0, 256], sizes = [2, 128], strides = [1, 1]} : vector<2x384xf32> to vector<2x128xf32>
    %612 = math.tanh %610 : vector<2x128xf32>
    %613 = arith.mulf %611, %612 : vector<2x128xf32>
    %614 = arith.truncf %613 : vector<2x128xf32> to vector<2x128xbf16>
    %615 = vector.extract_strided_slice %613 {offsets = [0, 0], sizes = [1, 128], strides = [1, 1]} : vector<2x128xf32> to vector<1x128xf32>
    %c6_272 = arith.constant 6 : index
    %c0_273 = arith.constant 0 : index
    %616 = vector.load %arg14[%c6_272, %c0_273] : memref<16x128xf32, #tpu.memory_space<vmem>>, vector<1x128xf32>
    tpu.vector_store %arg14[%c6_272, %c0_273], %615 {strides = array<i32>} : memref<16x128xf32, #tpu.memory_space<vmem>>, vector<1x128xf32>,
    %617 = vector.extract_strided_slice %613 {offsets = [1, 0], sizes = [1, 128], strides = [1, 1]} : vector<2x128xf32> to vector<1x128xf32>
    %c14_274 = arith.constant 14 : index
    %c0_275 = arith.constant 0 : index
    %618 = vector.load %arg14[%c14_274, %c0_275] : memref<16x128xf32, #tpu.memory_space<vmem>>, vector<1x128xf32>
    tpu.vector_store %arg14[%c14_274, %c0_275], %617 {strides = array<i32>} : memref<16x128xf32, #tpu.memory_space<vmem>>, vector<1x128xf32>,
    %c14_276 = arith.constant 14 : index
    %c0_277 = arith.constant 0 : index
    %619 = vector.load %arg12[%c14_276, %c0_277] : memref<16x512xf32, #tpu.memory_space<vmem>>, vector<2x512xf32>
    %cst_278 = arith.constant dense<0.000000e+00> : vector<2x512xf32>
    %620 = tpu.matmul %614, %436, %cst_278 {dimension_numbers = #tpu.dot_dimension_numbers<[1], [0], [0], [1], [0, 0, 1, 1], [], []>} : vector<2x128xbf16>, vector<128x512xbf16>, vector<2x512xf32> -> vector<2x512xf32>
    %621 = arith.addf %619, %620 : vector<2x512xf32>
    %622 = vector.extract_strided_slice %621 {offsets = [0, 0], sizes = [2, 384], strides = [1, 1]} : vector<2x512xf32> to vector<2x384xf32>
    %623 = arith.negf %622 : vector<2x384xf32>
    %624 = math.exp %623 : vector<2x384xf32>
    %cst_279 = arith.constant 1.000000e+00 : f32
    %625 = vector.broadcast %cst_279 : f32 to vector<2x384xf32>
    %626 = arith.addf %625, %624 : vector<2x384xf32>
    %627 = arith.divf %625, %626 : vector<2x384xf32>
    %628 = vector.extract_strided_slice %621 {offsets = [0, 384], sizes = [2, 128], strides = [1, 1]} : vector<2x512xf32> to vector<2x128xf32>
    %629 = math.tanh %628 : vector<2x128xf32>
    %630 = vector.extract_strided_slice %627 {offsets = [0, 128], sizes = [2, 128], strides = [1, 1]} : vector<2x384xf32> to vector<2x128xf32>
    %631 = arith.mulf %630, %610 : vector<2x128xf32>
    %632 = vector.extract_strided_slice %627 {offsets = [0, 0], sizes = [2, 128], strides = [1, 1]} : vector<2x384xf32> to vector<2x128xf32>
    %633 = arith.mulf %632, %629 : vector<2x128xf32>
    %634 = arith.addf %631, %633 : vector<2x128xf32>
    %635 = vector.extract_strided_slice %627 {offsets = [0, 256], sizes = [2, 128], strides = [1, 1]} : vector<2x384xf32> to vector<2x128xf32>
    %636 = math.tanh %634 : vector<2x128xf32>
    %637 = arith.mulf %635, %636 : vector<2x128xf32>
    %638 = vector.extract_strided_slice %637 {offsets = [0, 0], sizes = [1, 128], strides = [1, 1]} : vector<2x128xf32> to vector<1x128xf32>
    %c7_280 = arith.constant 7 : index
    %c0_281 = arith.constant 0 : index
    %639 = vector.load %arg14[%c7_280, %c0_281] : memref<16x128xf32, #tpu.memory_space<vmem>>, vector<1x128xf32>
    tpu.vector_store %arg14[%c7_280, %c0_281], %638 {strides = array<i32>} : memref<16x128xf32, #tpu.memory_space<vmem>>, vector<1x128xf32>,
    %640 = vector.extract_strided_slice %637 {offsets = [1, 0], sizes = [1, 128], strides = [1, 1]} : vector<2x128xf32> to vector<1x128xf32>
    %c15_282 = arith.constant 15 : index
    %c0_283 = arith.constant 0 : index
    %641 = vector.load %arg14[%c15_282, %c0_283] : memref<16x128xf32, #tpu.memory_space<vmem>>, vector<1x128xf32>
    tpu.vector_store %arg14[%c15_282, %c0_283], %640 {strides = array<i32>} : memref<16x128xf32, #tpu.memory_space<vmem>>, vector<1x128xf32>,
    %c2_284 = arith.constant 2 : index
    %c0_285 = arith.constant 0 : index
    %c0_286 = arith.constant 0 : index
    %642 = vector.load %arg10[%c2_284, %c0_285, %c0_286] : memref<3x2x128xf32, #tpu.memory_space<vmem>>, vector<1x2x128xf32>
    %643 = vector.shape_cast %642 : vector<1x2x128xf32> to vector<2x128xf32>
    %644 = vector.shape_cast %637 : vector<2x128xf32> to vector<1x2x128xf32>
    tpu.vector_store %arg10[%c2_284, %c0_285, %c0_286], %644 {strides = array<i32>} : memref<3x2x128xf32, #tpu.memory_space<vmem>>, vector<1x2x128xf32>,
    %c2_287 = arith.constant 2 : index
    %c0_288 = arith.constant 0 : index
    %c0_289 = arith.constant 0 : index
    %645 = vector.load %arg11[%c2_287, %c0_288, %c0_289] : memref<3x2x128xf32, #tpu.memory_space<vmem>>, vector<1x2x128xf32>
    %646 = vector.shape_cast %645 : vector<1x2x128xf32> to vector<2x128xf32>
    %647 = vector.shape_cast %634 : vector<2x128xf32> to vector<1x2x128xf32>
    tpu.vector_store %arg11[%c2_287, %c0_288, %c0_289], %647 {strides = array<i32>} : memref<3x2x128xf32, #tpu.memory_space<vmem>>, vector<1x2x128xf32>,
    %c0_290 = arith.constant 0 : index
    %c0_291 = arith.constant 0 : index
    %648 = vector.load %arg14[%c0_290, %c0_291] : memref<16x128xf32, #tpu.memory_space<vmem>>, vector<16x128xf32>
    %649 = arith.truncf %648 : vector<16x128xf32> to vector<16x128xbf16>
    %c0_292 = arith.constant 0 : index
    %c0_293 = arith.constant 0 : index
    %650 = vector.load %arg7[%c0_292, %c0_293] : memref<128x32xbf16, #tpu.memory_space<vmem>>, vector<128x32xbf16>
    %cst_294 = arith.constant dense<0.000000e+00> : vector<16x32xf32>
    %651 = tpu.matmul %649, %650, %cst_294 {dimension_numbers = #tpu.dot_dimension_numbers<[1], [0], [0], [1], [0, 0, 1, 1], [], []>} : vector<16x128xbf16>, vector<128x32xbf16>, vector<16x32xf32> -> vector<16x32xf32>
    %c0_295 = arith.constant 0 : index
    %c0_296 = arith.constant 0 : index
    %652 = vector.load %arg8[%c0_295, %c0_296] : memref<1x32xf32, #tpu.memory_space<vmem>>, vector<1x32xf32>
    %653 = vector.broadcast %652 : vector<1x32xf32> to vector<16x32xf32>
    %654 = arith.addf %651, %653 : vector<16x32xf32>
    %c0_297 = arith.constant 0 : index
    %c0_298 = arith.constant 0 : index
    %655 = vector.load %arg9[%c0_297, %c0_298] : memref<16x32xf32, #tpu.memory_space<vmem>>, vector<16x32xf32>
    tpu.vector_store %arg9[%c0_297, %c0_298], %654 {strides = array<i32>} : memref<16x32xf32, #tpu.memory_space<vmem>>, vector<16x32xf32>,
    return
  }
}

</mosaic_0001>

<bundles_post_ra>
// kernel: char_lstm_forward.1
= control target key start
LH: loop header
LB: loop body
LE: loop exit
PB: predicated region body
PF: predicated region fallthrough
CT: control target
= control target key end

     0   :  { %17 = vsyncpa [#allocation8], 0  ;;  %s7518_s0 = inlined_call_operand.vmem [shape: s32[2,8], index: 0, kind: input, shape index: {}]   ;;  %s7519_s1 = inlined_call_operand.vmem [shape: f32[3,2,128], index: 1, kind: input, shape index: {}]   ;;  %s7520_s2 = inlined_call_operand.vmem [shape: f32[3,2,128], index: 2, kind: input, shape index: {}]   ;;  %s7521_s3 = inlined_call_operand.hbm [shape: f32[32,512], index: 3, kind: input, shape index: {}]   ;;  %s7522_s4 = inlined_call_operand.hbm [shape: bf16[2,128,512], index: 4, kind: input, shape index: {}]   ;;  %s7523_s5 = inlined_call_operand.hbm [shape: bf16[3,128,512], index: 5, kind: input, shape index: {}]   ;;  %s7524_s6 = inlined_call_operand.vmem [shape: f32[2,1,512], index: 6, kind: input, shape index: {}]   ;;  %s7525_s7 = inlined_call_operand.vmem [shape: bf16[128,32], index: 7, kind: input, shape index: {}]   ;;  %s7526_s8 = inlined_call_operand.vmem [shape: f32[1,32], index: 8, kind: input, shape index: {}]   ;;  %s7527_s9 = inlined_call_operand.hbm [shape: f32[16,32], index: 9, kind: output, shape index: {0}]   ;;  %s7528_s10 = inlined_call_operand.hbm [shape: f32[3,2,128], index: 10, kind: output, shape index: {1}]   ;;  %s7529_s11 = inlined_call_operand.hbm [shape: f32[3,2,128], index: 11, kind: output, shape index: {2}]  }
   0x1   :  { %18 = vsyncpa [#allocation6], 0 }
   0x2   :  { %19 = vsyncpa [#allocation11], 0 }
   0x3   :  { %20 = vsyncpa [#allocation7], 0 }
   0x4   :  { %21 = vsyncpa [#allocation15], 0  ;;  %s6098_s17 = smov [#allocation10]   ;;  %s28_s21 = sshll.u32 %s7518_s0, 4  ;;  %s29_s21 = int_to_ptr.vmem [resolvable:$true] %s28_s21 }
   0x5   :  { %s53_s18 = sshll.u32 %s6098_s17, 4  ;;  %s54_s18 = int_to_ptr.vmem [resolvable:$true] %s53_s18 }
   0x6   :  { %s5964_s22 = scalar_lea.vmem %s54_s18, 8192  ;;  %p5969_p1 = scmp.lt.s32.totalorder %s54_s18, %s54_s18 }
   0x7   :  { %p5965_p0 = scmp.ne.s32.totalorder %s54_s18, %s5964_s22  ;;  %p5970_p2 = scmp.lt.s32.totalorder %s5964_s22, %s5964_s22 }
   0x9   :  { %p5971_p3 = por %p5970_p2, %p5969_p1 }
   0xb   :  { %p5972_p4 = pnand %p5971_p3, %p5965_p0 }
   0xd   :  { %5975 = shalt.err (!%p5972_p4)
}
   0xe   :  { %s6099_s23 = smov 256   ;;  %s6100_s24 = smov 16  }
   0xf   :  { %59 = dma.hbm_to_vmem [thread:$0]  %s7522_s4, 8192, %s54_s18, [#allocation11], %s6099_s23, %s6099_s23, %s6100_s24  }
  0x10   :  { %s5976_s27 = scalar_lea.vmem %s29_s21, 32  ;;  %p5981_p6 = scmp.lt.s32.totalorder %s29_s21, %s29_s21 }
  0x11   :  { %p5977_p5 = scmp.ne.s32.totalorder %s29_s21, %s5976_s27  ;;  %p5982_p7 = scmp.lt.s32.totalorder %s5976_s27, %s5976_s27 }
  0x13   :  { %p5983_p8 = por %p5982_p7, %p5981_p6 }
  0x15   :  { %p5984_p9 = pnand %p5983_p8, %p5977_p5 }
  0x17   :  { %5987 = shalt.err (!%p5984_p9)
}
  0x18   :  { %s6101_s0 = smov [#allocation5]   ;;  %s6102_s28 = smov [#allocation9]  }
  0x19   :  { %31 = dma.vmem_to_smem %s29_s21, 32, %s6101_s0, [#allocation8]  }
  0x1a   :  { %s41_s29 = sshll.u32 %s6102_s28, 4  ;;  %s42_s29 = int_to_ptr.vmem [resolvable:$true] %s41_s29 }
  0x1b   :  { %s5996_s30 = scalar_lea.vmem %s42_s29, 2048  ;;  %p6001_p11 = scmp.lt.s32.totalorder %s42_s29, %s42_s29 }
  0x1c   :  { %p5997_p10 = scmp.ne.s32.totalorder %s42_s29, %s5996_s30  ;;  %p6002_p12 = scmp.lt.s32.totalorder %s5996_s30, %s5996_s30 }
  0x1e   :  { %p6003_p13 = por %p6002_p12, %p6001_p11 }
  0x20   :  { %p6004_p0 = pnand %p6003_p13, %p5997_p10 }
  0x22   :  { %6007 = shalt.err (!%p6004_p0)
}
  0x23   :  { %s6103_s4 = smov 512   ;;  %s6104_s12 = smov 32  }
  0x24   :  { %47 = dma.hbm_to_vmem [thread:$0]  %s7521_s3, 2048, %s42_s29, [#allocation6], %s6103_s4, %s6103_s4, %s6104_s12  }
  0x25   :  { %s6105_s15 = smov [#allocation12]  }
  0x26   :  { %s65_s16 = sshll.u32 %s6105_s15, 4  ;;  %s66_s16 = int_to_ptr.vmem [resolvable:$true] %s65_s16 }
  0x27   :  { %s6016_s17 = scalar_lea.vmem %s66_s16, 12288  ;;  %p6021_p2 = scmp.lt.s32.totalorder %s66_s16, %s66_s16 }
  0x28   :  { %p6017_p1 = scmp.ne.s32.totalorder %s66_s16, %s6016_s17  ;;  %p6022_p3 = scmp.lt.s32.totalorder %s6016_s17, %s6016_s17 }
  0x2a   :  { %p6023_p4 = por %p6022_p3, %p6021_p2 }
  0x2c   :  { %p6024_p5 = pnand %p6023_p4, %p6017_p1 }
  0x2e   :  { %6027 = shalt.err (!%p6024_p5)
}
  0x2f   :  { %71 = dma.hbm_to_vmem [thread:$0]  %s7523_s5, 12288, %s66_s16, [#allocation11], %s6099_s23, %s6099_s23, %s6100_s24  }
  0x30   :  { %6088 = dma.done.wait [#allocation8], 32  }
  0x31   :  { %6089 = vsyncadd [#allocation8], 4294967264 }
  0x32   :  { %6090 = dma.done.wait [#allocation6], 2048  }
  0x33   :  { %6091 = vsyncadd [#allocation6], 4294965248 }
  0x34   :  { %6092 = dma.done.wait [#allocation11], 20480  }
  0x35   :  { %6093 = vsyncadd [#allocation11], 4294946816 }
  0x36   :  { %90 = sfence }
  0x37   :  { %v6194_v0 = vld [vmem:[#allocation12 + $0xe4] ss:$16 sps:$4 sm:$0xff]   ;;  %v6196_v1 = vld [vmem:[#allocation12 + $0xe0] ss:$16 sps:$4 sm:$0xff]   ;;  %v6106_v2 = vmov 0   ;;  %s6200_s3 = sld [smem:[#allocation5]]  ;;  %v102_v20 = vlaneseq }
  0x38   :  { %534 = vmatprep.mubr.bf16.mxu0 %v6106_v2  ;;  %575 = vmatprep.mubr.bf16.mxu1 %v6106_v2  ;;  %v6203_v3 = vld [vmem:[#allocation12 + $0xc4] ss:$16 sps:$4 sm:$0xff]   ;;  %v6206_v4 = vld [vmem:[#allocation12 + $0xc0] ss:$16 sps:$4 sm:$0xff]   ;;  %s6211_s5 = sld [smem:[#allocation5 + $0x80]]  ;;  %vm6108_vm1 = vmmov 0  }
  0x39   :  { %502 = vmatprep.subr.bf16.mxu0 %v6194_v0  ;;  %v6209_v5 = vld [vmem:[#allocation12 + $0xa4] ss:$16 sps:$4 sm:$0xff]   ;;  %v6213_v6 = vld [vmem:[#allocation12 + $0xec] ss:$16 sps:$4 sm:$0xff]   ;;  %v6215_v7 = vld [vmem:[#allocation12 + $0xe8] ss:$16 sps:$4 sm:$0xff]  }
  0x3a   :  { %503 = vmatpush1.bf16.msra.mxu0 %v6196_v1  ;;  %v6218_v8 = vld [vmem:[#allocation12 + $0xa0] ss:$16 sps:$4 sm:$0xff]   ;;  %543 = vmatprep.subr.bf16.mxu1 %v6213_v6  ;;  %v6222_v9 = vld [vmem:[#allocation12 + $0x84] ss:$16 sps:$4 sm:$0xff]   ;;  %v6225_v10 = vld [vmem:[#allocation12 + $0xcc] ss:$16 sps:$4 sm:$0xff]  }
  0x3b   :  { %504 = vmatprep.subr.bf16.mxu0 %v6203_v3  ;;  %544 = vmatpush1.bf16.msra.mxu1 %v6215_v7  ;;  %v6227_v11 = vld [vmem:[#allocation12 + $0xc8] ss:$16 sps:$4 sm:$0xff]   ;;  %v6233_v12 = vld [vmem:[#allocation12 + $0x80] ss:$16 sps:$4 sm:$0xff]   ;;  %v6235_v13 = vld [vmem:[#allocation12 + $0x64] ss:$16 sps:$4 sm:$0xff]  }
  0x3c   :  { %545 = vmatprep.subr.bf16.mxu1 %v6225_v10  ;;  %v6237_v14 = vld [vmem:[#allocation12 + $0xac] ss:$16 sps:$4 sm:$0xff]   ;;  %v6241_v15 = vld [vmem:[#allocation12 + $0xa8] ss:$16 sps:$4 sm:$0xff]   ;;  %v6249_v17 = vld [vmem:[#allocation12 + $0x60] ss:$16 sps:$4 sm:$0xff]  }
  0x3d   :  { %s93_s20 = sshra.s32 %s6200_s3, 3  ;;  %s96_s22 = sand.u32 7, %s6200_s3  ;;  %v6245_v16 = vld [vmem:[#allocation12 + $0x8c] ss:$16 sps:$4 sm:$0xff]   ;;  %v6252_v18 = vld [vmem:[#allocation12 + $0x44] ss:$16 sps:$4 sm:$0xff]  }
  0x3e   :  { %505 = vmatpush1.bf16.msra.mxu0 %v6206_v4  ;;  %s109_s21 = sshra.s32 %s6211_s5, 3  ;;  %s5164_s23 = sshll.u32 %s93_s20, 5  ;;  %v6255_v19 = vld [vmem:[#allocation12 + $0x88] ss:$16 sps:$4 sm:$0xff]   ;;  %v6258_v21 = vld [vmem:[#allocation12 + $0x6c] ss:$16 sps:$4 sm:$0xff]  }
  0x3f   :  { %506 = vmatprep.subr.bf16.mxu0 %v6209_v5  ;;  %546 = vmatpush1.bf16.msra.mxu1 %v6227_v11  ;;  %s112_s24 = sand.u32 7, %s6211_s5  ;;  %s5165_s25 = sshll.u32 %s109_s21, 5  ;;  %v6260_v22 = vld [vmem:[#allocation12 + $0x40] ss:$16 sps:$4 sm:$0xff]   ;;  %v6263_v23 = vld [vmem:[#allocation12 + $0x24] ss:$16 sps:$4 sm:$0xff]  }
  0x40   :  { %547 = vmatprep.subr.bf16.mxu1 %v6237_v14  ;;  %s99_s26 = sadd.s32 %s5164_s23, %s96_s22  ;;  %s115_s27 = sadd.s32 %s5165_s25, %s112_s24  ;;  %v6267_v24 = vld [vmem:[#allocation12 + $0x68] ss:$16 sps:$4 sm:$0xff]   ;;  %vm6270_vm0 = vcmp.lt.s32.totalorder %v102_v20, 512  ;;  %v6274_v26 = vld [vmem:[#allocation12 + $0x20] ss:$16 sps:$4 sm:$0xff]  }
  0x41   :  { %v6277_v27 = vld [vmem:[#allocation12 + $0x4c] ss:$16 sps:$4 sm:$0xff]   ;;  %v6279_v28 = vld [vmem:[#allocation12 + $0x4] ss:$16 sps:$4 sm:$0xff]   ;;  %v6281_v29 = vld [vmem:[#allocation12 + $0x48] ss:$16 sps:$4 sm:$0xff]  }
  0x42   :  { %507 = vmatpush1.bf16.msra.mxu0 %v6218_v8  ;;  %s100_s0 = scalar_lea.vmem [#allocation9], %s99_s26  ;;  %s116_s28 = scalar_lea.vmem [#allocation9], %s115_s27  ;;  %v6284_v32 = vld [vmem:[#allocation12 + $0x2c] ss:$16 sps:$4 sm:$0xff]   ;;  %v6292_v33 = vld [vmem:[#allocation12] ss:$16 sps:$4 sm:$0xff]  }
  0x43   :  { %508 = vmatprep.subr.bf16.mxu0 %v6222_v9  ;;  %548 = vmatpush1.bf16.msra.mxu1 %v6241_v15  ;;  %v101_v30 = vld [vmem:[%s100_s0] ss:$8 sm:$0xf]  ;;  %v6301_v36 = vld [vmem:[#allocation12 + $0xc] ss:$16 sps:$4 sm:$0xff]   ;;  %s4874_s4 = sld [smem:[#allocation5 + $0x1]] }
  0x44   :  { %549 = vmatprep.subr.bf16.mxu1 %v6245_v16  ;;  %v117_v31 = vld [vmem:[%s116_s28] ss:$8 sm:$0xf]  ;;  %106 = vst.msk [vmem:[#allocation2] ss:$8 sm:$0xf] %vm6270_vm0, %v101_v30 }
  0x45   :  { %119 = vst.msk [vmem:[#allocation2 + $0x1] ss:$8 sm:$0xf] %vm6270_vm0, %v117_v31  ;;  %v335_v34 = vld [vmem:[%s7519_s1] sm:$0x3]  ;;  %s4877_s13 = sld [smem:[#allocation5 + $0x81]] }
  0x46   :  { %509 = vmatpush1.bf16.msra.mxu0 %v6233_v12  ;;  %v6298_v35 = vld [vmem:[#allocation12 + $0x28] ss:$16 sps:$4 sm:$0xff]   ;;  %v337_v37 = vpack.c.bf16 %v335_v34, %v335_v34  ;;  %s4880_s24 = sld [smem:[#allocation5 + $0x2]] }
  0x47   :  { %510 = vmatprep.subr.bf16.mxu0 %v6235_v13  ;;  %550 = vmatpush1.bf16.msra.mxu1 %v6255_v19  ;;  %v6306_v38 = vld [vmem:[#allocation12 + $0x8] ss:$16 sps:$4 sm:$0xff]   ;;  %s4883_s25 = sld [smem:[#allocation5 + $0x82]] }
  0x48   :  { %551 = vmatprep.subr.bf16.mxu1 %v6258_v21 }
  0x49   :  { %s122_s14 = sshra.s32 %s4874_s4, 3  ;;  %s125_s15 = sand.u32 7, %s4874_s4 }
  0x4a   :  { %511 = vmatpush1.bf16.msra.mxu0 %v6249_v17  ;;  %s5166_s16 = sshll.u32 %s122_s14, 5 }
  0x4b   :  { %512 = vmatprep.subr.bf16.mxu0 %v6252_v18  ;;  %552 = vmatpush1.bf16.msra.mxu1 %v6267_v24  ;;  %s135_s17 = sshra.s32 %s4877_s13, 3  ;;  %s128_s18 = sadd.s32 %s5166_s16, %s125_s15 }
  0x4c   :  { %553 = vmatprep.subr.bf16.mxu1 %v6277_v27  ;;  %s138_s19 = sand.u32 7, %s4877_s13  ;;  %s5167_s3 = sshll.u32 %s135_s17, 5  ;;  %v338_v41 = vld [vmem:[#allocation2] sm:$0x3]  ;;  %v339_v43 = vld [vmem:[#allocation2 + $0x8] sm:$0x3] }
  0x4d   :  { %s129_s5 = scalar_lea.vmem [#allocation9], %s128_s18  ;;  %s141_s20 = sadd.s32 %s5167_s3, %s138_s19  ;;  %v340_v53 = vld [vmem:[#allocation2 + $0x10] sm:$0x3]  ;;  %v341_v57 = vld [vmem:[#allocation2 + $0x18] sm:$0x3] }
  0x4e   :  { %513 = vmatpush1.bf16.msra.mxu0 %v6260_v22  ;;  %v130_v39 = vld [vmem:[%s129_s5] ss:$8 sm:$0xf]  ;;  %s142_s21 = scalar_lea.vmem [#allocation9], %s141_s20  ;;  %s148_s26 = sshra.s32 %s4880_s24, 3 }
  0x4f   :  { %514 = vmatprep.subr.bf16.mxu0 %v6263_v23  ;;  %554 = vmatpush1.bf16.msra.mxu1 %v6281_v29  ;;  %132 = vst.msk [vmem:[#allocation2 + $0x2] ss:$8 sm:$0xf] %vm6270_vm0, %v130_v39  ;;  %v143_v40 = vld [vmem:[%s142_s21] ss:$8 sm:$0xf] }
  0x50   :  { %555 = vmatprep.subr.bf16.mxu1 %v6284_v32  ;;  %145 = vst.msk [vmem:[#allocation2 + $0x3] ss:$8 sm:$0xf] %vm6270_vm0, %v143_v40  ;;  %s151_s27 = sand.u32 7, %s4880_s24  ;;  %s5168_s0 = sshll.u32 %s148_s26, 5 }
  0x51   :  { %s161_s28 = sshra.s32 %s4883_s25, 3  ;;  %s154_s29 = sadd.s32 %s5168_s0, %s151_s27 }
  0x52   :  { %515 = vmatpush1.bf16.msra.mxu0 %v6274_v26  ;;  %s164_s30 = sand.u32 7, %s4883_s25  ;;  %s5169_s4 = sshll.u32 %s161_s28, 5 }
  0x53   :  { %516 = vmatprep.subr.bf16.mxu0 %v6279_v28  ;;  %556 = vmatpush1.bf16.msra.mxu1 %v6298_v35  ;;  %s155_s13 = scalar_lea.vmem [#allocation9], %s154_s29  ;;  %s167_s14 = sadd.s32 %s5169_s4, %s164_s30 }
  0x54   :  { %557 = vmatprep.subr.bf16.mxu1 %v6301_v36  ;;  %s168_s15 = scalar_lea.vmem [#allocation9], %s167_s14  ;;  %s4886_s16 = sld [smem:[#allocation5 + $0x3]] }
  0x55   :  { %s4889_s17 = sld [smem:[#allocation5 + $0x83]] }
  0x56   :  { %517 = vmatpush1.bf16.msra.mxu0 %v6292_v33  ;;  %s4892_s26 = sld [smem:[#allocation5 + $0x4]] }
  0x57   :  { %618 = vmatprep.subr.bf16.mxu0 %v6194_v0  ;;  %558 = vmatpush1.bf16.msra.mxu1 %v6306_v38  ;;  %s4895_s27 = sld [smem:[#allocation5 + $0x84]] }
  0x58   :  { %659 = vmatprep.subr.bf16.mxu1 %v6213_v6 }
  0x59   :  { %535 = vmatmul.mubr.bf16.vlgmr.msra.gmra.mxu0 %v337_v37 }
  0x5a   :  { %619 = vmatpush1.bf16.msra.mxu0 %v6196_v1  ;;  %650 = vmatprep.mubr.bf16.mxu0 %v6106_v2  ;;  %s174_s18 = sshra.s32 %s4886_s16, 3  ;;  %s177_s19 = sand.u32 7, %s4886_s16 }
  0x5b   :  { %620 = vmatprep.subr.bf16.mxu0 %v6203_v3  ;;  %576 = vmatmul.mubr.bf16.vlgmr.msra.gmra.mxu1 %v337_v37  ;;  %v336_v37 = vld [vmem:[%s7520_s2] sm:$0x3]  ;;  %s5170_s3 = sshll.u32 %s174_s18, 5  ;;  %s187_s5 = sshra.s32 %s4889_s17, 3 }
  0x5c   :  { %660 = vmatpush1.bf16.msra.mxu1 %v6215_v7  ;;  %691 = vmatprep.mubr.bf16.mxu1 %v6106_v2  ;;  %s180_s20 = sadd.s32 %s5170_s3, %s177_s19  ;;  %s190_s21 = sand.u32 7, %s4889_s17 }
  0x5d   :  { %661 = vmatprep.subr.bf16.mxu1 %v6225_v10  ;;  %s5171_s22 = sshll.u32 %s187_s5, 5  ;;  %s181_s23 = scalar_lea.vmem [#allocation9], %s180_s20 }
  0x5e   :  { %621 = vmatpush1.bf16.msra.mxu0 %v6206_v4  ;;  %s193_s24 = sadd.s32 %s5171_s22, %s190_s21  ;;  %s200_s0 = sshra.s32 %s4892_s26, 3 }
  0x5f   :  { %622 = vmatprep.subr.bf16.mxu0 %v6209_v5  ;;  %s194_s25 = scalar_lea.vmem [#allocation9], %s193_s24  ;;  %s203_s28 = sand.u32 7, %s4892_s26 }
  0x60   :  { %662 = vmatpush1.bf16.msra.mxu1 %v6227_v11  ;;  %s5172_s29 = sshll.u32 %s200_s0, 5  ;;  %s213_s30 = sshra.s32 %s4895_s27, 3 }
  0x61   :  { %663 = vmatprep.subr.bf16.mxu1 %v6237_v14  ;;  %s206_s4 = sadd.s32 %s5172_s29, %s203_s28  ;;  %s5173_s14 = sshll.u32 %s213_s30, 5 }
  0x62   :  { %623 = vmatpush1.bf16.msra.mxu0 %v6218_v8  ;;  %s4898_s18 = sld [smem:[#allocation5 + $0x5]] }
  0x63   :  { %624 = vmatprep.subr.bf16.mxu0 %v6222_v9  ;;  %s4901_s19 = sld [smem:[#allocation5 + $0x85]] }
  0x64   :  { %664 = vmatpush1.bf16.msra.mxu1 %v6241_v15  ;;  %s4904_s0 = sld [smem:[#allocation5 + $0x6]] }
  0x65   :  { %665 = vmatprep.subr.bf16.mxu1 %v6245_v16  ;;  %s4907_s28 = sld [smem:[#allocation5 + $0x86]] }
  0x66   :  { %625 = vmatpush1.bf16.msra.mxu0 %v6233_v12 }
  0x67   :  { %626 = vmatprep.subr.bf16.mxu0 %v6235_v13 }
  0x68   :  { %666 = vmatpush1.bf16.msra.mxu1 %v6255_v19  ;;  %s226_s3 = sshra.s32 %s4898_s18, 3  ;;  %s229_s5 = sand.u32 7, %s4898_s18 }
  0x69   :  { %667 = vmatprep.subr.bf16.mxu1 %v6258_v21  ;;  %s5174_s20 = sshll.u32 %s226_s3, 5  ;;  %s239_s21 = sshra.s32 %s4901_s19, 3 }
  0x6a   :  { %627 = vmatpush1.bf16.msra.mxu0 %v6249_v17  ;;  %s232_s22 = sadd.s32 %s5174_s20, %s229_s5  ;;  %s5175_s24 = sshll.u32 %s239_s21, 5 }
  0x6b   :  { %628 = vmatprep.subr.bf16.mxu0 %v6252_v18  ;;  %s252_s29 = sshra.s32 %s4904_s0, 3  ;;  %s255_s30 = sand.u32 7, %s4904_s0 }
  0x6c   :  { %668 = vmatpush1.bf16.msra.mxu1 %v6267_v24  ;;  %s4910_s3 = sld [smem:[#allocation5 + $0x7]] }
  0x6d   :  { %669 = vmatprep.subr.bf16.mxu1 %v6277_v27  ;;  %s4913_s5 = sld [smem:[#allocation5 + $0x87]] }
  0x6e   :  { %629 = vmatpush1.bf16.msra.mxu0 %v6260_v22 }
  0x6f   :  { %630 = vmatprep.subr.bf16.mxu0 %v6263_v23 }
  0x70   :  { %670 = vmatpush1.bf16.msra.mxu1 %v6281_v29 }
  0x71   :  { %671 = vmatprep.subr.bf16.mxu1 %v6284_v32 }
  0x72   :  { %631 = vmatpush1.bf16.msra.mxu0 %v6274_v26  ;;  %s278_s20 = sshra.s32 %s4910_s3, 3  ;;  %s281_s21 = sand.u32 7, %s4910_s3 }
  0x73   :  { %632 = vmatprep.subr.bf16.mxu0 %v6279_v28 }
  0x74   :  { %672 = vmatpush1.bf16.msra.mxu1 %v6298_v35 }
  0x75   :  { %673 = vmatprep.subr.bf16.mxu1 %v6301_v36 }
  0x76   :  { %633 = vmatpush1.bf16.msra.mxu0 %v6292_v33 }
  0x77   :  { %752 = vmatprep.subr.bf16.mxu0 %v6194_v0 }
  0x78   :  { %674 = vmatpush1.bf16.msra.mxu1 %v6306_v38 }
  0x79   :  { %793 = vmatprep.subr.bf16.mxu1 %v6213_v6 }
 0x119   :  { %v536_v42 = vpop.f32.mrf.mxu0 }
 0x11a   :  { %v584_v44 = vadd.f32 %v536_v42, %v338_v41 }
 0x11b   :  { %v538_v45 = vpop.f32.mrf.mxu0  ;;  %v577_v50 = vpop.f32.mrf.mxu1 }
 0x11c   :  { %v4948_v46 = vmul.f32 -1.442695, %v584_v44  ;;  %v585_v47 = vadd.f32 %v538_v45, %v339_v43  ;;  %v586_v55 = vadd.f32 %v577_v50, %v340_v53  ;;  %v614_v50 = vld [vmem:[#allocation2] sm:$0xc] }
 0x11d   :  { %v540_v48 = vpop.f32.mrf.mxu0  ;;  %v579_v52 = vpop.f32.mrf.mxu1 }
 0x11e   :  { %5476 = vpow2.f32 %v4948_v46  ;;  %v4949_v49 = vmul.f32 -1.442695, %v585_v47  ;;  %v4950_v58 = vmul.f32 -1.442695, %v586_v55  ;;  %v587_v59 = vadd.f32 %v579_v52, %v341_v57 }
 0x11f   :  { %v541_v51 = vpop.f32.mrf.mxu0  ;;  %v581_v54 = vpop.f32.mrf.mxu1  ;;  %v156_v48 = vld [vmem:[%s155_s13] ss:$8 sm:$0xf]  ;;  %s216_s13 = sand.u32 7, %s4895_s27 }
 0x120   :  { %5478 = vpow2.f32 %v4949_v49  ;;  %158 = vst.msk [vmem:[#allocation2 + $0x4] ss:$8 sm:$0xf] %vm6270_vm0, %v156_v48  ;;  %v169_v49 = vld [vmem:[%s168_s15] ss:$8 sm:$0xf]  ;;  %s219_s16 = sadd.s32 %s5173_s14, %s216_s13 }
 0x121   :  { %v582_v56 = vpop.f32.mrf.mxu1  ;;  %5480 = vpow2.f32 %v4950_v58  ;;  %171 = vst.msk [vmem:[#allocation2 + $0x5] ss:$8 sm:$0xf] %vm6270_vm0, %v169_v49  ;;  %v615_v54 = vld [vmem:[#allocation2 + $0x8] sm:$0xc]  ;;  %s207_s15 = scalar_lea.vmem [#allocation9], %s206_s4 }
 0x122   :  { %5482 = vtanh.f32 %v587_v59  ;;  %s220_s17 = scalar_lea.vmem [#allocation9], %s219_s16  ;;  %s5176_s4 = sshll.u32 %s252_s29, 5 }
 0x123   :  { %s265_s13 = sshra.s32 %s4907_s28, 3  ;;  %s258_s14 = sadd.s32 %s5176_s4, %s255_s30 }
 0x124   :  { %s5177_s16 = sshll.u32 %s265_s13, 5 }
 0x12b   :  { %v5477_v60 = vpop.eup %5476 }
 0x12c   :  { %v597_v61 = vadd.f32 1.0, %v5477_v60 }
 0x12d   :  { %v5479_v62 = vpop.eup %5478 }
 0x12e   :  { %5484 = vrcp.f32 %v597_v61  ;;  %v598_v63 = vadd.f32 1.0, %v5479_v62  ;;  %v5481_v30 = vpop.eup %5480 }
 0x12f   :  { %v5483_v31 = vpop.eup %5482  ;;  %v599_v40 = vadd.f32 1.0, %v5481_v30 }
 0x130   :  { %5486 = vrcp.f32 %v598_v63 }
 0x131   :  { %5488 = vrcp.f32 %v599_v40 }
 0x13b   :  { %v5485_v34 = vpop.eup %5484 }
 0x13c   :  { %v608_v42 = vmul.f32 %v5485_v34, %v5483_v31 }
 0x13d   :  { %v5487_v39 = vpop.eup %5486 }
 0x13e   :  { %v607_v41 = vmul.f32 %v5487_v39, %v336_v37  ;;  %v5489_v44 = vpop.eup %5488  ;;  %v616_v37 = vld [vmem:[#allocation2 + $0x10] sm:$0xc] }
 0x140   :  { %v6355_v43 = vadd.f32 %v608_v42, %v607_v41  ;;  %v617_v41 = vld [vmem:[#allocation2 + $0x18] sm:$0xc] }
 0x142   :  { %5490 = vtanh.f32 %v6355_v43 }
 0x14f   :  { %v5491_v45 = vpop.eup %5490 }
 0x150   :  { %v611_v46 = vmul.f32 %v5491_v45, %v5489_v44 }
 0x152   :  { %v612_v47 = vpack.c.bf16 %v611_v46, %v611_v46 }
 0x154   :  { %613 = vst [vmem:[#allocation3] sm:$0x1] %v612_v47  ;;  %651 = vmatmul.mubr.bf16.vlgmr.msra.gmra.mxu0 %v612_v47  ;;  %692 = vmatmul.mubr.bf16.vlgmr.msra.gmra.mxu1 %v612_v47 }
 0x155   :  { %753 = vmatpush1.bf16.msra.mxu0 %v6196_v1  ;;  %794 = vmatpush1.bf16.msra.mxu1 %v6215_v7 }
 0x156   :  { %754 = vmatprep.subr.bf16.mxu0 %v6203_v3  ;;  %795 = vmatprep.subr.bf16.mxu1 %v6225_v10 }
 0x157   :  { %784 = vmatprep.mubr.bf16.mxu0 %v6106_v2  ;;  %825 = vmatprep.mubr.bf16.mxu1 %v6106_v2 }
 0x159   :  { %755 = vmatpush1.bf16.msra.mxu0 %v6206_v4  ;;  %796 = vmatpush1.bf16.msra.mxu1 %v6227_v11 }
 0x15a   :  { %756 = vmatprep.subr.bf16.mxu0 %v6209_v5  ;;  %797 = vmatprep.subr.bf16.mxu1 %v6237_v14 }
 0x15d   :  { %757 = vmatpush1.bf16.msra.mxu0 %v6218_v8  ;;  %798 = vmatpush1.bf16.msra.mxu1 %v6241_v15 }
 0x15e   :  { %758 = vmatprep.subr.bf16.mxu0 %v6222_v9  ;;  %799 = vmatprep.subr.bf16.mxu1 %v6245_v16 }
 0x161   :  { %759 = vmatpush1.bf16.msra.mxu0 %v6233_v12  ;;  %800 = vmatpush1.bf16.msra.mxu1 %v6255_v19 }
 0x162   :  { %760 = vmatprep.subr.bf16.mxu0 %v6235_v13  ;;  %801 = vmatprep.subr.bf16.mxu1 %v6258_v21 }
 0x165   :  { %761 = vmatpush1.bf16.msra.mxu0 %v6249_v17  ;;  %802 = vmatpush1.bf16.msra.mxu1 %v6267_v24 }
 0x166   :  { %762 = vmatprep.subr.bf16.mxu0 %v6252_v18  ;;  %803 = vmatprep.subr.bf16.mxu1 %v6277_v27 }
 0x169   :  { %763 = vmatpush1.bf16.msra.mxu0 %v6260_v22  ;;  %804 = vmatpush1.bf16.msra.mxu1 %v6281_v29 }
 0x16a   :  { %764 = vmatprep.subr.bf16.mxu0 %v6263_v23  ;;  %805 = vmatprep.subr.bf16.mxu1 %v6284_v32 }
 0x16d   :  { %765 = vmatpush1.bf16.msra.mxu0 %v6274_v26  ;;  %806 = vmatpush1.bf16.msra.mxu1 %v6298_v35 }
 0x16e   :  { %766 = vmatprep.subr.bf16.mxu0 %v6279_v28  ;;  %807 = vmatprep.subr.bf16.mxu1 %v6301_v36 }
 0x171   :  { %767 = vmatpush1.bf16.msra.mxu0 %v6292_v33  ;;  %808 = vmatpush1.bf16.msra.mxu1 %v6306_v38 }
 0x172   :  { %886 = vmatprep.subr.bf16.mxu0 %v6194_v0  ;;  %927 = vmatprep.subr.bf16.mxu1 %v6213_v6 }
 0x214   :  { %v652_v51 = vpop.f32.mrf.mxu0  ;;  %v693_v52 = vpop.f32.mrf.mxu1 }
 0x215   :  { %v704_v53 = vrot.slane %v652_v51, 6  ;;  %v706_v34 = vrot.slane %v693_v52, 6 }
 0x216   :  { %v654_v55 = vpop.f32.mrf.mxu0  ;;  %v695_v56 = vpop.f32.mrf.mxu1 }
 0x217   :  { %v712_v57 = vadd.f32 %v704_v53, %v614_v50  ;;  %v705_v58 = vrot.slane %v654_v55, 6  ;;  %v714_v39 = vadd.f32 %v706_v34, %v616_v37  ;;  %v707_v40 = vrot.slane %v695_v56, 6 }
 0x218   :  { %v656_v59 = vpop.f32.mrf.mxu0  ;;  %v697_v60 = vpop.f32.mrf.mxu1  ;;  %v736_v53 = vrot.slane %v6355_v43, 6 }
 0x219   :  { %v4951_v61 = vmul.f32 -1.442695, %v712_v57  ;;  %v713_v62 = vadd.f32 %v705_v58, %v615_v54  ;;  %v4953_v42 = vmul.f32 -1.442695, %v714_v39  ;;  %v715_v45 = vadd.f32 %v707_v40, %v617_v41 }
 0x21a   :  { %v657_v63 = vpop.f32.mrf.mxu0  ;;  %v698_v30 = vpop.f32.mrf.mxu1 }
 0x21b   :  { %5492 = vpow2.f32 %v4951_v61  ;;  %v4952_v31 = vmul.f32 -1.442695, %v713_v62  ;;  %v748_v63 = vld [vmem:[#allocation2 + $0x18] sm:$0x30] }
 0x21d   :  { %5494 = vpow2.f32 %v4952_v31 }
 0x21e   :  { %5496 = vpow2.f32 %v4953_v42 }
 0x228   :  { %v5493_v44 = vpop.eup %5492 }
 0x229   :  { %v725_v46 = vadd.f32 1.0, %v5493_v44 }
 0x22a   :  { %v5495_v47 = vpop.eup %5494 }
 0x22b   :  { %5498 = vrcp.f32 %v725_v46  ;;  %v726_v48 = vadd.f32 1.0, %v5495_v47  ;;  %v5497_v49 = vpop.eup %5496 }
 0x22c   :  { %5500 = vtanh.f32 %v715_v45  ;;  %v727_v54 = vadd.f32 1.0, %v5497_v49 }
 0x22d   :  { %5502 = vrcp.f32 %v726_v48 }
 0x22e   :  { %5504 = vrcp.f32 %v727_v54 }
 0x238   :  { %v5499_v50 = vpop.eup %5498 }
 0x239   :  { %v5501_v51 = vpop.eup %5500 }
 0x23a   :  { %v5503_v52 = vpop.eup %5502  ;;  %v739_v56 = vmul.f32 %v5501_v51, %v5499_v50 }
 0x23b   :  { %v738_v55 = vmul.f32 %v5503_v52, %v736_v53  ;;  %v5505_v58 = vpop.eup %5504 }
 0x23d   :  { %v6397_v57 = vadd.f32 %v739_v56, %v738_v55  ;;  %v6442_v56 = vld [vmem:[#allocation12 + $0xe0] ss:$16 sps:$4 sm:$0xff]  }
 0x23f   :  { %5506 = vtanh.f32 %v6397_v57  ;;  %v870_v45 = vrot.slane %v6397_v57, 6  ;;  %v6445_v57 = vld [vmem:[#allocation12 + $0xe8] ss:$16 sps:$4 sm:$0xff]  }
 0x24c   :  { %v5507_v59 = vpop.eup %5506 }
 0x24d   :  { %v742_v60 = vmul.f32 %v5507_v59, %v5505_v58  ;;  %v6448_v58 = vld [vmem:[#allocation12 + $0xc4] ss:$16 sps:$4 sm:$0xff]   ;;  %v6451_v59 = vld [vmem:[#allocation12 + $0xcc] ss:$16 sps:$4 sm:$0xff]  }
 0x24f   :  { %v743_v61 = vpack.c.bf16 %v742_v60, %v742_v60  ;;  %v6456_v60 = vld [vmem:[#allocation12 + $0xc0] ss:$16 sps:$4 sm:$0xff]  }
 0x251   :  { %744 = vst [vmem:[#allocation3] sm:$0x2] %v743_v61  ;;  %v750_v62 = vrot.slane %v743_v61, 1  ;;  %v6459_v61 = vld [vmem:[#allocation12 + $0xc8] ss:$16 sps:$4 sm:$0xff]  }
 0x253   :  { %785 = vmatmul.mubr.bf16.vlgmr.msra.gmra.mxu0 %v750_v62  ;;  %826 = vmatmul.mubr.bf16.vlgmr.msra.gmra.mxu1 %v750_v62  ;;  %v6462_v62 = vld [vmem:[#allocation12 + $0xa4] ss:$16 sps:$4 sm:$0xff]  }
 0x254   :  { %887 = vmatpush1.bf16.msra.mxu0 %v6196_v1  ;;  %928 = vmatpush1.bf16.msra.mxu1 %v6215_v7  ;;  %v182_v1 = vld [vmem:[%s181_s23] ss:$8 sm:$0xf]  ;;  %v746_v7 = vld [vmem:[#allocation2 + $0x8] sm:$0x30]  ;;  %s242_s23 = sand.u32 7, %s4901_s19 }
 0x255   :  { %888 = vmatprep.subr.bf16.mxu0 %v6203_v3  ;;  %929 = vmatprep.subr.bf16.mxu1 %v6225_v10  ;;  %184 = vst.msk [vmem:[#allocation2 + $0x6] ss:$8 sm:$0xf] %vm6270_vm0, %v182_v1  ;;  %v195_v3 = vld [vmem:[%s194_s25] ss:$8 sm:$0xf]  ;;  %s245_s26 = sadd.s32 %s5175_s24, %s242_s23 }
 0x256   :  { %918 = vmatprep.mubr.bf16.mxu0 %v6106_v2  ;;  %959 = vmatprep.mubr.bf16.mxu1 %v6106_v2  ;;  %197 = vst.msk [vmem:[#allocation2 + $0x7] ss:$8 sm:$0xf] %vm6270_vm0, %v195_v3  ;;  %v6465_v1 = vld [vmem:[#allocation12 + $0xac] ss:$16 sps:$4 sm:$0xff]   ;;  %s233_s25 = scalar_lea.vmem [#allocation9], %s232_s22 }
 0x257   :  { %v6468_v3 = vld [vmem:[#allocation12 + $0xa0] ss:$16 sps:$4 sm:$0xff]   ;;  %s246_s27 = scalar_lea.vmem [#allocation9], %s245_s26  ;;  %s5178_s22 = sshll.u32 %s278_s20, 5 }
 0x258   :  { %889 = vmatpush1.bf16.msra.mxu0 %v6206_v4  ;;  %930 = vmatpush1.bf16.msra.mxu1 %v6227_v11  ;;  %s291_s23 = sshra.s32 %s4913_s5, 3  ;;  %s284_s24 = sadd.s32 %s5178_s22, %s281_s21 }
 0x259   :  { %890 = vmatprep.subr.bf16.mxu0 %v6209_v5  ;;  %931 = vmatprep.subr.bf16.mxu1 %v6237_v14  ;;  %s5179_s26 = sshll.u32 %s291_s23, 5 }
 0x25c   :  { %891 = vmatpush1.bf16.msra.mxu0 %v6218_v8  ;;  %932 = vmatpush1.bf16.msra.mxu1 %v6241_v15 }
 0x25d   :  { %892 = vmatprep.subr.bf16.mxu0 %v6222_v9  ;;  %933 = vmatprep.subr.bf16.mxu1 %v6245_v16 }
 0x260   :  { %893 = vmatpush1.bf16.msra.mxu0 %v6233_v12  ;;  %934 = vmatpush1.bf16.msra.mxu1 %v6255_v19 }
 0x261   :  { %894 = vmatprep.subr.bf16.mxu0 %v6235_v13  ;;  %935 = vmatprep.subr.bf16.mxu1 %v6258_v21 }
 0x264   :  { %895 = vmatpush1.bf16.msra.mxu0 %v6249_v17  ;;  %936 = vmatpush1.bf16.msra.mxu1 %v6267_v24 }
 0x265   :  { %896 = vmatprep.subr.bf16.mxu0 %v6252_v18  ;;  %937 = vmatprep.subr.bf16.mxu1 %v6277_v27 }
 0x268   :  { %897 = vmatpush1.bf16.msra.mxu0 %v6260_v22  ;;  %938 = vmatpush1.bf16.msra.mxu1 %v6281_v29  ;;  %v747_v22 = vld [vmem:[#allocation2 + $0x10] sm:$0x30] }
 0x269   :  { %898 = vmatprep.subr.bf16.mxu0 %v6263_v23  ;;  %939 = vmatprep.subr.bf16.mxu1 %v6284_v32 }
 0x26c   :  { %899 = vmatpush1.bf16.msra.mxu0 %v6274_v26  ;;  %940 = vmatpush1.bf16.msra.mxu1 %v6298_v35 }
 0x26d   :  { %900 = vmatprep.subr.bf16.mxu0 %v6279_v28  ;;  %941 = vmatprep.subr.bf16.mxu1 %v6301_v36 }
 0x270   :  { %901 = vmatpush1.bf16.msra.mxu0 %v6292_v33  ;;  %942 = vmatpush1.bf16.msra.mxu1 %v6306_v38 }
 0x271   :  { %1020 = vmatprep.subr.bf16.mxu0 %v6194_v0  ;;  %1061 = vmatprep.subr.bf16.mxu1 %v6213_v6  ;;  %v745_v0 = vld [vmem:[#allocation2] sm:$0x30] }
 0x313   :  { %v786_v4 = vpop.f32.mrf.mxu0  ;;  %v827_v5 = vpop.f32.mrf.mxu1 }
 0x314   :  { %v838_v6 = vrot.slane %v786_v4, 4  ;;  %v840_v19 = vrot.slane %v827_v5, 4  ;;  %v6474_v4 = vld [vmem:[#allocation12 + $0x84] ss:$16 sps:$4 sm:$0xff]   ;;  %v6477_v5 = vld [vmem:[#allocation12 + $0x8c] ss:$16 sps:$4 sm:$0xff]  }
 0x315   :  { %v788_v8 = vpop.f32.mrf.mxu0  ;;  %v829_v9 = vpop.f32.mrf.mxu1 }
 0x316   :  { %v846_v10 = vadd.f32 %v838_v6, %v745_v0  ;;  %v839_v11 = vrot.slane %v788_v8, 4  ;;  %v848_v23 = vadd.f32 %v840_v19, %v747_v22  ;;  %v841_v43 = vrot.slane %v829_v9, 4  ;;  %v6471_v0 = vld [vmem:[#allocation12 + $0xa8] ss:$16 sps:$4 sm:$0xff]   ;;  %v6480_v6 = vld [vmem:[#allocation12 + $0x80] ss:$16 sps:$4 sm:$0xff]  }
 0x317   :  { %v790_v12 = vpop.f32.mrf.mxu0  ;;  %v831_v13 = vpop.f32.mrf.mxu1  ;;  %v6486_v8 = vld [vmem:[#allocation12 + $0x64] ss:$16 sps:$4 sm:$0xff]   ;;  %v6490_v9 = vld [vmem:[#allocation12 + $0x60] ss:$16 sps:$4 sm:$0xff]  }
 0x318   :  { %v4954_v14 = vmul.f32 -1.442695, %v846_v10  ;;  %v847_v15 = vadd.f32 %v839_v11, %v746_v7  ;;  %v4956_v30 = vmul.f32 -1.442695, %v848_v23  ;;  %v849_v34 = vadd.f32 %v841_v43, %v748_v63  ;;  %v6483_v7 = vld [vmem:[#allocation12 + $0x88] ss:$16 sps:$4 sm:$0xff]  }
 0x319   :  { %v791_v16 = vpop.f32.mrf.mxu0  ;;  %v832_v17 = vpop.f32.mrf.mxu1  ;;  %v6494_v10 = vld [vmem:[#allocation12 + $0x44] ss:$16 sps:$4 sm:$0xff]   ;;  %v6498_v11 = vld [vmem:[#allocation12 + $0x40] ss:$16 sps:$4 sm:$0xff]   ;;  %v881_v63 = vld [vmem:[#allocation2 + $0x10] sm:$0xc0] }
 0x31a   :  { %5508 = vpow2.f32 %v4954_v14  ;;  %v4955_v18 = vmul.f32 -1.442695, %v847_v15  ;;  %v6502_v12 = vld [vmem:[#allocation12 + $0x24] ss:$16 sps:$4 sm:$0xff]  }
 0x31c   :  { %5510 = vpow2.f32 %v4955_v18 }
 0x31d   :  { %5512 = vpow2.f32 %v4956_v30 }
 0x327   :  { %v5509_v31 = vpop.eup %5508 }
 0x328   :  { %v859_v37 = vadd.f32 1.0, %v5509_v31 }
 0x329   :  { %v5511_v39 = vpop.eup %5510 }
 0x32a   :  { %5514 = vrcp.f32 %v859_v37  ;;  %v860_v40 = vadd.f32 1.0, %v5511_v39  ;;  %v5513_v41 = vpop.eup %5512 }
 0x32b   :  { %5516 = vtanh.f32 %v849_v34  ;;  %v861_v47 = vadd.f32 1.0, %v5513_v41  ;;  %v882_v34 = vld [vmem:[#allocation2 + $0x18] sm:$0xc0] }
 0x32c   :  { %5518 = vrcp.f32 %v860_v40 }
 0x32d   :  { %5520 = vrcp.f32 %v861_v47 }
 0x337   :  { %v5515_v42 = vpop.eup %5514 }
 0x338   :  { %v5517_v44 = vpop.eup %5516 }
 0x339   :  { %v5519_v46 = vpop.eup %5518  ;;  %v873_v49 = vmul.f32 %v5517_v44, %v5515_v42 }
 0x33a   :  { %v872_v48 = vmul.f32 %v5519_v46, %v870_v45  ;;  %v5521_v51 = vpop.eup %5520 }
 0x33c   :  { %v6439_v50 = vadd.f32 %v873_v49, %v872_v48 }
 0x33e   :  { %5522 = vtanh.f32 %v6439_v50  ;;  %v1004_v48 = vrot.slane %v6439_v50, 6  ;;  %v6543_v50 = vld [vmem:[#allocation12 + $0x6c] ss:$16 sps:$4 sm:$0xff]  }
 0x34b   :  { %v5523_v53 = vpop.eup %5522 }
 0x34c   :  { %v876_v52 = vmul.f32 %v5523_v53, %v5521_v51 }
 0x34e   :  { %v877_v54 = vpack.c.bf16 %v876_v52, %v876_v52 }
 0x350   :  { %878 = vst [vmem:[#allocation3] sm:$0x4] %v877_v54  ;;  %v884_v55 = vrot.slane %v877_v54, 2 }
 0x352   :  { %919 = vmatmul.mubr.bf16.vlgmr.msra.gmra.mxu0 %v884_v55  ;;  %960 = vmatmul.mubr.bf16.vlgmr.msra.gmra.mxu1 %v884_v55 }
 0x353   :  { %1021 = vmatpush1.bf16.msra.mxu0 %v6442_v56  ;;  %1062 = vmatpush1.bf16.msra.mxu1 %v6445_v57 }
 0x354   :  { %1022 = vmatprep.subr.bf16.mxu0 %v6448_v58  ;;  %1063 = vmatprep.subr.bf16.mxu1 %v6451_v59 }
 0x355   :  { %1052 = vmatprep.mubr.bf16.mxu0 %v6106_v2  ;;  %1093 = vmatprep.mubr.bf16.mxu1 %v6106_v2 }
 0x357   :  { %1023 = vmatpush1.bf16.msra.mxu0 %v6456_v60  ;;  %1064 = vmatpush1.bf16.msra.mxu1 %v6459_v61 }
 0x358   :  { %1024 = vmatprep.subr.bf16.mxu0 %v6462_v62  ;;  %1065 = vmatprep.subr.bf16.mxu1 %v6465_v1 }
 0x35b   :  { %1025 = vmatpush1.bf16.msra.mxu0 %v6468_v3  ;;  %1066 = vmatpush1.bf16.msra.mxu1 %v6471_v0 }
 0x35c   :  { %1026 = vmatprep.subr.bf16.mxu0 %v6474_v4  ;;  %1067 = vmatprep.subr.bf16.mxu1 %v6477_v5 }
 0x35f   :  { %1027 = vmatpush1.bf16.msra.mxu0 %v6480_v6  ;;  %1068 = vmatpush1.bf16.msra.mxu1 %v6483_v7 }
 0x360   :  { %1028 = vmatprep.subr.bf16.mxu0 %v6486_v8  ;;  %1069 = vmatprep.subr.bf16.mxu1 %v6258_v21  ;;  %v6512_v21 = vld [vmem:[#allocation12 + $0xe4] ss:$16 sps:$4 sm:$0xff]  }
 0x363   :  { %1029 = vmatpush1.bf16.msra.mxu0 %v6490_v9  ;;  %1070 = vmatpush1.bf16.msra.mxu1 %v6267_v24  ;;  %v6515_v24 = vld [vmem:[#allocation12 + $0xec] ss:$16 sps:$4 sm:$0xff]  }
 0x364   :  { %1030 = vmatprep.subr.bf16.mxu0 %v6494_v10  ;;  %1071 = vmatprep.subr.bf16.mxu1 %v6277_v27  ;;  %v221_v27 = vld [vmem:[%s220_s17] ss:$8 sm:$0xf]  ;;  %s259_s17 = scalar_lea.vmem [#allocation9], %s258_s14 }
 0x365   :  { %223 = vst.msk [vmem:[#allocation2 + $0x21] ss:$8 sm:$0xf] %vm6270_vm0, %v221_v27 }
 0x367   :  { %1031 = vmatpush1.bf16.msra.mxu0 %v6498_v11  ;;  %1072 = vmatpush1.bf16.msra.mxu1 %v6281_v29 }
 0x368   :  { %1032 = vmatprep.subr.bf16.mxu0 %v6502_v12  ;;  %1073 = vmatprep.subr.bf16.mxu1 %v6284_v32 }
 0x36b   :  { %1033 = vmatpush1.bf16.msra.mxu0 %v6274_v26  ;;  %1074 = vmatpush1.bf16.msra.mxu1 %v6298_v35  ;;  %v208_v26 = vld [vmem:[%s207_s15] ss:$8 sm:$0xf]  ;;  %v880_v35 = vld [vmem:[#allocation2 + $0x8] sm:$0xc0]  ;;  %s268_s15 = sand.u32 7, %s4907_s28 }
 0x36c   :  { %1034 = vmatprep.subr.bf16.mxu0 %v6279_v28  ;;  %1075 = vmatprep.subr.bf16.mxu1 %v6301_v36  ;;  %210 = vst.msk [vmem:[#allocation2 + $0x20] ss:$8 sm:$0xf] %vm6270_vm0, %v208_v26  ;;  %v879_v28 = vld [vmem:[#allocation2] sm:$0xc0]  ;;  %s271_s18 = sadd.s32 %s5177_s16, %s268_s15 }
 0x36d   :  { %s272_s19 = scalar_lea.vmem [#allocation9], %s271_s18 }
 0x36f   :  { %1035 = vmatpush1.bf16.msra.mxu0 %v6292_v33  ;;  %1076 = vmatpush1.bf16.msra.mxu1 %v6306_v38 }
 0x370   :  { %1139 = vmatprep.subr.bf16.mxu0 %v6512_v21  ;;  %1180 = vmatprep.subr.bf16.mxu1 %v6515_v24 }
 0x412   :  { %v920_v29 = vpop.f32.mrf.mxu0  ;;  %v961_v32 = vpop.f32.mrf.mxu1 }
 0x413   :  { %v972_v33 = vrot.slane %v920_v29, 2  ;;  %v974_v43 = vrot.slane %v961_v32, 2  ;;  %v6547_v32 = vld [vmem:[#allocation12 + $0x68] ss:$16 sps:$4 sm:$0xff]  }
 0x414   :  { %v922_v36 = vpop.f32.mrf.mxu0  ;;  %v963_v38 = vpop.f32.mrf.mxu1 }
 0x415   :  { %v980_v13 = vadd.f32 %v972_v33, %v879_v28  ;;  %v973_v14 = vrot.slane %v922_v36, 2  ;;  %v982_v30 = vadd.f32 %v974_v43, %v881_v63  ;;  %v975_v31 = vrot.slane %v963_v38, 2  ;;  %v6551_v33 = vld [vmem:[#allocation12 + $0x4c] ss:$16 sps:$4 sm:$0xff]   ;;  %v6562_v38 = vld [vmem:[#allocation12 + $0x20] ss:$16 sps:$4 sm:$0xff]  }
 0x416   :  { %v924_v15 = vpop.f32.mrf.mxu0  ;;  %v965_v16 = vpop.f32.mrf.mxu1  ;;  %v6559_v36 = vld [vmem:[#allocation12 + $0x2c] ss:$16 sps:$4 sm:$0xff]   ;;  %v1014_v63 = vld [vmem:[#allocation2 + $0x28] sm:$0x3] }
 0x417   :  { %v4957_v17 = vmul.f32 -1.442695, %v980_v13  ;;  %v981_v18 = vadd.f32 %v973_v14, %v880_v35  ;;  %v4959_v37 = vmul.f32 -1.442695, %v982_v30  ;;  %v983_v40 = vadd.f32 %v975_v31, %v882_v34  ;;  %v6555_v35 = vld [vmem:[#allocation12 + $0x48] ss:$16 sps:$4 sm:$0xff]  }
 0x418   :  { %v925_v19 = vpop.f32.mrf.mxu0  ;;  %v966_v22 = vpop.f32.mrf.mxu1  ;;  %v6565_v13 = vld [vmem:[#allocation12 + $0x28] ss:$16 sps:$4 sm:$0xff]   ;;  %v6568_v14 = vld [vmem:[#allocation12 + $0x4] ss:$16 sps:$4 sm:$0xff]   ;;  %v6571_v15 = vld [vmem:[#allocation12 + $0xc] ss:$16 sps:$4 sm:$0xff]  }
 0x419   :  { %5524 = vpow2.f32 %v4957_v17  ;;  %v4958_v23 = vmul.f32 -1.442695, %v981_v18  ;;  %v6574_v16 = vld [vmem:[#allocation12] ss:$16 sps:$4 sm:$0xff]   ;;  %v6577_v17 = vld [vmem:[#allocation12 + $0x8] ss:$16 sps:$4 sm:$0xff]  }
 0x41a   :  { %v234_v18 = vld [vmem:[%s233_s25] ss:$8 sm:$0xf]  ;;  %s294_s25 = sand.u32 7, %s4913_s5 }
 0x41b   :  { %5526 = vpow2.f32 %v4958_v23  ;;  %236 = vst.msk [vmem:[#allocation2 + $0x22] ss:$8 sm:$0xf] %vm6270_vm0, %v234_v18  ;;  %v247_v19 = vld [vmem:[%s246_s27] ss:$8 sm:$0xf]  ;;  %s297_s0 = sadd.s32 %s5179_s26, %s294_s25 }
 0x41c   :  { %5528 = vpow2.f32 %v4959_v37  ;;  %249 = vst.msk [vmem:[#allocation2 + $0x23] ss:$8 sm:$0xf] %vm6270_vm0, %v247_v19  ;;  %v1013_v22 = vld [vmem:[#allocation2 + $0x20] sm:$0x3]  ;;  %s285_s27 = scalar_lea.vmem [#allocation9], %s284_s24 }
 0x41d   :  { %s298_s28 = scalar_lea.vmem [#allocation9], %s297_s0 }
 0x426   :  { %v5525_v39 = vpop.eup %5524 }
 0x427   :  { %v993_v41 = vadd.f32 1.0, %v5525_v39 }
 0x428   :  { %v5527_v42 = vpop.eup %5526 }
 0x429   :  { %5530 = vrcp.f32 %v993_v41  ;;  %v994_v44 = vadd.f32 1.0, %v5527_v42  ;;  %v5529_v45 = vpop.eup %5528 }
 0x42a   :  { %5532 = vtanh.f32 %v983_v40  ;;  %v995_v51 = vadd.f32 1.0, %v5529_v45 }
 0x42b   :  { %5534 = vrcp.f32 %v994_v44 }
 0x42c   :  { %5536 = vrcp.f32 %v995_v51 }
 0x436   :  { %v5531_v46 = vpop.eup %5530 }
 0x437   :  { %v5533_v47 = vpop.eup %5532 }
 0x438   :  { %v5535_v49 = vpop.eup %5534  ;;  %v1007_v52 = vmul.f32 %v5533_v47, %v5531_v46  ;;  %v1015_v46 = vld [vmem:[#allocation2 + $0x30] sm:$0x3] }
 0x439   :  { %v1006_v53 = vmul.f32 %v5535_v49, %v1004_v48  ;;  %v5537_v55 = vpop.eup %5536  ;;  %v1016_v48 = vld [vmem:[#allocation2 + $0x38] sm:$0x3] }
 0x43b   :  { %v6523_v54 = vadd.f32 %v1007_v52, %v1006_v53 }
 0x43d   :  { %5538 = vtanh.f32 %v6523_v54  ;;  %v1126_v18 = vrot.slane %v6523_v54, 6  ;;  %v260_v54 = vld [vmem:[%s259_s17] ss:$8 sm:$0xf] }
 0x43e   :  { %262 = vst.msk [vmem:[#allocation2 + $0x24] ss:$8 sm:$0xf] %vm6270_vm0, %v260_v54 }
 0x44a   :  { %v5539_v26 = vpop.eup %5538 }
 0x44b   :  { %v1010_v27 = vmul.f32 %v5539_v26, %v5537_v55 }
 0x44d   :  { %v1011_v28 = vpack.c.bf16 %v1010_v27, %v1010_v27 }
 0x44f   :  { %1012 = vst [vmem:[#allocation3] sm:$0x8] %v1011_v28  ;;  %v1018_v29 = vrot.slane %v1011_v28, 3 }
 0x451   :  { %1053 = vmatmul.mubr.bf16.vlgmr.msra.gmra.mxu0 %v1018_v29  ;;  %1094 = vmatmul.mubr.bf16.vlgmr.msra.gmra.mxu1 %v1018_v29 }
 0x452   :  { %1140 = vmatpush1.bf16.msra.mxu0 %v6442_v56  ;;  %1181 = vmatpush1.bf16.msra.mxu1 %v6445_v57 }
 0x453   :  { %1141 = vmatprep.subr.bf16.mxu0 %v6448_v58  ;;  %1182 = vmatprep.subr.bf16.mxu1 %v6451_v59 }
 0x454   :  { %1171 = vmatprep.mubr.bf16.mxu0 %v6106_v2  ;;  %1212 = vmatprep.mubr.bf16.mxu1 %v6106_v2 }
 0x456   :  { %1142 = vmatpush1.bf16.msra.mxu0 %v6456_v60  ;;  %1183 = vmatpush1.bf16.msra.mxu1 %v6459_v61 }
 0x457   :  { %1143 = vmatprep.subr.bf16.mxu0 %v6462_v62  ;;  %1184 = vmatprep.subr.bf16.mxu1 %v6465_v1 }
 0x45a   :  { %1144 = vmatpush1.bf16.msra.mxu0 %v6468_v3  ;;  %1185 = vmatpush1.bf16.msra.mxu1 %v6471_v0 }
 0x45b   :  { %1145 = vmatprep.subr.bf16.mxu0 %v6474_v4  ;;  %1186 = vmatprep.subr.bf16.mxu1 %v6477_v5 }
 0x45e   :  { %1146 = vmatpush1.bf16.msra.mxu0 %v6480_v6  ;;  %1187 = vmatpush1.bf16.msra.mxu1 %v6483_v7 }
 0x45f   :  { %1147 = vmatprep.subr.bf16.mxu0 %v6486_v8  ;;  %1188 = vmatprep.subr.bf16.mxu1 %v6543_v50 }
 0x462   :  { %1148 = vmatpush1.bf16.msra.mxu0 %v6490_v9  ;;  %1189 = vmatpush1.bf16.msra.mxu1 %v6547_v32 }
 0x463   :  { %1149 = vmatprep.subr.bf16.mxu0 %v6494_v10  ;;  %1190 = vmatprep.subr.bf16.mxu1 %v6551_v33 }
 0x466   :  { %1150 = vmatpush1.bf16.msra.mxu0 %v6498_v11  ;;  %1191 = vmatpush1.bf16.msra.mxu1 %v6555_v35 }
 0x467   :  { %1151 = vmatprep.subr.bf16.mxu0 %v6502_v12  ;;  %1192 = vmatprep.subr.bf16.mxu1 %v6559_v36 }
 0x46a   :  { %1152 = vmatpush1.bf16.msra.mxu0 %v6562_v38  ;;  %1193 = vmatpush1.bf16.msra.mxu1 %v6565_v13 }
 0x46b   :  { %1153 = vmatprep.subr.bf16.mxu0 %v6568_v14  ;;  %1194 = vmatprep.subr.bf16.mxu1 %v6571_v15 }
 0x46e   :  { %1154 = vmatpush1.bf16.msra.mxu0 %v6574_v16  ;;  %1195 = vmatpush1.bf16.msra.mxu1 %v6577_v17 }
 0x46f   :  { %1273 = vmatprep.subr.bf16.mxu0 %v6512_v21  ;;  %1314 = vmatprep.subr.bf16.mxu1 %v6515_v24 }
 0x511   :  { %v1054_v23 = vpop.f32.mrf.mxu0  ;;  %v1095_v43 = vpop.f32.mrf.mxu1 }
 0x512   :  { %v1102_v30 = vadd.f32 %v1054_v23, %v1013_v22  ;;  %v1104_v47 = vadd.f32 %v1095_v43, %v1015_v46 }
 0x513   :  { %v1056_v31 = vpop.f32.mrf.mxu0  ;;  %v1097_v34 = vpop.f32.mrf.mxu1 }
 0x514   :  { %v4960_v37 = vmul.f32 -1.442695, %v1102_v30  ;;  %v1103_v39 = vadd.f32 %v1056_v31, %v1014_v63  ;;  %v4962_v49 = vmul.f32 -1.442695, %v1104_v47  ;;  %v1105_v53 = vadd.f32 %v1097_v34, %v1016_v48 }
 0x515   :  { %v1058_v40 = vpop.f32.mrf.mxu0  ;;  %v1099_v41 = vpop.f32.mrf.mxu1 }
 0x516   :  { %5540 = vpow2.f32 %v4960_v37  ;;  %v4961_v42 = vmul.f32 -1.442695, %v1103_v39  ;;  %v273_v39 = vld [vmem:[%s272_s19] ss:$8 sm:$0xf] }
 0x517   :  { %v1059_v44 = vpop.f32.mrf.mxu0  ;;  %v1100_v45 = vpop.f32.mrf.mxu1  ;;  %275 = vst.msk [vmem:[#allocation2 + $0x25] ss:$8 sm:$0xf] %vm6270_vm0, %v273_v39 }
 0x518   :  { %5542 = vpow2.f32 %v4961_v42  ;;  %v1136_v42 = vld [vmem:[#allocation2 + $0x28] sm:$0xc] }
 0x519   :  { %5544 = vpow2.f32 %v4962_v49 }
 0x523   :  { %v5541_v51 = vpop.eup %5540 }
 0x524   :  { %v1115_v52 = vadd.f32 1.0, %v5541_v51 }
 0x525   :  { %v5543_v55 = vpop.eup %5542 }
 0x526   :  { %5546 = vrcp.f32 %v1115_v52  ;;  %v1116_v26 = vadd.f32 1.0, %v5543_v55  ;;  %v5545_v27 = vpop.eup %5544 }
 0x527   :  { %5548 = vtanh.f32 %v1105_v53  ;;  %v1117_v22 = vadd.f32 1.0, %v5545_v27 }
 0x528   :  { %5550 = vrcp.f32 %v1116_v26 }
 0x529   :  { %5552 = vrcp.f32 %v1117_v22 }
 0x533   :  { %v5547_v28 = vpop.eup %5546 }
 0x534   :  { %v5549_v29 = vpop.eup %5548 }
 0x535   :  { %v5551_v19 = vpop.eup %5550  ;;  %v1129_v43 = vmul.f32 %v5549_v29, %v5547_v28  ;;  %v1137_v28 = vld [vmem:[#allocation2 + $0x30] sm:$0xc] }
 0x536   :  { %v1128_v23 = vmul.f32 %v5551_v19, %v1126_v18  ;;  %v5553_v30 = vpop.eup %5552  ;;  %v1138_v19 = vld [vmem:[#allocation2 + $0x38] sm:$0xc] }
 0x538   :  { %v6587_v63 = vadd.f32 %v1129_v43, %v1128_v23 }
 0x53a   :  { %5554 = vtanh.f32 %v6587_v63 }
 0x547   :  { %v5555_v31 = vpop.eup %5554 }
 0x548   :  { %v1132_v34 = vmul.f32 %v5555_v31, %v5553_v30 }
 0x54a   :  { %v1133_v37 = vpack.c.bf16 %v1132_v34, %v1132_v34 }
 0x54c   :  { %1134 = vst [vmem:[#allocation3 + $0x4] sm:$0x1] %v1133_v37  ;;  %1172 = vmatmul.mubr.bf16.vlgmr.msra.gmra.mxu0 %v1133_v37  ;;  %1213 = vmatmul.mubr.bf16.vlgmr.msra.gmra.mxu1 %v1133_v37 }
 0x54d   :  { %1274 = vmatpush1.bf16.msra.mxu0 %v6442_v56  ;;  %1315 = vmatpush1.bf16.msra.mxu1 %v6445_v57 }
 0x54e   :  { %1275 = vmatprep.subr.bf16.mxu0 %v6448_v58  ;;  %1316 = vmatprep.subr.bf16.mxu1 %v6451_v59 }
 0x54f   :  { %1305 = vmatprep.mubr.bf16.mxu0 %v6106_v2  ;;  %1346 = vmatprep.mubr.bf16.mxu1 %v6106_v2 }
 0x551   :  { %1276 = vmatpush1.bf16.msra.mxu0 %v6456_v60  ;;  %1317 = vmatpush1.bf16.msra.mxu1 %v6459_v61 }
 0x552   :  { %1277 = vmatprep.subr.bf16.mxu0 %v6462_v62  ;;  %1318 = vmatprep.subr.bf16.mxu1 %v6465_v1 }
 0x555   :  { %1278 = vmatpush1.bf16.msra.mxu0 %v6468_v3  ;;  %1319 = vmatpush1.bf16.msra.mxu1 %v6471_v0 }
 0x556   :  { %1279 = vmatprep.subr.bf16.mxu0 %v6474_v4  ;;  %1320 = vmatprep.subr.bf16.mxu1 %v6477_v5 }
 0x559   :  { %1280 = vmatpush1.bf16.msra.mxu0 %v6480_v6  ;;  %1321 = vmatpush1.bf16.msra.mxu1 %v6483_v7 }
 0x55a   :  { %1281 = vmatprep.subr.bf16.mxu0 %v6486_v8  ;;  %1322 = vmatprep.subr.bf16.mxu1 %v6543_v50 }
 0x55d   :  { %1282 = vmatpush1.bf16.msra.mxu0 %v6490_v9  ;;  %1323 = vmatpush1.bf16.msra.mxu1 %v6547_v32 }
 0x55e   :  { %1283 = vmatprep.subr.bf16.mxu0 %v6494_v10  ;;  %1324 = vmatprep.subr.bf16.mxu1 %v6551_v33 }
 0x561   :  { %1284 = vmatpush1.bf16.msra.mxu0 %v6498_v11  ;;  %1325 = vmatpush1.bf16.msra.mxu1 %v6555_v35 }
 0x562   :  { %1285 = vmatprep.subr.bf16.mxu0 %v6502_v12  ;;  %1326 = vmatprep.subr.bf16.mxu1 %v6559_v36 }
 0x565   :  { %1286 = vmatpush1.bf16.msra.mxu0 %v6562_v38  ;;  %1327 = vmatpush1.bf16.msra.mxu1 %v6565_v13 }
 0x566   :  { %1287 = vmatprep.subr.bf16.mxu0 %v6568_v14  ;;  %1328 = vmatprep.subr.bf16.mxu1 %v6571_v15 }
 0x569   :  { %1288 = vmatpush1.bf16.msra.mxu0 %v6574_v16  ;;  %1329 = vmatpush1.bf16.msra.mxu1 %v6577_v17 }
 0x56a   :  { %1407 = vmatprep.subr.bf16.mxu0 %v6512_v21  ;;  %1448 = vmatprep.subr.bf16.mxu1 %v6515_v24  ;;  %v1135_v21 = vld [vmem:[#allocation2 + $0x20] sm:$0xc] }
 0x60c   :  { %v1173_v24 = vpop.f32.mrf.mxu0  ;;  %v1214_v40 = vpop.f32.mrf.mxu1 }
 0x60d   :  { %v1225_v41 = vrot.slane %v1173_v24, 6  ;;  %v1227_v27 = vrot.slane %v1214_v40, 6 }
 0x60e   :  { %v1175_v44 = vpop.f32.mrf.mxu0  ;;  %v1216_v45 = vpop.f32.mrf.mxu1 }
 0x60f   :  { %v1233_v46 = vadd.f32 %v1225_v41, %v1135_v21  ;;  %v1226_v47 = vrot.slane %v1175_v44, 6  ;;  %v1235_v29 = vadd.f32 %v1227_v27, %v1137_v28  ;;  %v1228_v18 = vrot.slane %v1216_v45, 6 }
 0x610   :  { %v1177_v48 = vpop.f32.mrf.mxu0  ;;  %v1218_v49 = vpop.f32.mrf.mxu1  ;;  %v1257_v21 = vrot.slane %v6587_v63, 6 }
 0x611   :  { %v4963_v51 = vmul.f32 -1.442695, %v1233_v46  ;;  %v1234_v53 = vadd.f32 %v1226_v47, %v1136_v42  ;;  %v4965_v22 = vmul.f32 -1.442695, %v1235_v29  ;;  %v1236_v43 = vadd.f32 %v1228_v18, %v1138_v19 }
 0x612   :  { %v1178_v52 = vpop.f32.mrf.mxu0  ;;  %v1219_v55 = vpop.f32.mrf.mxu1 }
 0x613   :  { %5556 = vpow2.f32 %v4963_v51  ;;  %v4964_v26 = vmul.f32 -1.442695, %v1234_v53 }
 0x615   :  { %5558 = vpow2.f32 %v4964_v26 }
 0x616   :  { %5560 = vpow2.f32 %v4965_v22 }
 0x620   :  { %v5557_v23 = vpop.eup %5556 }
 0x621   :  { %v1246_v30 = vadd.f32 1.0, %v5557_v23  ;;  %v5276_v23 = vld [vmem:[#allocation10 + $0xe4] ss:$16 sps:$4 sm:$0xff]  }
 0x622   :  { %v5559_v31 = vpop.eup %5558 }
 0x623   :  { %5562 = vrcp.f32 %v1246_v30  ;;  %v1247_v34 = vadd.f32 1.0, %v5559_v31  ;;  %v5561_v37 = vpop.eup %5560  ;;  %v5274_v30 = vld [vmem:[#allocation10 + $0xe0] ss:$16 sps:$4 sm:$0xff]   ;;  %v5277_v31 = vld [vmem:[#allocation10 + $0xe8] ss:$16 sps:$4 sm:$0xff]  }
 0x624   :  { %5564 = vtanh.f32 %v1236_v43  ;;  %v1248_v40 = vadd.f32 1.0, %v5561_v37  ;;  %v5279_v43 = vld [vmem:[#allocation10 + $0xec] ss:$16 sps:$4 sm:$0xff]  }
 0x625   :  { %5566 = vrcp.f32 %v1247_v34  ;;  %v5282_v34 = vld [vmem:[#allocation10 + $0xc4] ss:$16 sps:$4 sm:$0xff]   ;;  %v5285_v37 = vld [vmem:[#allocation10 + $0xcc] ss:$16 sps:$4 sm:$0xff]  }
 0x626   :  { %5568 = vrcp.f32 %v1248_v40  ;;  %v5286_v40 = vld [vmem:[#allocation10 + $0xa0] ss:$16 sps:$4 sm:$0xff]  }
 0x630   :  { %v5563_v54 = vpop.eup %5562 }
 0x631   :  { %v5565_v39 = vpop.eup %5564 }
 0x632   :  { %v5567_v24 = vpop.eup %5566  ;;  %v1260_v42 = vmul.f32 %v5565_v39, %v5563_v54  ;;  %v5280_v54 = vld [vmem:[#allocation10 + $0xc0] ss:$16 sps:$4 sm:$0xff]   ;;  %v5283_v39 = vld [vmem:[#allocation10 + $0xc8] ss:$16 sps:$4 sm:$0xff]  }
 0x633   :  { %v1259_v41 = vmul.f32 %v5567_v24, %v1257_v21  ;;  %v5569_v45 = vpop.eup %5568  ;;  %v5288_v21 = vld [vmem:[#allocation10 + $0xa4] ss:$16 sps:$4 sm:$0xff]   ;;  %v5291_v24 = vld [vmem:[#allocation10 + $0xac] ss:$16 sps:$4 sm:$0xff]  }
 0x635   :  { %v6629_v44 = vadd.f32 %v1260_v42, %v1259_v41  ;;  %v5289_v41 = vld [vmem:[#allocation10 + $0xa8] ss:$16 sps:$4 sm:$0xff]   ;;  %v5294_v42 = vld [vmem:[#allocation10 + $0x84] ss:$16 sps:$4 sm:$0xff]  }
 0x637   :  { %5570 = vtanh.f32 %v6629_v44  ;;  %v1391_v51 = vrot.slane %v6629_v44, 6  ;;  %v5297_v44 = vld [vmem:[#allocation10 + $0x8c] ss:$16 sps:$4 sm:$0xff]  }
 0x644   :  { %v5571_v46 = vpop.eup %5570 }
 0x645   :  { %v1263_v47 = vmul.f32 %v5571_v46, %v5569_v45  ;;  %v5292_v45 = vld [vmem:[#allocation10 + $0x80] ss:$16 sps:$4 sm:$0xff]   ;;  %v5295_v46 = vld [vmem:[#allocation10 + $0x88] ss:$16 sps:$4 sm:$0xff]  }
 0x647   :  { %v1264_v48 = vpack.c.bf16 %v1263_v47, %v1263_v47  ;;  %v5300_v47 = vld [vmem:[#allocation10 + $0x64] ss:$16 sps:$4 sm:$0xff]  }
 0x649   :  { %1265 = vst [vmem:[#allocation3 + $0x4] sm:$0x2] %v1264_v48  ;;  %v1271_v49 = vrot.slane %v1264_v48, 1  ;;  %v5303_v48 = vld [vmem:[#allocation10 + $0x6c] ss:$16 sps:$4 sm:$0xff]  }
 0x64b   :  { %1306 = vmatmul.mubr.bf16.vlgmr.msra.gmra.mxu0 %v1271_v49  ;;  %1347 = vmatmul.mubr.bf16.vlgmr.msra.gmra.mxu1 %v1271_v49  ;;  %v5298_v49 = vld [vmem:[#allocation10 + $0x60] ss:$16 sps:$4 sm:$0xff]  }
 0x64c   :  { %1408 = vmatpush1.bf16.msra.mxu0 %v6442_v56  ;;  %1449 = vmatpush1.bf16.msra.mxu1 %v6445_v57  ;;  %v286_v56 = vld [vmem:[%s285_s27] ss:$8 sm:$0xf] }
 0x64d   :  { %1409 = vmatprep.subr.bf16.mxu0 %v6448_v58  ;;  %1450 = vmatprep.subr.bf16.mxu1 %v6451_v59  ;;  %288 = vst.msk [vmem:[#allocation2 + $0x26] ss:$8 sm:$0xf] %vm6270_vm0, %v286_v56  ;;  %v299_v57 = vld [vmem:[%s298_s28] ss:$8 sm:$0xf] }
 0x64e   :  { %1439 = vmatprep.mubr.bf16.mxu0 %v6106_v2  ;;  %1480 = vmatprep.mubr.bf16.mxu1 %v6106_v2  ;;  %301 = vst.msk [vmem:[#allocation2 + $0x27] ss:$8 sm:$0xf] %vm6270_vm0, %v299_v57  ;;  %v1266_v58 = vld [vmem:[#allocation2 + $0x20] sm:$0x30] }
 0x64f   :  { %v5301_v56 = vld [vmem:[#allocation10 + $0x68] ss:$16 sps:$4 sm:$0xff]   ;;  %v5306_v57 = vld [vmem:[#allocation10 + $0x44] ss:$16 sps:$4 sm:$0xff]  }
 0x650   :  { %1410 = vmatpush1.bf16.msra.mxu0 %v6456_v60  ;;  %1451 = vmatpush1.bf16.msra.mxu1 %v6459_v61 }
 0x651   :  { %1411 = vmatprep.subr.bf16.mxu0 %v6462_v62  ;;  %1452 = vmatprep.subr.bf16.mxu1 %v6465_v1  ;;  %v1267_v62 = vld [vmem:[#allocation2 + $0x28] sm:$0x30] }
 0x654   :  { %1412 = vmatpush1.bf16.msra.mxu0 %v6468_v3  ;;  %1453 = vmatpush1.bf16.msra.mxu1 %v6471_v0 }
 0x655   :  { %1413 = vmatprep.subr.bf16.mxu0 %v6474_v4  ;;  %1454 = vmatprep.subr.bf16.mxu1 %v6477_v5 }
 0x658   :  { %1414 = vmatpush1.bf16.msra.mxu0 %v6480_v6  ;;  %1455 = vmatpush1.bf16.msra.mxu1 %v6483_v7 }
 0x659   :  { %1415 = vmatprep.subr.bf16.mxu0 %v6486_v8  ;;  %1456 = vmatprep.subr.bf16.mxu1 %v6543_v50 }
 0x65c   :  { %1416 = vmatpush1.bf16.msra.mxu0 %v6490_v9  ;;  %1457 = vmatpush1.bf16.msra.mxu1 %v6547_v32 }
 0x65d   :  { %1417 = vmatprep.subr.bf16.mxu0 %v6494_v10  ;;  %1458 = vmatprep.subr.bf16.mxu1 %v6551_v33  ;;  %v1269_v33 = vld [vmem:[#allocation2 + $0x38] sm:$0x30] }
 0x660   :  { %1418 = vmatpush1.bf16.msra.mxu0 %v6498_v11  ;;  %1459 = vmatpush1.bf16.msra.mxu1 %v6555_v35 }
 0x661   :  { %1419 = vmatprep.subr.bf16.mxu0 %v6502_v12  ;;  %1460 = vmatprep.subr.bf16.mxu1 %v6559_v36  ;;  %v1268_v12 = vld [vmem:[#allocation2 + $0x30] sm:$0x30] }
 0x664   :  { %1420 = vmatpush1.bf16.msra.mxu0 %v6562_v38  ;;  %1461 = vmatpush1.bf16.msra.mxu1 %v6565_v13 }
 0x665   :  { %1421 = vmatprep.subr.bf16.mxu0 %v6568_v14  ;;  %1462 = vmatprep.subr.bf16.mxu1 %v6571_v15 }
 0x668   :  { %1422 = vmatpush1.bf16.msra.mxu0 %v6574_v16  ;;  %1463 = vmatpush1.bf16.msra.mxu1 %v6577_v17 }
 0x669   :  { %1791 = vmatprep.subr.bf16.mxu0 %v5276_v23  ;;  %1834 = vmatprep.subr.bf16.mxu1 %v5279_v43 }
 0x70b   :  { %v1307_v59 = vpop.f32.mrf.mxu0  ;;  %v1348_v60 = vpop.f32.mrf.mxu1 }
 0x70c   :  { %v1359_v61 = vrot.slane %v1307_v59, 4  ;;  %v1361_v25 = vrot.slane %v1348_v60, 4  ;;  %v5304_v59 = vld [vmem:[#allocation10 + $0x40] ss:$16 sps:$4 sm:$0xff]   ;;  %v5307_v60 = vld [vmem:[#allocation10 + $0x48] ss:$16 sps:$4 sm:$0xff]  }
 0x70d   :  { %v1309_v1 = vpop.f32.mrf.mxu0  ;;  %v1350_v3 = vpop.f32.mrf.mxu1 }
 0x70e   :  { %v1367_v0 = vadd.f32 %v1359_v61, %v1266_v58  ;;  %v1360_v4 = vrot.slane %v1309_v1, 4  ;;  %v1369_v50 = vadd.f32 %v1361_v25, %v1268_v12  ;;  %v1362_v32 = vrot.slane %v1350_v3, 4  ;;  %v5309_v58 = vld [vmem:[#allocation10 + $0x4c] ss:$16 sps:$4 sm:$0xff]   ;;  %v5310_v61 = vld [vmem:[#allocation10 + $0x20] ss:$16 sps:$4 sm:$0xff]  }
 0x70f   :  { %v1311_v5 = vpop.f32.mrf.mxu0  ;;  %v1352_v6 = vpop.f32.mrf.mxu1  ;;  %v5313_v1 = vld [vmem:[#allocation10 + $0x28] ss:$16 sps:$4 sm:$0xff]   ;;  %v5315_v3 = vld [vmem:[#allocation10 + $0x2c] ss:$16 sps:$4 sm:$0xff]   ;;  %v1401_v12 = vld [vmem:[#allocation2 + $0x28] sm:$0xc0] }
 0x710   :  { %v4966_v7 = vmul.f32 -1.442695, %v1367_v0  ;;  %v1368_v8 = vadd.f32 %v1360_v4, %v1267_v62  ;;  %v4968_v35 = vmul.f32 -1.442695, %v1369_v50  ;;  %v1370_v38 = vadd.f32 %v1362_v32, %v1269_v33  ;;  %v5312_v62 = vld [vmem:[#allocation10 + $0x24] ss:$16 sps:$4 sm:$0xff]  }
 0x711   :  { %v1312_v9 = vpop.f32.mrf.mxu0  ;;  %v1353_v10 = vpop.f32.mrf.mxu1  ;;  %v5318_v0 = vld [vmem:[#allocation10 + $0x4] ss:$16 sps:$4 sm:$0xff]   ;;  %v5321_v4 = vld [vmem:[#allocation10 + $0xc] ss:$16 sps:$4 sm:$0xff]   ;;  %v5316_v5 = vld [vmem:[#allocation10] ss:$16 sps:$4 sm:$0xff]  }
 0x712   :  { %5572 = vpow2.f32 %v4966_v7  ;;  %v4967_v11 = vmul.f32 -1.442695, %v1368_v8  ;;  %v5319_v6 = vld [vmem:[#allocation10 + $0x8] ss:$16 sps:$4 sm:$0xff]   ;;  %v6674_v7 = vld [vmem:[#allocation12 + $0x1e4] ss:$16 sps:$4 sm:$0xff]  }
 0x713   :  { %v6676_v8 = vld [vmem:[#allocation12 + $0x1ec] ss:$16 sps:$4 sm:$0xff]  }
 0x714   :  { %5574 = vpow2.f32 %v4967_v11  ;;  %v1400_v9 = vld [vmem:[#allocation2 + $0x20] sm:$0xc0] }
 0x715   :  { %5576 = vpow2.f32 %v4968_v35 }
 0x71f   :  { %v5573_v36 = vpop.eup %5572 }
 0x720   :  { %v1380_v13 = vadd.f32 1.0, %v5573_v36 }
 0x721   :  { %v5575_v14 = vpop.eup %5574 }
 0x722   :  { %5578 = vrcp.f32 %v1380_v13  ;;  %v1381_v15 = vadd.f32 1.0, %v5575_v14  ;;  %v5577_v16 = vpop.eup %5576 }
 0x723   :  { %5580 = vtanh.f32 %v1370_v38  ;;  %v1382_v52 = vadd.f32 1.0, %v5577_v16 }
 0x724   :  { %5582 = vrcp.f32 %v1381_v15 }
 0x725   :  { %5584 = vrcp.f32 %v1382_v52 }
 0x72f   :  { %v5579_v17 = vpop.eup %5578 }
 0x730   :  { %v5581_v63 = vpop.eup %5580 }
 0x731   :  { %v5583_v53 = vpop.eup %5582  ;;  %v1394_v26 = vmul.f32 %v5581_v63, %v5579_v17 }
 0x732   :  { %v1393_v55 = vmul.f32 %v5583_v53, %v1391_v51  ;;  %v5585_v28 = vpop.eup %5584  ;;  %v1402_v51 = vld [vmem:[#allocation2 + $0x30] sm:$0xc0] }
 0x734   :  { %v6669_v27 = vadd.f32 %v1394_v26, %v1393_v55  ;;  %v1403_v55 = vld [vmem:[#allocation2 + $0x38] sm:$0xc0] }
 0x736   :  { %5586 = vtanh.f32 %v6669_v27 }
 0x743   :  { %v5587_v29 = vpop.eup %5586 }
 0x744   :  { %v1397_v18 = vmul.f32 %v5587_v29, %v5585_v28 }
 0x746   :  { %v1398_v19 = vpack.c.bf16 %v1397_v18, %v1397_v18 }
 0x748   :  { %1399 = vst [vmem:[#allocation3 + $0x4] sm:$0x4] %v1398_v19  ;;  %v1405_v22 = vrot.slane %v1398_v19, 2 }
 0x74a   :  { %1440 = vmatmul.mubr.bf16.vlgmr.msra.gmra.mxu0 %v1405_v22  ;;  %1481 = vmatmul.mubr.bf16.vlgmr.msra.gmra.mxu1 %v1405_v22 }
 0x74b   :  { %1823 = vmatprep.mubr.bf16.mxu0 %v6106_v2  ;;  %1866 = vmatprep.mubr.bf16.mxu1 %v6106_v2 }
 0x74c   :  { %1792 = vmatpush1.bf16.msra.mxu0 %v5274_v30  ;;  %1835 = vmatpush1.bf16.msra.mxu1 %v5277_v31  ;;  %v1525_v31 = vrot.slane %v6669_v27, 6 }
 0x74d   :  { %1793 = vmatprep.subr.bf16.mxu0 %v5282_v34  ;;  %1836 = vmatprep.subr.bf16.mxu1 %v5285_v37 }
 0x750   :  { %1794 = vmatpush1.bf16.msra.mxu0 %v5280_v54  ;;  %1837 = vmatpush1.bf16.msra.mxu1 %v5283_v39 }
 0x751   :  { %1795 = vmatprep.subr.bf16.mxu0 %v5288_v21  ;;  %1838 = vmatprep.subr.bf16.mxu1 %v5291_v24 }
 0x754   :  { %1796 = vmatpush1.bf16.msra.mxu0 %v5286_v40  ;;  %1839 = vmatpush1.bf16.msra.mxu1 %v5289_v41 }
 0x755   :  { %1797 = vmatprep.subr.bf16.mxu0 %v5294_v42  ;;  %1840 = vmatprep.subr.bf16.mxu1 %v5297_v44  ;;  %v6681_v44 = vld [vmem:[#allocation12 + $0x1e0] ss:$16 sps:$4 sm:$0xff]  }
 0x758   :  { %1798 = vmatpush1.bf16.msra.mxu0 %v5292_v45  ;;  %1841 = vmatpush1.bf16.msra.mxu1 %v5295_v46  ;;  %v6683_v45 = vld [vmem:[#allocation12 + $0x1e8] ss:$16 sps:$4 sm:$0xff]   ;;  %v6685_v46 = vld [vmem:[#allocation12 + $0x1c4] ss:$16 sps:$4 sm:$0xff]  }
 0x759   :  { %1799 = vmatprep.subr.bf16.mxu0 %v5300_v47  ;;  %1842 = vmatprep.subr.bf16.mxu1 %v5303_v48  ;;  %v6687_v47 = vld [vmem:[#allocation12 + $0x1cc] ss:$16 sps:$4 sm:$0xff]   ;;  %v6691_v48 = vld [vmem:[#allocation12 + $0x1c0] ss:$16 sps:$4 sm:$0xff]  }
 0x75c   :  { %1800 = vmatpush1.bf16.msra.mxu0 %v5298_v49  ;;  %1843 = vmatpush1.bf16.msra.mxu1 %v5301_v56  ;;  %v6693_v49 = vld [vmem:[#allocation12 + $0x1c8] ss:$16 sps:$4 sm:$0xff]   ;;  %v6697_v56 = vld [vmem:[#allocation12 + $0x1a4] ss:$16 sps:$4 sm:$0xff]  }
 0x75d   :  { %1801 = vmatprep.subr.bf16.mxu0 %v5306_v57  ;;  %1844 = vmatprep.subr.bf16.mxu1 %v5309_v58  ;;  %v6699_v57 = vld [vmem:[#allocation12 + $0x1ac] ss:$16 sps:$4 sm:$0xff]   ;;  %v6705_v58 = vld [vmem:[#allocation12 + $0x1a0] ss:$16 sps:$4 sm:$0xff]  }
 0x760   :  { %1802 = vmatpush1.bf16.msra.mxu0 %v5304_v59  ;;  %1845 = vmatpush1.bf16.msra.mxu1 %v5307_v60  ;;  %v6707_v59 = vld [vmem:[#allocation12 + $0x1a8] ss:$16 sps:$4 sm:$0xff]   ;;  %v6711_v60 = vld [vmem:[#allocation12 + $0x184] ss:$16 sps:$4 sm:$0xff]  }
 0x761   :  { %1803 = vmatprep.subr.bf16.mxu0 %v5312_v62  ;;  %1846 = vmatprep.subr.bf16.mxu1 %v5315_v3  ;;  %v6717_v62 = vld [vmem:[#allocation12 + $0x180] ss:$16 sps:$4 sm:$0xff]   ;;  %v6723_v3 = vld [vmem:[#allocation12 + $0x164] ss:$16 sps:$4 sm:$0xff]  }
 0x764   :  { %1804 = vmatpush1.bf16.msra.mxu0 %v5310_v61  ;;  %1847 = vmatpush1.bf16.msra.mxu1 %v5313_v1  ;;  %v6713_v61 = vld [vmem:[#allocation12 + $0x18c] ss:$16 sps:$4 sm:$0xff]   ;;  %v6719_v1 = vld [vmem:[#allocation12 + $0x188] ss:$16 sps:$4 sm:$0xff]  }
 0x765   :  { %1805 = vmatprep.subr.bf16.mxu0 %v5318_v0  ;;  %1848 = vmatprep.subr.bf16.mxu1 %v5321_v4  ;;  %v6725_v0 = vld [vmem:[#allocation12 + $0x16c] ss:$16 sps:$4 sm:$0xff]   ;;  %v6729_v4 = vld [vmem:[#allocation12 + $0x160] ss:$16 sps:$4 sm:$0xff]  }
 0x768   :  { %1806 = vmatpush1.bf16.msra.mxu0 %v5316_v5  ;;  %1849 = vmatpush1.bf16.msra.mxu1 %v5319_v6  ;;  %v6731_v5 = vld [vmem:[#allocation12 + $0x168] ss:$16 sps:$4 sm:$0xff]   ;;  %v6735_v6 = vld [vmem:[#allocation12 + $0x144] ss:$16 sps:$4 sm:$0xff]  }
 0x769   :  { %2054 = vmatprep.subr.bf16.mxu0 %v6674_v7  ;;  %2095 = vmatprep.subr.bf16.mxu1 %v6676_v8 }
 0x80a   :  { %v1441_v10 = vpop.f32.mrf.mxu0  ;;  %v1482_v11 = vpop.f32.mrf.mxu1 }
 0x80b   :  { %v1493_v25 = vrot.slane %v1441_v10, 2  ;;  %v1495_v63 = vrot.slane %v1482_v11, 2  ;;  %v6741_v10 = vld [vmem:[#allocation12 + $0x140] ss:$16 sps:$4 sm:$0xff]   ;;  %v6743_v11 = vld [vmem:[#allocation12 + $0x148] ss:$16 sps:$4 sm:$0xff]  }
 0x80c   :  { %v1443_v50 = vpop.f32.mrf.mxu0  ;;  %v1484_v32 = vpop.f32.mrf.mxu1 }
 0x80d   :  { %v1501_v33 = vadd.f32 %v1493_v25, %v1400_v9  ;;  %v1494_v35 = vrot.slane %v1443_v50, 2  ;;  %v1503_v53 = vadd.f32 %v1495_v63, %v1402_v51  ;;  %v1496_v52 = vrot.slane %v1484_v32, 2  ;;  %v6737_v9 = vld [vmem:[#allocation12 + $0x14c] ss:$16 sps:$4 sm:$0xff]   ;;  %v6747_v25 = vld [vmem:[#allocation12 + $0x124] ss:$16 sps:$4 sm:$0xff]  }
 0x80e   :  { %v1445_v36 = vpop.f32.mrf.mxu0  ;;  %v1486_v38 = vpop.f32.mrf.mxu1  ;;  %v6753_v50 = vld [vmem:[#allocation12 + $0x120] ss:$16 sps:$4 sm:$0xff]   ;;  %v6755_v32 = vld [vmem:[#allocation12 + $0x128] ss:$16 sps:$4 sm:$0xff]  }
 0x80f   :  { %v4969_v13 = vmul.f32 -1.442695, %v1501_v33  ;;  %v1502_v14 = vadd.f32 %v1494_v35, %v1401_v12  ;;  %v4971_v26 = vmul.f32 -1.442695, %v1503_v53  ;;  %v1504_v29 = vadd.f32 %v1496_v52, %v1403_v55  ;;  %v6749_v12 = vld [vmem:[#allocation12 + $0x12c] ss:$16 sps:$4 sm:$0xff]  }
 0x810   :  { %v1446_v15 = vpop.f32.mrf.mxu0  ;;  %v1487_v16 = vpop.f32.mrf.mxu1  ;;  %v6759_v33 = vld [vmem:[#allocation12 + $0x104] ss:$16 sps:$4 sm:$0xff]   ;;  %v6761_v35 = vld [vmem:[#allocation12 + $0x10c] ss:$16 sps:$4 sm:$0xff]   ;;  %v6765_v36 = vld [vmem:[#allocation12 + $0x100] ss:$16 sps:$4 sm:$0xff]  }
 0x811   :  { %5588 = vpow2.f32 %v4969_v13  ;;  %v4970_v17 = vmul.f32 -1.442695, %v1502_v14  ;;  %v6767_v38 = vld [vmem:[#allocation12 + $0x108] ss:$16 sps:$4 sm:$0xff]   ;;  %v6813_v15 = vshrl.u32 %v102_v20, 7 }
 0x812   :  { %v5005_v13 = vld [vmem:[%s7519_s1 + $0x2] sm:$0x3] }
 0x813   :  { %5590 = vpow2.f32 %v4970_v17  ;;  %v1889_v14 = vpack.c.bf16 %v5005_v13, %v5005_v13  ;;  %v1607_v16 = vsub.s32 0, %v6813_v15  ;;  %v1615_v17 = vsub.s32 2, %v6813_v15  ;;  %v1603_v63 = vld [vmem:[%s7524_s6] sm:$0xf] }
 0x814   :  { %5592 = vpow2.f32 %v4971_v26  ;;  %v1611_v51 = vsub.s32 1, %v6813_v15  ;;  %v1619_v53 = vsub.s32 3, %v6813_v15 }
 0x815   :  { %v1608_v52 = vrot.slane %v1603_v63, %v1607_v16  ;;  %v1616_v55 = vrot.slane %v1603_v63, %v1615_v17 }
 0x816   :  { %v1612_v20 = vrot.slane %v1603_v63, %v1611_v51  ;;  %v1620_v26 = vrot.slane %v1603_v63, %v1619_v53 }
 0x81e   :  { %v5589_v28 = vpop.eup %5588 }
 0x81f   :  { %v1514_v18 = vadd.f32 1.0, %v5589_v28 }
 0x820   :  { %v5591_v19 = vpop.eup %5590 }
 0x821   :  { %5594 = vrcp.f32 %v1514_v18  ;;  %v1515_v22 = vadd.f32 1.0, %v5591_v19  ;;  %v5593_v23 = vpop.eup %5592 }
 0x822   :  { %5596 = vtanh.f32 %v1504_v29  ;;  %v1516_v37 = vadd.f32 1.0, %v5593_v23 }
 0x823   :  { %5598 = vrcp.f32 %v1515_v22 }
 0x824   :  { %5600 = vrcp.f32 %v1516_v37 }
 0x82e   :  { %v5595_v43 = vpop.eup %5594 }
 0x82f   :  { %v5597_v30 = vpop.eup %5596 }
 0x830   :  { %v5599_v34 = vpop.eup %5598  ;;  %v1528_v39 = vmul.f32 %v5597_v30, %v5595_v43 }
 0x831   :  { %v1527_v54 = vmul.f32 %v5599_v34, %v1525_v31  ;;  %v5601_v24 = vpop.eup %5600 }
 0x833   :  { %v1529_v21 = vadd.f32 %v1528_v39, %v1527_v54 }
 0x835   :  { %5602 = vtanh.f32 %v1529_v21  ;;  %1535 = vst [vmem:[#allocation16 - $0x6] sm:$0xc0] %v1529_v21 }
 0x842   :  { %v5603_v40 = vpop.eup %5602 }
 0x843   :  { %v1531_v41 = vmul.f32 %v5603_v40, %v5601_v24 }
 0x845   :  { %v1532_v42 = vpack.c.bf16 %v1531_v41, %v1531_v41  ;;  %1534 = vst [vmem:[#allocation14 - $0x6] sm:$0xc0] %v1531_v41 }
 0x847   :  { %1533 = vst [vmem:[#allocation3 + $0x4] sm:$0x8] %v1532_v42 }
 0x84e   :  { %v5326_v27 = vld [vmem:[#allocation3] sm:$0xff]  }
 0x84f   :  { %1824 = vmatmul.mubr.bf16.vlgmr.msra.gmra.mxu0 %v5326_v27  ;;  %1867 = vmatmul.mubr.bf16.vlgmr.msra.gmra.mxu1 %v5326_v27 }
 0x850   :  { %2055 = vmatpush1.bf16.msra.mxu0 %v6681_v44  ;;  %2096 = vmatpush1.bf16.msra.mxu1 %v6683_v45 }
 0x851   :  { %2056 = vmatprep.subr.bf16.mxu0 %v6685_v46  ;;  %2097 = vmatprep.subr.bf16.mxu1 %v6687_v47 }
 0x852   :  { %2086 = vmatprep.mubr.bf16.mxu0 %v6106_v2  ;;  %2127 = vmatprep.mubr.bf16.mxu1 %v6106_v2 }
 0x854   :  { %2057 = vmatpush1.bf16.msra.mxu0 %v6691_v48  ;;  %2098 = vmatpush1.bf16.msra.mxu1 %v6693_v49 }
 0x855   :  { %2058 = vmatprep.subr.bf16.mxu0 %v6697_v56  ;;  %2099 = vmatprep.subr.bf16.mxu1 %v6699_v57 }
 0x858   :  { %2059 = vmatpush1.bf16.msra.mxu0 %v6705_v58  ;;  %2100 = vmatpush1.bf16.msra.mxu1 %v6707_v59 }
 0x859   :  { %2060 = vmatprep.subr.bf16.mxu0 %v6711_v60  ;;  %2101 = vmatprep.subr.bf16.mxu1 %v6713_v61 }
 0x85c   :  { %2061 = vmatpush1.bf16.msra.mxu0 %v6717_v62  ;;  %2102 = vmatpush1.bf16.msra.mxu1 %v6719_v1 }
 0x85d   :  { %2062 = vmatprep.subr.bf16.mxu0 %v6723_v3  ;;  %2103 = vmatprep.subr.bf16.mxu1 %v6725_v0 }
 0x860   :  { %2063 = vmatpush1.bf16.msra.mxu0 %v6729_v4  ;;  %2104 = vmatpush1.bf16.msra.mxu1 %v6731_v5 }
 0x861   :  { %2064 = vmatprep.subr.bf16.mxu0 %v6735_v6  ;;  %2105 = vmatprep.subr.bf16.mxu1 %v6737_v9 }
 0x864   :  { %2065 = vmatpush1.bf16.msra.mxu0 %v6741_v10  ;;  %2106 = vmatpush1.bf16.msra.mxu1 %v6743_v11 }
 0x865   :  { %2066 = vmatprep.subr.bf16.mxu0 %v6747_v25  ;;  %2107 = vmatprep.subr.bf16.mxu1 %v6749_v12 }
 0x868   :  { %2067 = vmatpush1.bf16.msra.mxu0 %v6753_v50  ;;  %2108 = vmatpush1.bf16.msra.mxu1 %v6755_v32 }
 0x869   :  { %2068 = vmatprep.subr.bf16.mxu0 %v6759_v33  ;;  %2109 = vmatprep.subr.bf16.mxu1 %v6761_v35 }
 0x86c   :  { %2069 = vmatpush1.bf16.msra.mxu0 %v6765_v36  ;;  %2110 = vmatpush1.bf16.msra.mxu1 %v6767_v38 }
 0x86d   :  { %2170 = vmatprep.subr.bf16.mxu0 %v6674_v7  ;;  %2211 = vmatprep.subr.bf16.mxu1 %v6676_v8 }
 0x86f   :  { %2087 = vmatmul.mubr.bf16.vlgmr.msra.gmra.mxu0 %v1889_v14  ;;  %2128 = vmatmul.mubr.bf16.vlgmr.msra.gmra.mxu1 %v1889_v14 }
 0x870   :  { %2171 = vmatpush1.bf16.msra.mxu0 %v6681_v44  ;;  %2212 = vmatpush1.bf16.msra.mxu1 %v6683_v45 }
 0x871   :  { %2172 = vmatprep.subr.bf16.mxu0 %v6685_v46  ;;  %2213 = vmatprep.subr.bf16.mxu1 %v6687_v47 }
 0x872   :  { %2202 = vmatprep.mubr.bf16.mxu0 %v6106_v2  ;;  %2243 = vmatprep.mubr.bf16.mxu1 %v6106_v2 }
 0x874   :  { %2173 = vmatpush1.bf16.msra.mxu0 %v6691_v48  ;;  %2214 = vmatpush1.bf16.msra.mxu1 %v6693_v49 }
 0x875   :  { %2174 = vmatprep.subr.bf16.mxu0 %v6697_v56  ;;  %2215 = vmatprep.subr.bf16.mxu1 %v6699_v57 }
 0x878   :  { %2175 = vmatpush1.bf16.msra.mxu0 %v6705_v58  ;;  %2216 = vmatpush1.bf16.msra.mxu1 %v6707_v59 }
 0x879   :  { %2176 = vmatprep.subr.bf16.mxu0 %v6711_v60  ;;  %2217 = vmatprep.subr.bf16.mxu1 %v6713_v61 }
 0x87c   :  { %2177 = vmatpush1.bf16.msra.mxu0 %v6717_v62  ;;  %2218 = vmatpush1.bf16.msra.mxu1 %v6719_v1 }
 0x87d   :  { %2178 = vmatprep.subr.bf16.mxu0 %v6723_v3  ;;  %2219 = vmatprep.subr.bf16.mxu1 %v6725_v0 }
 0x880   :  { %2179 = vmatpush1.bf16.msra.mxu0 %v6729_v4  ;;  %2220 = vmatpush1.bf16.msra.mxu1 %v6731_v5 }
 0x881   :  { %2180 = vmatprep.subr.bf16.mxu0 %v6735_v6  ;;  %2221 = vmatprep.subr.bf16.mxu1 %v6737_v9 }
 0x884   :  { %2181 = vmatpush1.bf16.msra.mxu0 %v6741_v10  ;;  %2222 = vmatpush1.bf16.msra.mxu1 %v6743_v11 }
 0x885   :  { %2182 = vmatprep.subr.bf16.mxu0 %v6747_v25  ;;  %2223 = vmatprep.subr.bf16.mxu1 %v6749_v12 }
 0x888   :  { %2183 = vmatpush1.bf16.msra.mxu0 %v6753_v50  ;;  %2224 = vmatpush1.bf16.msra.mxu1 %v6755_v32 }
 0x889   :  { %2184 = vmatprep.subr.bf16.mxu0 %v6759_v33  ;;  %2225 = vmatprep.subr.bf16.mxu1 %v6761_v35 }
 0x88c   :  { %2185 = vmatpush1.bf16.msra.mxu0 %v6765_v36  ;;  %2226 = vmatpush1.bf16.msra.mxu1 %v6767_v38 }
 0x88d   :  { %2304 = vmatprep.subr.bf16.mxu0 %v6674_v7  ;;  %2345 = vmatprep.subr.bf16.mxu1 %v6676_v8 }
 0x90f   :  { %v1825_v28 = vpop.f32.mrf.mxu0  ;;  %v1868_v29 = vpop.f32.mrf.mxu1 }
 0x910   :  { %v1826_v18 = vadd.f32 %v1825_v28, %v1608_v52  ;;  %v1869_v19 = vadd.f32 %v1868_v29, %v1616_v55 }
 0x911   :  { %v1827_v22 = vpop.f32.mrf.mxu0  ;;  %v1870_v23 = vpop.f32.mrf.mxu1 }
 0x912   :  { %1877 = vst [vmem:[#allocation2] sm:$0xff] %v1826_v18  ;;  %1879 = vst [vmem:[#allocation2 + $0x10] sm:$0xff] %v1869_v19  ;;  %v1828_v43 = vadd.f32 %v1827_v22, %v1612_v20  ;;  %v1871_v30 = vadd.f32 %v1870_v23, %v1620_v26 }
 0x913   :  { %v1829_v31 = vpop.f32.mrf.mxu0  ;;  %v1872_v34 = vpop.f32.mrf.mxu1 }
 0x914   :  { %1878 = vst [vmem:[#allocation2 + $0x8] sm:$0xff] %v1828_v43  ;;  %1880 = vst [vmem:[#allocation2 + $0x18] sm:$0xff] %v1871_v30  ;;  %v1830_v37 = vadd.f32 %v1829_v31, %v1608_v52  ;;  %v1873_v54 = vadd.f32 %v1872_v34, %v1616_v55 }
 0x915   :  { %v1831_v39 = vpop.f32.mrf.mxu0  ;;  %v1874_v21 = vpop.f32.mrf.mxu1 }
 0x916   :  { %1881 = vst [vmem:[#allocation2 + $0x20] sm:$0xff] %v1830_v37  ;;  %1883 = vst [vmem:[#allocation2 + $0x30] sm:$0xff] %v1873_v54  ;;  %v1832_v24 = vadd.f32 %v1831_v39, %v1612_v20  ;;  %v1875_v40 = vadd.f32 %v1874_v21, %v1620_v26 }
 0x918   :  { %1882 = vst [vmem:[#allocation2 + $0x28] sm:$0xff] %v1832_v24  ;;  %1884 = vst [vmem:[#allocation2 + $0x38] sm:$0xff] %v1875_v40  ;;  %v5006_v40 = vld [vmem:[%s7520_s2 + $0x2] sm:$0x3] }
 0x919   :  { %v1890_v41 = vld [vmem:[#allocation2] sm:$0x3]  ;;  %v1892_v20 = vld [vmem:[#allocation2 + $0x10] sm:$0x3] }
 0x91b   :  { %v1891_v14 = vld [vmem:[#allocation2 + $0x8] sm:$0x3]  ;;  %v1893_v30 = vld [vmem:[#allocation2 + $0x18] sm:$0x3] }
 0x92f   :  { %v2088_v42 = vpop.f32.mrf.mxu0  ;;  %v2129_v27 = vpop.f32.mrf.mxu1 }
 0x930   :  { %v2136_v13 = vadd.f32 %v2088_v42, %v1890_v41  ;;  %v2138_v26 = vadd.f32 %v2129_v27, %v1892_v20 }
 0x931   :  { %v2090_v63 = vpop.f32.mrf.mxu0  ;;  %v2131_v28 = vpop.f32.mrf.mxu1 }
 0x932   :  { %v5039_v29 = vmul.f32 -1.442695, %v2136_v13  ;;  %v2137_v18 = vadd.f32 %v2090_v63, %v1891_v14  ;;  %v5041_v43 = vmul.f32 -1.442695, %v2138_v26  ;;  %v2139_v34 = vadd.f32 %v2131_v28, %v1893_v30 }
 0x933   :  { %v2092_v19 = vpop.f32.mrf.mxu0  ;;  %v2133_v52 = vpop.f32.mrf.mxu1 }
 0x934   :  { %5604 = vpow2.f32 %v5039_v29  ;;  %v5040_v55 = vmul.f32 -1.442695, %v2137_v18 }
 0x935   :  { %v2093_v22 = vpop.f32.mrf.mxu0  ;;  %v2134_v23 = vpop.f32.mrf.mxu1 }
 0x936   :  { %5606 = vpow2.f32 %v5040_v55  ;;  %v2166_v23 = vld [vmem:[#allocation2] sm:$0xc] }
 0x937   :  { %5608 = vpow2.f32 %v5041_v43 }
 0x941   :  { %v5605_v31 = vpop.eup %5604 }
 0x942   :  { %v2149_v37 = vadd.f32 1.0, %v5605_v31  ;;  %v2167_v31 = vld [vmem:[#allocation2 + $0x8] sm:$0xc] }
 0x943   :  { %v5607_v54 = vpop.eup %5606 }
 0x944   :  { %5610 = vrcp.f32 %v2149_v37  ;;  %v2150_v39 = vadd.f32 1.0, %v5607_v54  ;;  %v5609_v21 = vpop.eup %5608 }
 0x945   :  { %5612 = vtanh.f32 %v2139_v34  ;;  %v2151_v27 = vadd.f32 1.0, %v5609_v21 }
 0x946   :  { %5614 = vrcp.f32 %v2150_v39 }
 0x947   :  { %5616 = vrcp.f32 %v2151_v27 }
 0x951   :  { %v5611_v24 = vpop.eup %5610 }
 0x952   :  { %v5613_v41 = vpop.eup %5612 }
 0x953   :  { %v5615_v42 = vpop.eup %5614  ;;  %v2160_v14 = vmul.f32 %v5613_v41, %v5611_v24 }
 0x954   :  { %v2159_v13 = vmul.f32 %v5615_v42, %v5006_v40  ;;  %v5617_v28 = vpop.eup %5616  ;;  %v2168_v42 = vld [vmem:[#allocation2 + $0x10] sm:$0xc] }
 0x956   :  { %v6833_v63 = vadd.f32 %v2160_v14, %v2159_v13 }
 0x958   :  { %5618 = vtanh.f32 %v6833_v63 }
 0x965   :  { %v5619_v29 = vpop.eup %5618 }
 0x966   :  { %v2163_v18 = vmul.f32 %v5619_v29, %v5617_v28  ;;  %v2169_v28 = vld [vmem:[#allocation2 + $0x18] sm:$0xc] }
 0x968   :  { %v2164_v19 = vpack.c.bf16 %v2163_v18, %v2163_v18 }
 0x96a   :  { %2165 = vst [vmem:[#allocation3] sm:$0x1] %v2164_v19  ;;  %2203 = vmatmul.mubr.bf16.vlgmr.msra.gmra.mxu0 %v2164_v19  ;;  %2244 = vmatmul.mubr.bf16.vlgmr.msra.gmra.mxu1 %v2164_v19 }
 0x96b   :  { %2305 = vmatpush1.bf16.msra.mxu0 %v6681_v44  ;;  %2346 = vmatpush1.bf16.msra.mxu1 %v6683_v45 }
 0x96c   :  { %2306 = vmatprep.subr.bf16.mxu0 %v6685_v46  ;;  %2347 = vmatprep.subr.bf16.mxu1 %v6687_v47 }
 0x96d   :  { %2336 = vmatprep.mubr.bf16.mxu0 %v6106_v2  ;;  %2377 = vmatprep.mubr.bf16.mxu1 %v6106_v2 }
 0x96f   :  { %2307 = vmatpush1.bf16.msra.mxu0 %v6691_v48  ;;  %2348 = vmatpush1.bf16.msra.mxu1 %v6693_v49 }
 0x970   :  { %2308 = vmatprep.subr.bf16.mxu0 %v6697_v56  ;;  %2349 = vmatprep.subr.bf16.mxu1 %v6699_v57 }
 0x973   :  { %2309 = vmatpush1.bf16.msra.mxu0 %v6705_v58  ;;  %2350 = vmatpush1.bf16.msra.mxu1 %v6707_v59 }
 0x974   :  { %2310 = vmatprep.subr.bf16.mxu0 %v6711_v60  ;;  %2351 = vmatprep.subr.bf16.mxu1 %v6713_v61 }
 0x977   :  { %2311 = vmatpush1.bf16.msra.mxu0 %v6717_v62  ;;  %2352 = vmatpush1.bf16.msra.mxu1 %v6719_v1 }
 0x978   :  { %2312 = vmatprep.subr.bf16.mxu0 %v6723_v3  ;;  %2353 = vmatprep.subr.bf16.mxu1 %v6725_v0 }
 0x97b   :  { %2313 = vmatpush1.bf16.msra.mxu0 %v6729_v4  ;;  %2354 = vmatpush1.bf16.msra.mxu1 %v6731_v5 }
 0x97c   :  { %2314 = vmatprep.subr.bf16.mxu0 %v6735_v6  ;;  %2355 = vmatprep.subr.bf16.mxu1 %v6737_v9 }
 0x97f   :  { %2315 = vmatpush1.bf16.msra.mxu0 %v6741_v10  ;;  %2356 = vmatpush1.bf16.msra.mxu1 %v6743_v11 }
 0x980   :  { %2316 = vmatprep.subr.bf16.mxu0 %v6747_v25  ;;  %2357 = vmatprep.subr.bf16.mxu1 %v6749_v12 }
 0x983   :  { %2317 = vmatpush1.bf16.msra.mxu0 %v6753_v50  ;;  %2358 = vmatpush1.bf16.msra.mxu1 %v6755_v32 }
 0x984   :  { %2318 = vmatprep.subr.bf16.mxu0 %v6759_v33  ;;  %2359 = vmatprep.subr.bf16.mxu1 %v6761_v35 }
 0x987   :  { %2319 = vmatpush1.bf16.msra.mxu0 %v6765_v36  ;;  %2360 = vmatpush1.bf16.msra.mxu1 %v6767_v38 }
 0x988   :  { %2438 = vmatprep.subr.bf16.mxu0 %v6674_v7  ;;  %2479 = vmatprep.subr.bf16.mxu1 %v6676_v8 }
 0xa2a   :  { %v2204_v52 = vpop.f32.mrf.mxu0  ;;  %v2245_v55 = vpop.f32.mrf.mxu1 }
 0xa2b   :  { %v2256_v22 = vrot.slane %v2204_v52, 6  ;;  %v2258_v41 = vrot.slane %v2245_v55, 6 }
 0xa2c   :  { %v2206_v20 = vpop.f32.mrf.mxu0  ;;  %v2247_v26 = vpop.f32.mrf.mxu1 }
 0xa2d   :  { %v2264_v43 = vadd.f32 %v2256_v22, %v2166_v23  ;;  %v2257_v30 = vrot.slane %v2206_v20, 6  ;;  %v2266_v27 = vadd.f32 %v2258_v41, %v2168_v42  ;;  %v2259_v13 = vrot.slane %v2247_v26, 6 }
 0xa2e   :  { %v2208_v34 = vpop.f32.mrf.mxu0  ;;  %v2249_v37 = vpop.f32.mrf.mxu1 }
 0xa2f   :  { %v5042_v54 = vmul.f32 -1.442695, %v2264_v43  ;;  %v2265_v39 = vadd.f32 %v2257_v30, %v2167_v31  ;;  %v5044_v14 = vmul.f32 -1.442695, %v2266_v27  ;;  %v2267_v18 = vadd.f32 %v2259_v13, %v2169_v28  ;;  %v2297_v27 = vld [vmem:[#allocation2] sm:$0x30] }
 0xa30   :  { %v2209_v21 = vpop.f32.mrf.mxu0  ;;  %v2250_v24 = vpop.f32.mrf.mxu1  ;;  %v2288_v30 = vrot.slane %v6833_v63, 6 }
 0xa31   :  { %5620 = vpow2.f32 %v5042_v54  ;;  %v5043_v40 = vmul.f32 -1.442695, %v2265_v39 }
 0xa33   :  { %5622 = vpow2.f32 %v5043_v40 }
 0xa34   :  { %5624 = vpow2.f32 %v5044_v14 }
 0xa3e   :  { %v5621_v29 = vpop.eup %5620 }
 0xa3f   :  { %v2277_v19 = vadd.f32 1.0, %v5621_v29 }
 0xa40   :  { %v5623_v52 = vpop.eup %5622 }
 0xa41   :  { %5626 = vrcp.f32 %v2277_v19  ;;  %v2278_v22 = vadd.f32 1.0, %v5623_v52  ;;  %v5625_v23 = vpop.eup %5624 }
 0xa42   :  { %5628 = vtanh.f32 %v2267_v18  ;;  %v2279_v31 = vadd.f32 1.0, %v5625_v23  ;;  %v2298_v18 = vld [vmem:[#allocation2 + $0x8] sm:$0x30] }
 0xa43   :  { %5630 = vrcp.f32 %v2278_v22 }
 0xa44   :  { %5632 = vrcp.f32 %v2279_v31  ;;  %v2299_v31 = vld [vmem:[#allocation2 + $0x10] sm:$0x30] }
 0xa4e   :  { %v5627_v20 = vpop.eup %5626 }
 0xa4f   :  { %v5629_v43 = vpop.eup %5628 }
 0xa50   :  { %v5631_v55 = vpop.eup %5630  ;;  %v2291_v26 = vmul.f32 %v5629_v43, %v5627_v20 }
 0xa51   :  { %v2290_v34 = vmul.f32 %v5631_v55, %v2288_v30  ;;  %v5633_v54 = vpop.eup %5632 }
 0xa53   :  { %v6871_v37 = vadd.f32 %v2291_v26, %v2290_v34 }
 0xa55   :  { %5634 = vtanh.f32 %v6871_v37 }
 0xa62   :  { %v5635_v39 = vpop.eup %5634 }
 0xa63   :  { %v2294_v21 = vmul.f32 %v5635_v39, %v5633_v54  ;;  %v2300_v39 = vld [vmem:[#allocation2 + $0x18] sm:$0x30] }
 0xa65   :  { %v2295_v24 = vpack.c.bf16 %v2294_v21, %v2294_v21 }
 0xa67   :  { %2296 = vst [vmem:[#allocation3] sm:$0x2] %v2295_v24  ;;  %v2302_v40 = vrot.slane %v2295_v24, 1 }
 0xa69   :  { %2337 = vmatmul.mubr.bf16.vlgmr.msra.gmra.mxu0 %v2302_v40  ;;  %2378 = vmatmul.mubr.bf16.vlgmr.msra.gmra.mxu1 %v2302_v40 }
 0xa6a   :  { %2439 = vmatpush1.bf16.msra.mxu0 %v6681_v44  ;;  %2480 = vmatpush1.bf16.msra.mxu1 %v6683_v45 }
 0xa6b   :  { %2440 = vmatprep.subr.bf16.mxu0 %v6685_v46  ;;  %2481 = vmatprep.subr.bf16.mxu1 %v6687_v47 }
 0xa6c   :  { %2470 = vmatprep.mubr.bf16.mxu0 %v6106_v2  ;;  %2511 = vmatprep.mubr.bf16.mxu1 %v6106_v2 }
 0xa6e   :  { %2441 = vmatpush1.bf16.msra.mxu0 %v6691_v48  ;;  %2482 = vmatpush1.bf16.msra.mxu1 %v6693_v49 }
 0xa6f   :  { %2442 = vmatprep.subr.bf16.mxu0 %v6697_v56  ;;  %2483 = vmatprep.subr.bf16.mxu1 %v6699_v57 }
 0xa72   :  { %2443 = vmatpush1.bf16.msra.mxu0 %v6705_v58  ;;  %2484 = vmatpush1.bf16.msra.mxu1 %v6707_v59 }
 0xa73   :  { %2444 = vmatprep.subr.bf16.mxu0 %v6711_v60  ;;  %2485 = vmatprep.subr.bf16.mxu1 %v6713_v61 }
 0xa76   :  { %2445 = vmatpush1.bf16.msra.mxu0 %v6717_v62  ;;  %2486 = vmatpush1.bf16.msra.mxu1 %v6719_v1 }
 0xa77   :  { %2446 = vmatprep.subr.bf16.mxu0 %v6723_v3  ;;  %2487 = vmatprep.subr.bf16.mxu1 %v6725_v0 }
 0xa7a   :  { %2447 = vmatpush1.bf16.msra.mxu0 %v6729_v4  ;;  %2488 = vmatpush1.bf16.msra.mxu1 %v6731_v5 }
 0xa7b   :  { %2448 = vmatprep.subr.bf16.mxu0 %v6735_v6  ;;  %2489 = vmatprep.subr.bf16.mxu1 %v6737_v9 }
 0xa7e   :  { %2449 = vmatpush1.bf16.msra.mxu0 %v6741_v10  ;;  %2490 = vmatpush1.bf16.msra.mxu1 %v6743_v11 }
 0xa7f   :  { %2450 = vmatprep.subr.bf16.mxu0 %v6747_v25  ;;  %2491 = vmatprep.subr.bf16.mxu1 %v6749_v12 }
 0xa82   :  { %2451 = vmatpush1.bf16.msra.mxu0 %v6753_v50  ;;  %2492 = vmatpush1.bf16.msra.mxu1 %v6755_v32 }
 0xa83   :  { %2452 = vmatprep.subr.bf16.mxu0 %v6759_v33  ;;  %2493 = vmatprep.subr.bf16.mxu1 %v6761_v35 }
 0xa86   :  { %2453 = vmatpush1.bf16.msra.mxu0 %v6765_v36  ;;  %2494 = vmatpush1.bf16.msra.mxu1 %v6767_v38 }
 0xa87   :  { %2572 = vmatprep.subr.bf16.mxu0 %v6674_v7  ;;  %2613 = vmatprep.subr.bf16.mxu1 %v6676_v8 }
 0xb29   :  { %v2338_v63 = vpop.f32.mrf.mxu0  ;;  %v2379_v41 = vpop.f32.mrf.mxu1 }
 0xb2a   :  { %v2390_v42 = vrot.slane %v2338_v63, 4  ;;  %v2392_v55 = vrot.slane %v2379_v41, 4 }
 0xb2b   :  { %v2340_v13 = vpop.f32.mrf.mxu0  ;;  %v2381_v14 = vpop.f32.mrf.mxu1 }
 0xb2c   :  { %v2398_v28 = vadd.f32 %v2390_v42, %v2297_v27  ;;  %v2391_v29 = vrot.slane %v2340_v13, 4  ;;  %v2400_v34 = vadd.f32 %v2392_v55, %v2299_v31  ;;  %v2393_v26 = vrot.slane %v2381_v14, 4 }
 0xb2d   :  { %v2342_v19 = vpop.f32.mrf.mxu0  ;;  %v2383_v52 = vpop.f32.mrf.mxu1 }
 0xb2e   :  { %v5045_v22 = vmul.f32 -1.442695, %v2398_v28  ;;  %v2399_v23 = vadd.f32 %v2391_v29, %v2298_v18  ;;  %v5047_v54 = vmul.f32 -1.442695, %v2400_v34  ;;  %v2401_v24 = vadd.f32 %v2393_v26, %v2300_v39  ;;  %v2431_v34 = vld [vmem:[#allocation2] sm:$0xc0] }
 0xb2f   :  { %v2343_v20 = vpop.f32.mrf.mxu0  ;;  %v2384_v43 = vpop.f32.mrf.mxu1  ;;  %v2422_v29 = vrot.slane %v6871_v37, 6 }
 0xb30   :  { %5636 = vpow2.f32 %v5045_v22  ;;  %v5046_v30 = vmul.f32 -1.442695, %v2399_v23 }
 0xb32   :  { %5638 = vpow2.f32 %v5046_v30 }
 0xb33   :  { %5640 = vpow2.f32 %v5047_v54 }
 0xb3d   :  { %v5637_v21 = vpop.eup %5636 }
 0xb3e   :  { %v2411_v40 = vadd.f32 1.0, %v5637_v21 }
 0xb3f   :  { %v5639_v63 = vpop.eup %5638 }
 0xb40   :  { %5642 = vrcp.f32 %v2411_v40  ;;  %v2412_v42 = vadd.f32 1.0, %v5639_v63  ;;  %v5641_v27 = vpop.eup %5640 }
 0xb41   :  { %5644 = vtanh.f32 %v2401_v24  ;;  %v2413_v18 = vadd.f32 1.0, %v5641_v27  ;;  %v2432_v24 = vld [vmem:[#allocation2 + $0x8] sm:$0xc0] }
 0xb42   :  { %5646 = vrcp.f32 %v2412_v42 }
 0xb43   :  { %5648 = vrcp.f32 %v2413_v18 }
 0xb4d   :  { %v5643_v13 = vpop.eup %5642 }
 0xb4e   :  { %v5645_v28 = vpop.eup %5644 }
 0xb4f   :  { %v5647_v41 = vpop.eup %5646  ;;  %v2425_v14 = vmul.f32 %v5645_v28, %v5643_v13 }
 0xb50   :  { %v2424_v19 = vmul.f32 %v5647_v41, %v2422_v29  ;;  %v5649_v22 = vpop.eup %5648 }
 0xb52   :  { %v6909_v52 = vadd.f32 %v2425_v14, %v2424_v19  ;;  %v2434_v14 = vld [vmem:[#allocation2 + $0x18] sm:$0xc0] }
 0xb54   :  { %5650 = vtanh.f32 %v6909_v52 }
 0xb61   :  { %v5651_v23 = vpop.eup %5650 }
 0xb62   :  { %v2428_v20 = vmul.f32 %v5651_v23, %v5649_v22 }
 0xb64   :  { %v2429_v43 = vpack.c.bf16 %v2428_v20, %v2428_v20 }
 0xb66   :  { %2430 = vst [vmem:[#allocation3] sm:$0x4] %v2429_v43  ;;  %v2436_v30 = vrot.slane %v2429_v43, 2 }
 0xb68   :  { %2471 = vmatmul.mubr.bf16.vlgmr.msra.gmra.mxu0 %v2436_v30  ;;  %2512 = vmatmul.mubr.bf16.vlgmr.msra.gmra.mxu1 %v2436_v30 }
 0xb69   :  { %2573 = vmatpush1.bf16.msra.mxu0 %v6681_v44  ;;  %2614 = vmatpush1.bf16.msra.mxu1 %v6683_v45 }
 0xb6a   :  { %2574 = vmatprep.subr.bf16.mxu0 %v6685_v46  ;;  %2615 = vmatprep.subr.bf16.mxu1 %v6687_v47 }
 0xb6b   :  { %2604 = vmatprep.mubr.bf16.mxu0 %v6106_v2  ;;  %2645 = vmatprep.mubr.bf16.mxu1 %v6106_v2 }
 0xb6d   :  { %2575 = vmatpush1.bf16.msra.mxu0 %v6691_v48  ;;  %2616 = vmatpush1.bf16.msra.mxu1 %v6693_v49 }
 0xb6e   :  { %2576 = vmatprep.subr.bf16.mxu0 %v6697_v56  ;;  %2617 = vmatprep.subr.bf16.mxu1 %v6699_v57 }
 0xb71   :  { %2577 = vmatpush1.bf16.msra.mxu0 %v6705_v58  ;;  %2618 = vmatpush1.bf16.msra.mxu1 %v6707_v59 }
 0xb72   :  { %2578 = vmatprep.subr.bf16.mxu0 %v6711_v60  ;;  %2619 = vmatprep.subr.bf16.mxu1 %v6713_v61 }
 0xb75   :  { %2579 = vmatpush1.bf16.msra.mxu0 %v6717_v62  ;;  %2620 = vmatpush1.bf16.msra.mxu1 %v6719_v1 }
 0xb76   :  { %2580 = vmatprep.subr.bf16.mxu0 %v6723_v3  ;;  %2621 = vmatprep.subr.bf16.mxu1 %v6725_v0 }
 0xb79   :  { %2581 = vmatpush1.bf16.msra.mxu0 %v6729_v4  ;;  %2622 = vmatpush1.bf16.msra.mxu1 %v6731_v5 }
 0xb7a   :  { %2582 = vmatprep.subr.bf16.mxu0 %v6735_v6  ;;  %2623 = vmatprep.subr.bf16.mxu1 %v6737_v9 }
 0xb7d   :  { %2583 = vmatpush1.bf16.msra.mxu0 %v6741_v10  ;;  %2624 = vmatpush1.bf16.msra.mxu1 %v6743_v11 }
 0xb7e   :  { %2584 = vmatprep.subr.bf16.mxu0 %v6747_v25  ;;  %2625 = vmatprep.subr.bf16.mxu1 %v6749_v12 }
 0xb81   :  { %2585 = vmatpush1.bf16.msra.mxu0 %v6753_v50  ;;  %2626 = vmatpush1.bf16.msra.mxu1 %v6755_v32 }
 0xb82   :  { %2586 = vmatprep.subr.bf16.mxu0 %v6759_v33  ;;  %2627 = vmatprep.subr.bf16.mxu1 %v6761_v35 }
 0xb85   :  { %2587 = vmatpush1.bf16.msra.mxu0 %v6765_v36  ;;  %2628 = vmatpush1.bf16.msra.mxu1 %v6767_v38 }
 0xb86   :  { %2691 = vmatprep.subr.bf16.mxu0 %v6674_v7  ;;  %2732 = vmatprep.subr.bf16.mxu1 %v6676_v8  ;;  %v2433_v8 = vld [vmem:[#allocation2 + $0x10] sm:$0xc0] }
 0xc28   :  { %v2472_v37 = vpop.f32.mrf.mxu0  ;;  %v2513_v55 = vpop.f32.mrf.mxu1 }
 0xc29   :  { %v2524_v31 = vrot.slane %v2472_v37, 2  ;;  %v2526_v7 = vrot.slane %v2513_v55, 2 }
 0xc2a   :  { %v2474_v26 = vpop.f32.mrf.mxu0  ;;  %v2515_v54 = vpop.f32.mrf.mxu1 }
 0xc2b   :  { %v2532_v39 = vadd.f32 %v2524_v31, %v2431_v34  ;;  %v2525_v21 = vrot.slane %v2474_v26, 2  ;;  %v2534_v41 = vadd.f32 %v2526_v7, %v2433_v8  ;;  %v2527_v18 = vrot.slane %v2515_v54, 2 }
 0xc2c   :  { %v2476_v40 = vpop.f32.mrf.mxu0  ;;  %v2517_v63 = vpop.f32.mrf.mxu1  ;;  %v2556_v26 = vrot.slane %v6909_v52, 6 }
 0xc2d   :  { %v5048_v42 = vmul.f32 -1.442695, %v2532_v39  ;;  %v2533_v27 = vadd.f32 %v2525_v21, %v2432_v24  ;;  %v5050_v19 = vmul.f32 -1.442695, %v2534_v41  ;;  %v2535_v23 = vadd.f32 %v2527_v18, %v2434_v14  ;;  %v2568_v41 = vld [vmem:[#allocation2 + $0x38] sm:$0x3] }
 0xc2e   :  { %v2477_v13 = vpop.f32.mrf.mxu0  ;;  %v2518_v28 = vpop.f32.mrf.mxu1 }
 0xc2f   :  { %5652 = vpow2.f32 %v5048_v42  ;;  %v5049_v29 = vmul.f32 -1.442695, %v2533_v27 }
 0xc31   :  { %5654 = vpow2.f32 %v5049_v29  ;;  %v2567_v29 = vld [vmem:[#allocation2 + $0x30] sm:$0x3] }
 0xc32   :  { %5656 = vpow2.f32 %v5050_v19 }
 0xc3c   :  { %v5653_v22 = vpop.eup %5652 }
 0xc3d   :  { %v2545_v20 = vadd.f32 1.0, %v5653_v22 }
 0xc3e   :  { %v5655_v43 = vpop.eup %5654 }
 0xc3f   :  { %5658 = vrcp.f32 %v2545_v20  ;;  %v2546_v30 = vadd.f32 1.0, %v5655_v43  ;;  %v5657_v37 = vpop.eup %5656 }
 0xc40   :  { %5660 = vtanh.f32 %v2535_v23  ;;  %v2547_v39 = vadd.f32 1.0, %v5657_v37 }
 0xc41   :  { %5662 = vrcp.f32 %v2546_v30 }
 0xc42   :  { %5664 = vrcp.f32 %v2547_v39 }
 0xc4c   :  { %v5659_v31 = vpop.eup %5658 }
 0xc4d   :  { %v5661_v34 = vpop.eup %5660 }
 0xc4e   :  { %v5663_v55 = vpop.eup %5662  ;;  %v2559_v54 = vmul.f32 %v5661_v34, %v5659_v31 }
 0xc4f   :  { %v2558_v21 = vmul.f32 %v5663_v55, %v2556_v26  ;;  %v5665_v40 = vpop.eup %5664 }
 0xc51   :  { %v6947_v24 = vadd.f32 %v2559_v54, %v2558_v21 }
 0xc53   :  { %5666 = vtanh.f32 %v6947_v24  ;;  %v2678_v37 = vrot.slane %v6947_v24, 6  ;;  %v6995_v24 = vld [vmem:[#allocation12 + $0x1e8] ss:$16 sps:$4 sm:$0xff]  }
 0xc60   :  { %v5667_v63 = vpop.eup %5666 }
 0xc61   :  { %v2562_v42 = vmul.f32 %v5667_v63, %v5665_v40 }
 0xc63   :  { %v2563_v27 = vpack.c.bf16 %v2562_v42, %v2562_v42  ;;  %v6992_v42 = vld [vmem:[#allocation12 + $0x1e0] ss:$16 sps:$4 sm:$0xff]  }
 0xc65   :  { %2564 = vst [vmem:[#allocation3] sm:$0x8] %v2563_v27  ;;  %v2570_v13 = vrot.slane %v2563_v27, 3  ;;  %v6998_v27 = vld [vmem:[#allocation12 + $0x1c4] ss:$16 sps:$4 sm:$0xff]  }
 0xc67   :  { %2605 = vmatmul.mubr.bf16.vlgmr.msra.gmra.mxu0 %v2570_v13  ;;  %2646 = vmatmul.mubr.bf16.vlgmr.msra.gmra.mxu1 %v2570_v13  ;;  %v7001_v13 = vld [vmem:[#allocation12 + $0x1cc] ss:$16 sps:$4 sm:$0xff]  }
 0xc68   :  { %2692 = vmatpush1.bf16.msra.mxu0 %v6681_v44  ;;  %2733 = vmatpush1.bf16.msra.mxu1 %v6683_v45  ;;  %v6982_v44 = vld [vmem:[#allocation12 + $0x1e4] ss:$16 sps:$4 sm:$0xff]   ;;  %v6985_v45 = vld [vmem:[#allocation12 + $0x1ec] ss:$16 sps:$4 sm:$0xff]  }
 0xc69   :  { %2693 = vmatprep.subr.bf16.mxu0 %v6685_v46  ;;  %2734 = vmatprep.subr.bf16.mxu1 %v6687_v47  ;;  %v2565_v46 = vld [vmem:[#allocation2 + $0x20] sm:$0x3] }
 0xc6a   :  { %2723 = vmatprep.mubr.bf16.mxu0 %v6106_v2  ;;  %2764 = vmatprep.mubr.bf16.mxu1 %v6106_v2 }
 0xc6c   :  { %2694 = vmatpush1.bf16.msra.mxu0 %v6691_v48  ;;  %2735 = vmatpush1.bf16.msra.mxu1 %v6693_v49 }
 0xc6d   :  { %2695 = vmatprep.subr.bf16.mxu0 %v6697_v56  ;;  %2736 = vmatprep.subr.bf16.mxu1 %v6699_v57  ;;  %v2566_v56 = vld [vmem:[#allocation2 + $0x28] sm:$0x3] }
 0xc70   :  { %2696 = vmatpush1.bf16.msra.mxu0 %v6705_v58  ;;  %2737 = vmatpush1.bf16.msra.mxu1 %v6707_v59 }
 0xc71   :  { %2697 = vmatprep.subr.bf16.mxu0 %v6711_v60  ;;  %2738 = vmatprep.subr.bf16.mxu1 %v6713_v61 }
 0xc74   :  { %2698 = vmatpush1.bf16.msra.mxu0 %v6717_v62  ;;  %2739 = vmatpush1.bf16.msra.mxu1 %v6719_v1 }
 0xc75   :  { %2699 = vmatprep.subr.bf16.mxu0 %v6723_v3  ;;  %2740 = vmatprep.subr.bf16.mxu1 %v6725_v0 }
 0xc78   :  { %2700 = vmatpush1.bf16.msra.mxu0 %v6729_v4  ;;  %2741 = vmatpush1.bf16.msra.mxu1 %v6731_v5 }
 0xc79   :  { %2701 = vmatprep.subr.bf16.mxu0 %v6735_v6  ;;  %2742 = vmatprep.subr.bf16.mxu1 %v6737_v9 }
 0xc7c   :  { %2702 = vmatpush1.bf16.msra.mxu0 %v6741_v10  ;;  %2743 = vmatpush1.bf16.msra.mxu1 %v6743_v11 }
 0xc7d   :  { %2703 = vmatprep.subr.bf16.mxu0 %v6747_v25  ;;  %2744 = vmatprep.subr.bf16.mxu1 %v6749_v12 }
 0xc80   :  { %2704 = vmatpush1.bf16.msra.mxu0 %v6753_v50  ;;  %2745 = vmatpush1.bf16.msra.mxu1 %v6755_v32 }
 0xc81   :  { %2705 = vmatprep.subr.bf16.mxu0 %v6759_v33  ;;  %2746 = vmatprep.subr.bf16.mxu1 %v6761_v35 }
 0xc84   :  { %2706 = vmatpush1.bf16.msra.mxu0 %v6765_v36  ;;  %2747 = vmatpush1.bf16.msra.mxu1 %v6767_v38 }
 0xc85   :  { %2825 = vmatprep.subr.bf16.mxu0 %v6982_v44  ;;  %2866 = vmatprep.subr.bf16.mxu1 %v6985_v45 }
 0xd27   :  { %v2606_v47 = vpop.f32.mrf.mxu0  ;;  %v2647_v48 = vpop.f32.mrf.mxu1 }
 0xd28   :  { %v2654_v49 = vadd.f32 %v2606_v47, %v2565_v46  ;;  %v2656_v7 = vadd.f32 %v2647_v48, %v2567_v29  ;;  %v7006_v46 = vld [vmem:[#allocation12 + $0x1c0] ss:$16 sps:$4 sm:$0xff]   ;;  %v7009_v47 = vld [vmem:[#allocation12 + $0x1c8] ss:$16 sps:$4 sm:$0xff]   ;;  %v7012_v48 = vld [vmem:[#allocation12 + $0x1a4] ss:$16 sps:$4 sm:$0xff]  }
 0xd29   :  { %v2608_v57 = vpop.f32.mrf.mxu0  ;;  %v2649_v58 = vpop.f32.mrf.mxu1 }
 0xd2a   :  { %v5051_v59 = vmul.f32 -1.442695, %v2654_v49  ;;  %v2655_v60 = vadd.f32 %v2608_v57, %v2566_v56  ;;  %v5053_v8 = vmul.f32 -1.442695, %v2656_v7  ;;  %v2657_v19 = vadd.f32 %v2649_v58, %v2568_v41  ;;  %v7015_v49 = vld [vmem:[#allocation12 + $0x1ac] ss:$16 sps:$4 sm:$0xff]  }
 0xd2b   :  { %v2610_v61 = vpop.f32.mrf.mxu0  ;;  %v2651_v62 = vpop.f32.mrf.mxu1  ;;  %v7018_v56 = vld [vmem:[#allocation12 + $0x1a0] ss:$16 sps:$4 sm:$0xff]   ;;  %v7021_v57 = vld [vmem:[#allocation12 + $0x1a8] ss:$16 sps:$4 sm:$0xff]   ;;  %v7024_v58 = vld [vmem:[#allocation12 + $0x184] ss:$16 sps:$4 sm:$0xff]  }
 0xd2c   :  { %5668 = vpow2.f32 %v5051_v59  ;;  %v5052_v1 = vmul.f32 -1.442695, %v2655_v60  ;;  %v7027_v59 = vld [vmem:[#allocation12 + $0x18c] ss:$16 sps:$4 sm:$0xff]   ;;  %v7030_v60 = vld [vmem:[#allocation12 + $0x180] ss:$16 sps:$4 sm:$0xff]  }
 0xd2d   :  { %v2611_v52 = vpop.f32.mrf.mxu0  ;;  %v2652_v28 = vpop.f32.mrf.mxu1  ;;  %v7033_v61 = vld [vmem:[#allocation12 + $0x188] ss:$16 sps:$4 sm:$0xff]  }
 0xd2e   :  { %5670 = vpow2.f32 %v5052_v1  ;;  %v2690_v28 = vld [vmem:[#allocation2 + $0x38] sm:$0xc] }
 0xd2f   :  { %5672 = vpow2.f32 %v5053_v8 }
 0xd39   :  { %v5669_v18 = vpop.eup %5668 }
 0xd3a   :  { %v2667_v14 = vadd.f32 1.0, %v5669_v18 }
 0xd3b   :  { %v5671_v22 = vpop.eup %5670 }
 0xd3c   :  { %5674 = vrcp.f32 %v2667_v14  ;;  %v2668_v23 = vadd.f32 1.0, %v5671_v22  ;;  %v5673_v20 = vpop.eup %5672 }
 0xd3d   :  { %5676 = vtanh.f32 %v2657_v19  ;;  %v2669_v34 = vadd.f32 1.0, %v5673_v20 }
 0xd3e   :  { %5678 = vrcp.f32 %v2668_v23 }
 0xd3f   :  { %5680 = vrcp.f32 %v2669_v34 }
 0xd49   :  { %v5675_v43 = vpop.eup %5674 }
 0xd4a   :  { %v5677_v30 = vpop.eup %5676 }
 0xd4b   :  { %v5679_v31 = vpop.eup %5678  ;;  %v2681_v55 = vmul.f32 %v5677_v30, %v5675_v43 }
 0xd4c   :  { %v2680_v26 = vmul.f32 %v5679_v31, %v2678_v37  ;;  %v5681_v21 = vpop.eup %5680 }
 0xd4e   :  { %v6989_v39 = vadd.f32 %v2681_v55, %v2680_v26 }
 0xd50   :  { %5682 = vtanh.f32 %v6989_v39  ;;  %v2809_v23 = vrot.slane %v6989_v39, 6  ;;  %v5908_v39 = vld [vmem:[#allocation12 + $0x164] ss:$16 sps:$4 sm:$0xff]  }
 0xd5d   :  { %v5683_v54 = vpop.eup %5682 }
 0xd5e   :  { %v2684_v40 = vmul.f32 %v5683_v54, %v5681_v21 }
 0xd60   :  { %v2685_v63 = vpack.c.bf16 %v2684_v40, %v2684_v40  ;;  %v5909_v40 = vld [vmem:[#allocation12 + $0x16c] ss:$16 sps:$4 sm:$0xff]  }
 0xd62   :  { %2686 = vst [vmem:[#allocation3 + $0x4] sm:$0x1] %v2685_v63  ;;  %2724 = vmatmul.mubr.bf16.vlgmr.msra.gmra.mxu0 %v2685_v63  ;;  %2765 = vmatmul.mubr.bf16.vlgmr.msra.gmra.mxu1 %v2685_v63  ;;  %v5910_v63 = vld [vmem:[#allocation12 + $0x160] ss:$16 sps:$4 sm:$0xff]  }
 0xd63   :  { %2826 = vmatpush1.bf16.msra.mxu0 %v6992_v42  ;;  %2867 = vmatpush1.bf16.msra.mxu1 %v6995_v24 }
 0xd64   :  { %2827 = vmatprep.subr.bf16.mxu0 %v6998_v27  ;;  %2868 = vmatprep.subr.bf16.mxu1 %v7001_v13 }
 0xd65   :  { %2857 = vmatprep.mubr.bf16.mxu0 %v6106_v2  ;;  %2898 = vmatprep.mubr.bf16.mxu1 %v6106_v2 }
 0xd67   :  { %2828 = vmatpush1.bf16.msra.mxu0 %v7006_v46  ;;  %2869 = vmatpush1.bf16.msra.mxu1 %v7009_v47 }
 0xd68   :  { %2829 = vmatprep.subr.bf16.mxu0 %v7012_v48  ;;  %2870 = vmatprep.subr.bf16.mxu1 %v7015_v49 }
 0xd6b   :  { %2830 = vmatpush1.bf16.msra.mxu0 %v7018_v56  ;;  %2871 = vmatpush1.bf16.msra.mxu1 %v7021_v57 }
 0xd6c   :  { %2831 = vmatprep.subr.bf16.mxu0 %v7024_v58  ;;  %2872 = vmatprep.subr.bf16.mxu1 %v7027_v59 }
 0xd6f   :  { %2832 = vmatpush1.bf16.msra.mxu0 %v7030_v60  ;;  %2873 = vmatpush1.bf16.msra.mxu1 %v7033_v61 }
 0xd70   :  { %2833 = vmatprep.subr.bf16.mxu0 %v6723_v3  ;;  %2874 = vmatprep.subr.bf16.mxu1 %v6725_v0 }
 0xd73   :  { %2834 = vmatpush1.bf16.msra.mxu0 %v6729_v4  ;;  %2875 = vmatpush1.bf16.msra.mxu1 %v6731_v5  ;;  %v2687_v5 = vld [vmem:[#allocation2 + $0x20] sm:$0xc] }
 0xd74   :  { %2835 = vmatprep.subr.bf16.mxu0 %v6735_v6  ;;  %2876 = vmatprep.subr.bf16.mxu1 %v6737_v9 }
 0xd77   :  { %2836 = vmatpush1.bf16.msra.mxu0 %v6741_v10  ;;  %2877 = vmatpush1.bf16.msra.mxu1 %v6743_v11 }
 0xd78   :  { %2837 = vmatprep.subr.bf16.mxu0 %v6747_v25  ;;  %2878 = vmatprep.subr.bf16.mxu1 %v6749_v12  ;;  %v2688_v25 = vld [vmem:[#allocation2 + $0x28] sm:$0xc] }
 0xd7b   :  { %2838 = vmatpush1.bf16.msra.mxu0 %v6753_v50  ;;  %2879 = vmatpush1.bf16.msra.mxu1 %v6755_v32 }
 0xd7c   :  { %2839 = vmatprep.subr.bf16.mxu0 %v6759_v33  ;;  %2880 = vmatprep.subr.bf16.mxu1 %v6761_v35 }
 0xd7f   :  { %2840 = vmatpush1.bf16.msra.mxu0 %v6765_v36  ;;  %2881 = vmatpush1.bf16.msra.mxu1 %v6767_v38 }
 0xd80   :  { %2959 = vmatprep.subr.bf16.mxu0 %v6982_v44  ;;  %3000 = vmatprep.subr.bf16.mxu1 %v6985_v45  ;;  %v2689_v45 = vld [vmem:[#allocation2 + $0x30] sm:$0xc] }
 0xe22   :  { %v2725_v3 = vpop.f32.mrf.mxu0  ;;  %v2766_v0 = vpop.f32.mrf.mxu1 }
 0xe23   :  { %v2777_v4 = vrot.slane %v2725_v3, 6  ;;  %v2779_v44 = vrot.slane %v2766_v0, 6 }
 0xe24   :  { %v2727_v6 = vpop.f32.mrf.mxu0  ;;  %v2768_v9 = vpop.f32.mrf.mxu1 }
 0xe25   :  { %v2785_v10 = vadd.f32 %v2777_v4, %v2687_v5  ;;  %v2778_v11 = vrot.slane %v2727_v6, 6  ;;  %v2787_v62 = vadd.f32 %v2779_v44, %v2689_v45  ;;  %v2780_v1 = vrot.slane %v2768_v9, 6  ;;  %v2818_v4 = vld [vmem:[#allocation2 + $0x20] sm:$0x30]  ;;  %v2820_v44 = vld [vmem:[#allocation2 + $0x30] sm:$0x30] }
 0xe26   :  { %v2729_v12 = vpop.f32.mrf.mxu0  ;;  %v2770_v50 = vpop.f32.mrf.mxu1 }
 0xe27   :  { %v5054_v32 = vmul.f32 -1.442695, %v2785_v10  ;;  %v2786_v33 = vadd.f32 %v2778_v11, %v2688_v25  ;;  %v5056_v52 = vmul.f32 -1.442695, %v2787_v62  ;;  %v2788_v7 = vadd.f32 %v2780_v1, %v2690_v28  ;;  %v2819_v11 = vld [vmem:[#allocation2 + $0x28] sm:$0x30] }
 0xe28   :  { %v2730_v35 = vpop.f32.mrf.mxu0  ;;  %v2771_v36 = vpop.f32.mrf.mxu1 }
 0xe29   :  { %5684 = vpow2.f32 %v5054_v32  ;;  %v5055_v38 = vmul.f32 -1.442695, %v2786_v33 }
 0xe2b   :  { %5686 = vpow2.f32 %v5055_v38 }
 0xe2c   :  { %5688 = vpow2.f32 %v5056_v52  ;;  %v2821_v52 = vld [vmem:[#allocation2 + $0x38] sm:$0x30] }
 0xe36   :  { %v5685_v29 = vpop.eup %5684 }
 0xe37   :  { %v2798_v8 = vadd.f32 1.0, %v5685_v29 }
 0xe38   :  { %v5687_v41 = vpop.eup %5686 }
 0xe39   :  { %5690 = vrcp.f32 %v2798_v8  ;;  %v2799_v18 = vadd.f32 1.0, %v5687_v41  ;;  %v5689_v19 = vpop.eup %5688 }
 0xe3a   :  { %5692 = vtanh.f32 %v2788_v7  ;;  %v2800_v43 = vadd.f32 1.0, %v5689_v19 }
 0xe3b   :  { %5694 = vrcp.f32 %v2799_v18 }
 0xe3c   :  { %5696 = vrcp.f32 %v2800_v43 }
 0xe46   :  { %v5691_v14 = vpop.eup %5690 }
 0xe47   :  { %v5693_v22 = vpop.eup %5692 }
 0xe48   :  { %v5695_v20 = vpop.eup %5694  ;;  %v2812_v37 = vmul.f32 %v5693_v22, %v5691_v14 }
 0xe49   :  { %v2811_v30 = vmul.f32 %v5695_v20, %v2809_v23  ;;  %v5697_v34 = vpop.eup %5696 }
 0xe4b   :  { %v7055_v31 = vadd.f32 %v2812_v37, %v2811_v30 }
 0xe4d   :  { %5698 = vtanh.f32 %v7055_v31  ;;  %v2943_v22 = vrot.slane %v7055_v31, 6  ;;  %v5373_v31 = vld [vmem:[#allocation10 + $0x1e4] ss:$16 sps:$4 sm:$0xff]  }
 0xe5a   :  { %v5699_v26 = vpop.eup %5698 }
 0xe5b   :  { %v2815_v55 = vmul.f32 %v5699_v26, %v5697_v34 }
 0xe5d   :  { %v2816_v21 = vpack.c.bf16 %v2815_v55, %v2815_v55 }
 0xe5f   :  { %2817 = vst [vmem:[#allocation3 + $0x4] sm:$0x2] %v2816_v21  ;;  %v2823_v54 = vrot.slane %v2816_v21, 1 }
 0xe61   :  { %2858 = vmatmul.mubr.bf16.vlgmr.msra.gmra.mxu0 %v2823_v54  ;;  %2899 = vmatmul.mubr.bf16.vlgmr.msra.gmra.mxu1 %v2823_v54 }
 0xe62   :  { %2960 = vmatpush1.bf16.msra.mxu0 %v6992_v42  ;;  %3001 = vmatpush1.bf16.msra.mxu1 %v6995_v24  ;;  %v5911_v42 = vld [vmem:[#allocation12 + $0x168] ss:$16 sps:$4 sm:$0xff]   ;;  %v5912_v24 = vld [vmem:[#allocation12 + $0x144] ss:$16 sps:$4 sm:$0xff]  }
 0xe63   :  { %2961 = vmatprep.subr.bf16.mxu0 %v6998_v27  ;;  %3002 = vmatprep.subr.bf16.mxu1 %v7001_v13  ;;  %v5913_v27 = vld [vmem:[#allocation12 + $0x14c] ss:$16 sps:$4 sm:$0xff]   ;;  %v5914_v13 = vld [vmem:[#allocation12 + $0x140] ss:$16 sps:$4 sm:$0xff]  }
 0xe64   :  { %2991 = vmatprep.mubr.bf16.mxu0 %v6106_v2  ;;  %3032 = vmatprep.mubr.bf16.mxu1 %v6106_v2 }
 0xe66   :  { %2962 = vmatpush1.bf16.msra.mxu0 %v7006_v46  ;;  %3003 = vmatpush1.bf16.msra.mxu1 %v7009_v47  ;;  %v5915_v46 = vld [vmem:[#allocation12 + $0x148] ss:$16 sps:$4 sm:$0xff]   ;;  %v5916_v47 = vld [vmem:[#allocation12 + $0x124] ss:$16 sps:$4 sm:$0xff]  }
 0xe67   :  { %2963 = vmatprep.subr.bf16.mxu0 %v7012_v48  ;;  %3004 = vmatprep.subr.bf16.mxu1 %v7015_v49  ;;  %v5917_v48 = vld [vmem:[#allocation12 + $0x12c] ss:$16 sps:$4 sm:$0xff]   ;;  %v5918_v49 = vld [vmem:[#allocation12 + $0x120] ss:$16 sps:$4 sm:$0xff]  }
 0xe6a   :  { %2964 = vmatpush1.bf16.msra.mxu0 %v7018_v56  ;;  %3005 = vmatpush1.bf16.msra.mxu1 %v7021_v57  ;;  %v5919_v56 = vld [vmem:[#allocation12 + $0x128] ss:$16 sps:$4 sm:$0xff]   ;;  %v5920_v57 = vld [vmem:[#allocation12 + $0x104] ss:$16 sps:$4 sm:$0xff]  }
 0xe6b   :  { %2965 = vmatprep.subr.bf16.mxu0 %v7024_v58  ;;  %3006 = vmatprep.subr.bf16.mxu1 %v7027_v59  ;;  %v5921_v58 = vld [vmem:[#allocation12 + $0x10c] ss:$16 sps:$4 sm:$0xff]   ;;  %v5922_v59 = vld [vmem:[#allocation12 + $0x100] ss:$16 sps:$4 sm:$0xff]  }
 0xe6e   :  { %2966 = vmatpush1.bf16.msra.mxu0 %v7030_v60  ;;  %3007 = vmatpush1.bf16.msra.mxu1 %v7033_v61  ;;  %v5923_v60 = vld [vmem:[#allocation12 + $0x108] ss:$16 sps:$4 sm:$0xff]  }
 0xe6f   :  { %2967 = vmatprep.subr.bf16.mxu0 %v5908_v39  ;;  %3008 = vmatprep.subr.bf16.mxu1 %v5909_v40  ;;  %v5376_v39 = vld [vmem:[#allocation10 + $0x1ec] ss:$16 sps:$4 sm:$0xff]   ;;  %v5371_v40 = vld [vmem:[#allocation10 + $0x1e0] ss:$16 sps:$4 sm:$0xff]  }
 0xe72   :  { %2968 = vmatpush1.bf16.msra.mxu0 %v5910_v63  ;;  %3009 = vmatpush1.bf16.msra.mxu1 %v5911_v42  ;;  %v5374_v63 = vld [vmem:[#allocation10 + $0x1e8] ss:$16 sps:$4 sm:$0xff]   ;;  %v5379_v42 = vld [vmem:[#allocation10 + $0x1c4] ss:$16 sps:$4 sm:$0xff]  }
 0xe73   :  { %2969 = vmatprep.subr.bf16.mxu0 %v5912_v24  ;;  %3010 = vmatprep.subr.bf16.mxu1 %v5913_v27  ;;  %v5382_v24 = vld [vmem:[#allocation10 + $0x1cc] ss:$16 sps:$4 sm:$0xff]   ;;  %v5377_v27 = vld [vmem:[#allocation10 + $0x1c0] ss:$16 sps:$4 sm:$0xff]  }
 0xe76   :  { %2970 = vmatpush1.bf16.msra.mxu0 %v5914_v13  ;;  %3011 = vmatpush1.bf16.msra.mxu1 %v5915_v46  ;;  %v5380_v13 = vld [vmem:[#allocation10 + $0x1c8] ss:$16 sps:$4 sm:$0xff]   ;;  %v5385_v46 = vld [vmem:[#allocation10 + $0x1a4] ss:$16 sps:$4 sm:$0xff]  }
 0xe77   :  { %2971 = vmatprep.subr.bf16.mxu0 %v5916_v47  ;;  %3012 = vmatprep.subr.bf16.mxu1 %v5917_v48  ;;  %v5388_v47 = vld [vmem:[#allocation10 + $0x1ac] ss:$16 sps:$4 sm:$0xff]   ;;  %v5383_v48 = vld [vmem:[#allocation10 + $0x1a0] ss:$16 sps:$4 sm:$0xff]  }
 0xe7a   :  { %2972 = vmatpush1.bf16.msra.mxu0 %v5918_v49  ;;  %3013 = vmatpush1.bf16.msra.mxu1 %v5919_v56  ;;  %v5386_v49 = vld [vmem:[#allocation10 + $0x1a8] ss:$16 sps:$4 sm:$0xff]   ;;  %v5391_v56 = vld [vmem:[#allocation10 + $0x184] ss:$16 sps:$4 sm:$0xff]  }
 0xe7b   :  { %2973 = vmatprep.subr.bf16.mxu0 %v5920_v57  ;;  %3014 = vmatprep.subr.bf16.mxu1 %v5921_v58  ;;  %v5394_v57 = vld [vmem:[#allocation10 + $0x18c] ss:$16 sps:$4 sm:$0xff]   ;;  %v5389_v58 = vld [vmem:[#allocation10 + $0x180] ss:$16 sps:$4 sm:$0xff]  }
 0xe7e   :  { %2974 = vmatpush1.bf16.msra.mxu0 %v5922_v59  ;;  %3015 = vmatpush1.bf16.msra.mxu1 %v5923_v60  ;;  %v5392_v59 = vld [vmem:[#allocation10 + $0x188] ss:$16 sps:$4 sm:$0xff]   ;;  %v5397_v60 = vld [vmem:[#allocation10 + $0x164] ss:$16 sps:$4 sm:$0xff]  }
 0xe7f   :  { %3347 = vmatprep.subr.bf16.mxu0 %v5373_v31  ;;  %3390 = vmatprep.subr.bf16.mxu1 %v5376_v39 }
 0xf21   :  { %v2859_v61 = vpop.f32.mrf.mxu0  ;;  %v2900_v3 = vpop.f32.mrf.mxu1 }
 0xf22   :  { %v2911_v0 = vrot.slane %v2859_v61, 4  ;;  %v2913_v38 = vrot.slane %v2900_v3, 4  ;;  %v5400_v61 = vld [vmem:[#allocation10 + $0x16c] ss:$16 sps:$4 sm:$0xff]   ;;  %v5395_v3 = vld [vmem:[#allocation10 + $0x160] ss:$16 sps:$4 sm:$0xff]  }
 0xf23   :  { %v2861_v5 = vpop.f32.mrf.mxu0  ;;  %v2902_v6 = vpop.f32.mrf.mxu1 }
 0xf24   :  { %v2919_v9 = vadd.f32 %v2911_v0, %v2818_v4  ;;  %v2912_v10 = vrot.slane %v2861_v5, 4  ;;  %v2921_v45 = vadd.f32 %v2913_v38, %v2820_v44  ;;  %v2914_v62 = vrot.slane %v2902_v6, 4  ;;  %v5398_v0 = vld [vmem:[#allocation10 + $0x168] ss:$16 sps:$4 sm:$0xff]   ;;  %v5403_v4 = vld [vmem:[#allocation10 + $0x144] ss:$16 sps:$4 sm:$0xff]  }
 0xf25   :  { %v2863_v25 = vpop.f32.mrf.mxu0  ;;  %v2904_v12 = vpop.f32.mrf.mxu1  ;;  %v5406_v5 = vld [vmem:[#allocation10 + $0x14c] ss:$16 sps:$4 sm:$0xff]   ;;  %v5401_v6 = vld [vmem:[#allocation10 + $0x140] ss:$16 sps:$4 sm:$0xff]  }
 0xf26   :  { %v5057_v50 = vmul.f32 -1.442695, %v2919_v9  ;;  %v2920_v32 = vadd.f32 %v2912_v10, %v2819_v11  ;;  %v5059_v1 = vmul.f32 -1.442695, %v2921_v45  ;;  %v2922_v29 = vadd.f32 %v2914_v62, %v2821_v52  ;;  %v5404_v9 = vld [vmem:[#allocation10 + $0x148] ss:$16 sps:$4 sm:$0xff]  }
 0xf27   :  { %v2864_v33 = vpop.f32.mrf.mxu0  ;;  %v2905_v35 = vpop.f32.mrf.mxu1  ;;  %v5409_v10 = vld [vmem:[#allocation10 + $0x124] ss:$16 sps:$4 sm:$0xff]   ;;  %v5407_v11 = vld [vmem:[#allocation10 + $0x120] ss:$16 sps:$4 sm:$0xff]   ;;  %v5410_v25 = vld [vmem:[#allocation10 + $0x128] ss:$16 sps:$4 sm:$0xff]  }
 0xf28   :  { %5700 = vpow2.f32 %v5057_v50  ;;  %v5058_v36 = vmul.f32 -1.442695, %v2920_v32  ;;  %v5412_v12 = vld [vmem:[#allocation10 + $0x12c] ss:$16 sps:$4 sm:$0xff]   ;;  %v5415_v50 = vld [vmem:[#allocation10 + $0x104] ss:$16 sps:$4 sm:$0xff]  }
 0xf29   :  { %v5418_v32 = vld [vmem:[#allocation10 + $0x10c] ss:$16 sps:$4 sm:$0xff]   ;;  %v5413_v33 = vld [vmem:[#allocation10 + $0x100] ss:$16 sps:$4 sm:$0xff]   ;;  %v5416_v35 = vld [vmem:[#allocation10 + $0x108] ss:$16 sps:$4 sm:$0xff]  }
 0xf2a   :  { %5702 = vpow2.f32 %v5058_v36  ;;  %v7080_v36 = vld [vmem:[#allocation12 + $0x2e4] ss:$16 sps:$4 sm:$0xff]   ;;  %v7082_v38 = vld [vmem:[#allocation12 + $0x2ec] ss:$16 sps:$4 sm:$0xff]  }
 0xf2b   :  { %5704 = vpow2.f32 %v5059_v1  ;;  %v2952_v1 = vld [vmem:[#allocation2 + $0x20] sm:$0xc0] }
 0xf35   :  { %v5701_v28 = vpop.eup %5700 }
 0xf36   :  { %v2932_v7 = vadd.f32 1.0, %v5701_v28 }
 0xf37   :  { %v5703_v8 = vpop.eup %5702 }
 0xf38   :  { %5706 = vrcp.f32 %v2932_v7  ;;  %v2933_v41 = vadd.f32 1.0, %v5703_v8  ;;  %v5705_v18 = vpop.eup %5704  ;;  %v2953_v8 = vld [vmem:[#allocation2 + $0x28] sm:$0xc0] }
 0xf39   :  { %5708 = vtanh.f32 %v2922_v29  ;;  %v2934_v20 = vadd.f32 1.0, %v5705_v18 }
 0xf3a   :  { %5710 = vrcp.f32 %v2933_v41 }
 0xf3b   :  { %5712 = vrcp.f32 %v2934_v20 }
 0xf45   :  { %v5707_v19 = vpop.eup %5706 }
 0xf46   :  { %v5709_v14 = vpop.eup %5708 }
 0xf47   :  { %v5711_v23 = vpop.eup %5710  ;;  %v2946_v30 = vmul.f32 %v5709_v14, %v5707_v19 }
 0xf48   :  { %v2945_v43 = vmul.f32 %v5711_v23, %v2943_v22  ;;  %v5713_v34 = vpop.eup %5712 }
 0xf4a   :  { %v7075_v37 = vadd.f32 %v2946_v30, %v2945_v43  ;;  %v2954_v30 = vld [vmem:[#allocation2 + $0x30] sm:$0xc0] }
 0xf4c   :  { %5714 = vtanh.f32 %v7075_v37 }
 0xf59   :  { %v5715_v26 = vpop.eup %5714 }
 0xf5a   :  { %v2949_v55 = vmul.f32 %v5715_v26, %v5713_v34 }
 0xf5c   :  { %v2950_v21 = vpack.c.bf16 %v2949_v55, %v2949_v55 }
 0xf5e   :  { %2951 = vst [vmem:[#allocation3 + $0x4] sm:$0x4] %v2950_v21  ;;  %v2957_v54 = vrot.slane %v2950_v21, 2  ;;  %v2955_v21 = vld [vmem:[#allocation2 + $0x38] sm:$0xc0] }
 0xf60   :  { %2992 = vmatmul.mubr.bf16.vlgmr.msra.gmra.mxu0 %v2957_v54  ;;  %3033 = vmatmul.mubr.bf16.vlgmr.msra.gmra.mxu1 %v2957_v54 }
 0xf61   :  { %3379 = vmatprep.mubr.bf16.mxu0 %v6106_v2  ;;  %3422 = vmatprep.mubr.bf16.mxu1 %v6106_v2 }
 0xf62   :  { %3348 = vmatpush1.bf16.msra.mxu0 %v5371_v40  ;;  %3391 = vmatpush1.bf16.msra.mxu1 %v5374_v63 }
 0xf63   :  { %3349 = vmatprep.subr.bf16.mxu0 %v5379_v42  ;;  %3392 = vmatprep.subr.bf16.mxu1 %v5382_v24 }
 0xf66   :  { %3350 = vmatpush1.bf16.msra.mxu0 %v5377_v27  ;;  %3393 = vmatpush1.bf16.msra.mxu1 %v5380_v13  ;;  %v3077_v13 = vrot.slane %v7075_v37, 6 }
 0xf67   :  { %3351 = vmatprep.subr.bf16.mxu0 %v5385_v46  ;;  %3394 = vmatprep.subr.bf16.mxu1 %v5388_v47 }
 0xf6a   :  { %3352 = vmatpush1.bf16.msra.mxu0 %v5383_v48  ;;  %3395 = vmatpush1.bf16.msra.mxu1 %v5386_v49 }
 0xf6b   :  { %3353 = vmatprep.subr.bf16.mxu0 %v5391_v56  ;;  %3396 = vmatprep.subr.bf16.mxu1 %v5394_v57 }
 0xf6e   :  { %3354 = vmatpush1.bf16.msra.mxu0 %v5389_v58  ;;  %3397 = vmatpush1.bf16.msra.mxu1 %v5392_v59 }
 0xf6f   :  { %3355 = vmatprep.subr.bf16.mxu0 %v5397_v60  ;;  %3398 = vmatprep.subr.bf16.mxu1 %v5400_v61  ;;  %v7087_v61 = vld [vmem:[#allocation12 + $0x2e0] ss:$16 sps:$4 sm:$0xff]  }
 0xf72   :  { %3356 = vmatpush1.bf16.msra.mxu0 %v5395_v3  ;;  %3399 = vmatpush1.bf16.msra.mxu1 %v5398_v0  ;;  %v7089_v3 = vld [vmem:[#allocation12 + $0x2e8] ss:$16 sps:$4 sm:$0xff]   ;;  %v7091_v0 = vld [vmem:[#allocation12 + $0x2c4] ss:$16 sps:$4 sm:$0xff]  }
 0xf73   :  { %3357 = vmatprep.subr.bf16.mxu0 %v5403_v4  ;;  %3400 = vmatprep.subr.bf16.mxu1 %v5406_v5  ;;  %v7093_v4 = vld [vmem:[#allocation12 + $0x2cc] ss:$16 sps:$4 sm:$0xff]   ;;  %v7097_v5 = vld [vmem:[#allocation12 + $0x2c0] ss:$16 sps:$4 sm:$0xff]  }
 0xf76   :  { %3358 = vmatpush1.bf16.msra.mxu0 %v5401_v6  ;;  %3401 = vmatpush1.bf16.msra.mxu1 %v5404_v9  ;;  %v7099_v6 = vld [vmem:[#allocation12 + $0x2c8] ss:$16 sps:$4 sm:$0xff]   ;;  %v7103_v9 = vld [vmem:[#allocation12 + $0x2a4] ss:$16 sps:$4 sm:$0xff]  }
 0xf77   :  { %3359 = vmatprep.subr.bf16.mxu0 %v5409_v10  ;;  %3402 = vmatprep.subr.bf16.mxu1 %v5412_v12  ;;  %v7105_v10 = vld [vmem:[#allocation12 + $0x2ac] ss:$16 sps:$4 sm:$0xff]   ;;  %v7117_v12 = vld [vmem:[#allocation12 + $0x284] ss:$16 sps:$4 sm:$0xff]  }
 0xf7a   :  { %3360 = vmatpush1.bf16.msra.mxu0 %v5407_v11  ;;  %3403 = vmatpush1.bf16.msra.mxu1 %v5410_v25  ;;  %v7111_v11 = vld [vmem:[#allocation12 + $0x2a0] ss:$16 sps:$4 sm:$0xff]   ;;  %v7113_v25 = vld [vmem:[#allocation12 + $0x2a8] ss:$16 sps:$4 sm:$0xff]  }
 0xf7b   :  { %3361 = vmatprep.subr.bf16.mxu0 %v5415_v50  ;;  %3404 = vmatprep.subr.bf16.mxu1 %v5418_v32  ;;  %v7119_v50 = vld [vmem:[#allocation12 + $0x28c] ss:$16 sps:$4 sm:$0xff]   ;;  %v7123_v32 = vld [vmem:[#allocation12 + $0x280] ss:$16 sps:$4 sm:$0xff]  }
 0xf7e   :  { %3362 = vmatpush1.bf16.msra.mxu0 %v5413_v33  ;;  %3405 = vmatpush1.bf16.msra.mxu1 %v5416_v35  ;;  %v7125_v33 = vld [vmem:[#allocation12 + $0x288] ss:$16 sps:$4 sm:$0xff]   ;;  %v7129_v35 = vld [vmem:[#allocation12 + $0x264] ss:$16 sps:$4 sm:$0xff]  }
 0xf7f   :  { %3610 = vmatprep.subr.bf16.mxu0 %v7080_v36  ;;  %3651 = vmatprep.subr.bf16.mxu1 %v7082_v38 }
0x1020   :  { %v2993_v44 = vpop.f32.mrf.mxu0  ;;  %v3034_v45 = vpop.f32.mrf.mxu1 }
0x1021   :  { %v3045_v62 = vrot.slane %v2993_v44, 2  ;;  %v3047_v43 = vrot.slane %v3034_v45, 2  ;;  %v7131_v44 = vld [vmem:[#allocation12 + $0x26c] ss:$16 sps:$4 sm:$0xff]   ;;  %v7135_v45 = vld [vmem:[#allocation12 + $0x260] ss:$16 sps:$4 sm:$0xff]  }
0x1022   :  { %v2995_v52 = vpop.f32.mrf.mxu0  ;;  %v3036_v28 = vpop.f32.mrf.mxu1 }
0x1023   :  { %v3053_v29 = vadd.f32 %v3045_v62, %v2952_v1  ;;  %v3046_v7 = vrot.slane %v2995_v52, 2  ;;  %v3055_v34 = vadd.f32 %v3047_v43, %v2954_v30  ;;  %v3048_v26 = vrot.slane %v3036_v28, 2  ;;  %v7137_v62 = vld [vmem:[#allocation12 + $0x268] ss:$16 sps:$4 sm:$0xff]   ;;  %v7141_v1 = vld [vmem:[#allocation12 + $0x244] ss:$16 sps:$4 sm:$0xff]  }
0x1024   :  { %v2997_v41 = vpop.f32.mrf.mxu0  ;;  %v3038_v18 = vpop.f32.mrf.mxu1  ;;  %v7143_v52 = vld [vmem:[#allocation12 + $0x24c] ss:$16 sps:$4 sm:$0xff]   ;;  %v7147_v28 = vld [vmem:[#allocation12 + $0x240] ss:$16 sps:$4 sm:$0xff]  }
0x1025   :  { %v5060_v19 = vmul.f32 -1.442695, %v3053_v29  ;;  %v3054_v14 = vadd.f32 %v3046_v7, %v2953_v8  ;;  %v5062_v55 = vmul.f32 -1.442695, %v3055_v34  ;;  %v3056_v31 = vadd.f32 %v3048_v26, %v2955_v21  ;;  %v7149_v29 = vld [vmem:[#allocation12 + $0x248] ss:$16 sps:$4 sm:$0xff]  }
0x1026   :  { %v2998_v22 = vpop.f32.mrf.mxu0  ;;  %v3039_v23 = vpop.f32.mrf.mxu1  ;;  %v7153_v7 = vld [vmem:[#allocation12 + $0x224] ss:$16 sps:$4 sm:$0xff]   ;;  %v7155_v8 = vld [vmem:[#allocation12 + $0x22c] ss:$16 sps:$4 sm:$0xff]   ;;  %v7159_v41 = vld [vmem:[#allocation12 + $0x220] ss:$16 sps:$4 sm:$0xff]  }
0x1027   :  { %5716 = vpow2.f32 %v5060_v19  ;;  %v5061_v20 = vmul.f32 -1.442695, %v3054_v14  ;;  %v7161_v18 = vld [vmem:[#allocation12 + $0x228] ss:$16 sps:$4 sm:$0xff]   ;;  %v7165_v19 = vld [vmem:[#allocation12 + $0x204] ss:$16 sps:$4 sm:$0xff]  }
0x1028   :  { %v7167_v14 = vld [vmem:[#allocation12 + $0x20c] ss:$16 sps:$4 sm:$0xff]   ;;  %v7171_v22 = vld [vmem:[#allocation12 + $0x200] ss:$16 sps:$4 sm:$0xff]   ;;  %v7173_v23 = vld [vmem:[#allocation12 + $0x208] ss:$16 sps:$4 sm:$0xff]  }
0x1029   :  { %5718 = vpow2.f32 %v5061_v20  ;;  %v5097_v20 = vld [vmem:[%s7519_s1 + $0x4] sm:$0x3] }
0x102a   :  { %5720 = vpow2.f32 %v5062_v55  ;;  %v3445_v43 = vpack.c.bf16 %v5097_v20, %v5097_v20  ;;  %v5063_v30 = vld [vmem:[%s7524_s6 + $0x4] sm:$0xf] }
0x102b   :  { %v3164_v34 = vrot.slane %v5063_v30, %v1607_v16  ;;  %v3172_v26 = vrot.slane %v5063_v30, %v1615_v17  ;;  %v3168_v55 = vrot.slane %v5063_v30, %v1611_v51  ;;  %v3176_v21 = vrot.slane %v5063_v30, %v1619_v53 }
0x1034   :  { %v5717_v54 = vpop.eup %5716 }
0x1035   :  { %v3066_v39 = vadd.f32 1.0, %v5717_v54 }
0x1036   :  { %v5719_v40 = vpop.eup %5718 }
0x1037   :  { %5722 = vrcp.f32 %v3066_v39  ;;  %v3067_v63 = vadd.f32 1.0, %v5719_v40  ;;  %v5721_v42 = vpop.eup %5720 }
0x1038   :  { %5724 = vtanh.f32 %v3056_v31  ;;  %v3068_v47 = vadd.f32 1.0, %v5721_v42 }
0x1039   :  { %5726 = vrcp.f32 %v3067_v63 }
0x103a   :  { %5728 = vrcp.f32 %v3068_v47 }
0x1044   :  { %v5723_v24 = vpop.eup %5722 }
0x1045   :  { %v5725_v27 = vpop.eup %5724 }
0x1046   :  { %v5727_v46 = vpop.eup %5726  ;;  %v3080_v49 = vmul.f32 %v5725_v27, %v5723_v24 }
0x1047   :  { %v3079_v48 = vmul.f32 %v5727_v46, %v3077_v13  ;;  %v5729_v57 = vpop.eup %5728 }
0x1049   :  { %v3081_v56 = vadd.f32 %v3080_v49, %v3079_v48 }
0x104b   :  { %5730 = vtanh.f32 %v3081_v56  ;;  %3089 = vst [vmem:[#allocation16 - $0x4] sm:$0xc0] %v3081_v56 }
0x1058   :  { %v5731_v58 = vpop.eup %5730 }
0x1059   :  { %v3083_v59 = vmul.f32 %v5731_v58, %v5729_v57 }
0x105b   :  { %v3084_v60 = vpack.c.bf16 %v3083_v59, %v3083_v59  ;;  %3087 = vst [vmem:[#allocation14 - $0x4] sm:$0xc0] %v3083_v59 }
0x105d   :  { %3085 = vst [vmem:[#allocation3 + $0x4] sm:$0x8] %v3084_v60 }
0x1064   :  { %v5423_v37 = vld [vmem:[#allocation3] sm:$0xff]  }
0x1065   :  { %3380 = vmatmul.mubr.bf16.vlgmr.msra.gmra.mxu0 %v5423_v37  ;;  %3423 = vmatmul.mubr.bf16.vlgmr.msra.gmra.mxu1 %v5423_v37 }
0x1066   :  { %3611 = vmatpush1.bf16.msra.mxu0 %v7087_v61  ;;  %3652 = vmatpush1.bf16.msra.mxu1 %v7089_v3 }
0x1067   :  { %3612 = vmatprep.subr.bf16.mxu0 %v7091_v0  ;;  %3653 = vmatprep.subr.bf16.mxu1 %v7093_v4 }
0x1068   :  { %3642 = vmatprep.mubr.bf16.mxu0 %v6106_v2  ;;  %3683 = vmatprep.mubr.bf16.mxu1 %v6106_v2 }
0x106a   :  { %3613 = vmatpush1.bf16.msra.mxu0 %v7097_v5  ;;  %3654 = vmatpush1.bf16.msra.mxu1 %v7099_v6 }
0x106b   :  { %3614 = vmatprep.subr.bf16.mxu0 %v7103_v9  ;;  %3655 = vmatprep.subr.bf16.mxu1 %v7105_v10 }
0x106e   :  { %3615 = vmatpush1.bf16.msra.mxu0 %v7111_v11  ;;  %3656 = vmatpush1.bf16.msra.mxu1 %v7113_v25 }
0x106f   :  { %3616 = vmatprep.subr.bf16.mxu0 %v7117_v12  ;;  %3657 = vmatprep.subr.bf16.mxu1 %v7119_v50 }
0x1072   :  { %3617 = vmatpush1.bf16.msra.mxu0 %v7123_v32  ;;  %3658 = vmatpush1.bf16.msra.mxu1 %v7125_v33 }
0x1073   :  { %3618 = vmatprep.subr.bf16.mxu0 %v7129_v35  ;;  %3659 = vmatprep.subr.bf16.mxu1 %v7131_v44 }
0x1076   :  { %3619 = vmatpush1.bf16.msra.mxu0 %v7135_v45  ;;  %3660 = vmatpush1.bf16.msra.mxu1 %v7137_v62 }
0x1077   :  { %3620 = vmatprep.subr.bf16.mxu0 %v7141_v1  ;;  %3661 = vmatprep.subr.bf16.mxu1 %v7143_v52 }
0x107a   :  { %3621 = vmatpush1.bf16.msra.mxu0 %v7147_v28  ;;  %3662 = vmatpush1.bf16.msra.mxu1 %v7149_v29 }
0x107b   :  { %3622 = vmatprep.subr.bf16.mxu0 %v7153_v7  ;;  %3663 = vmatprep.subr.bf16.mxu1 %v7155_v8 }
0x107e   :  { %3623 = vmatpush1.bf16.msra.mxu0 %v7159_v41  ;;  %3664 = vmatpush1.bf16.msra.mxu1 %v7161_v18 }
0x107f   :  { %3624 = vmatprep.subr.bf16.mxu0 %v7165_v19  ;;  %3665 = vmatprep.subr.bf16.mxu1 %v7167_v14 }
0x1082   :  { %3625 = vmatpush1.bf16.msra.mxu0 %v7171_v22  ;;  %3666 = vmatpush1.bf16.msra.mxu1 %v7173_v23 }
0x1083   :  { %3727 = vmatprep.subr.bf16.mxu0 %v7080_v36  ;;  %3768 = vmatprep.subr.bf16.mxu1 %v7082_v38 }
0x1085   :  { %3643 = vmatmul.mubr.bf16.vlgmr.msra.gmra.mxu0 %v3445_v43  ;;  %3684 = vmatmul.mubr.bf16.vlgmr.msra.gmra.mxu1 %v3445_v43 }
0x1086   :  { %3728 = vmatpush1.bf16.msra.mxu0 %v7087_v61  ;;  %3769 = vmatpush1.bf16.msra.mxu1 %v7089_v3 }
0x1087   :  { %3729 = vmatprep.subr.bf16.mxu0 %v7091_v0  ;;  %3770 = vmatprep.subr.bf16.mxu1 %v7093_v4 }
0x1088   :  { %3759 = vmatprep.mubr.bf16.mxu0 %v6106_v2  ;;  %3800 = vmatprep.mubr.bf16.mxu1 %v6106_v2 }
0x108a   :  { %3730 = vmatpush1.bf16.msra.mxu0 %v7097_v5  ;;  %3771 = vmatpush1.bf16.msra.mxu1 %v7099_v6 }
0x108b   :  { %3731 = vmatprep.subr.bf16.mxu0 %v7103_v9  ;;  %3772 = vmatprep.subr.bf16.mxu1 %v7105_v10 }
0x108e   :  { %3732 = vmatpush1.bf16.msra.mxu0 %v7111_v11  ;;  %3773 = vmatpush1.bf16.msra.mxu1 %v7113_v25 }
0x108f   :  { %3733 = vmatprep.subr.bf16.mxu0 %v7117_v12  ;;  %3774 = vmatprep.subr.bf16.mxu1 %v7119_v50 }
0x1092   :  { %3734 = vmatpush1.bf16.msra.mxu0 %v7123_v32  ;;  %3775 = vmatpush1.bf16.msra.mxu1 %v7125_v33 }
0x1093   :  { %3735 = vmatprep.subr.bf16.mxu0 %v7129_v35  ;;  %3776 = vmatprep.subr.bf16.mxu1 %v7131_v44 }
0x1096   :  { %3736 = vmatpush1.bf16.msra.mxu0 %v7135_v45  ;;  %3777 = vmatpush1.bf16.msra.mxu1 %v7137_v62 }
0x1097   :  { %3737 = vmatprep.subr.bf16.mxu0 %v7141_v1  ;;  %3778 = vmatprep.subr.bf16.mxu1 %v7143_v52 }
0x109a   :  { %3738 = vmatpush1.bf16.msra.mxu0 %v7147_v28  ;;  %3779 = vmatpush1.bf16.msra.mxu1 %v7149_v29 }
0x109b   :  { %3739 = vmatprep.subr.bf16.mxu0 %v7153_v7  ;;  %3780 = vmatprep.subr.bf16.mxu1 %v7155_v8 }
0x109e   :  { %3740 = vmatpush1.bf16.msra.mxu0 %v7159_v41  ;;  %3781 = vmatpush1.bf16.msra.mxu1 %v7161_v18 }
0x109f   :  { %3741 = vmatprep.subr.bf16.mxu0 %v7165_v19  ;;  %3782 = vmatprep.subr.bf16.mxu1 %v7167_v14 }
0x10a2   :  { %3742 = vmatpush1.bf16.msra.mxu0 %v7171_v22  ;;  %3783 = vmatpush1.bf16.msra.mxu1 %v7173_v23 }
0x10a3   :  { %3862 = vmatprep.subr.bf16.mxu0 %v7080_v36  ;;  %3903 = vmatprep.subr.bf16.mxu1 %v7082_v38 }
0x1125   :  { %v3381_v54 = vpop.f32.mrf.mxu0  ;;  %v3424_v31 = vpop.f32.mrf.mxu1 }
0x1126   :  { %v3382_v39 = vadd.f32 %v3381_v54, %v3164_v34  ;;  %v3425_v40 = vadd.f32 %v3424_v31, %v3172_v26 }
0x1127   :  { %v3383_v63 = vpop.f32.mrf.mxu0  ;;  %v3426_v42 = vpop.f32.mrf.mxu1 }
0x1128   :  { %3433 = vst [vmem:[#allocation2] sm:$0xff] %v3382_v39  ;;  %3435 = vst [vmem:[#allocation2 + $0x10] sm:$0xff] %v3425_v40  ;;  %v3384_v24 = vadd.f32 %v3383_v63, %v3168_v55  ;;  %v3427_v27 = vadd.f32 %v3426_v42, %v3176_v21 }
0x1129   :  { %v3385_v16 = vpop.f32.mrf.mxu0  ;;  %v3428_v13 = vpop.f32.mrf.mxu1 }
0x112a   :  { %3434 = vst [vmem:[#allocation2 + $0x8] sm:$0xff] %v3384_v24  ;;  %3436 = vst [vmem:[#allocation2 + $0x18] sm:$0xff] %v3427_v27  ;;  %v3386_v17 = vadd.f32 %v3385_v16, %v3164_v34  ;;  %v3429_v46 = vadd.f32 %v3428_v13, %v3172_v26 }
0x112b   :  { %v3387_v51 = vpop.f32.mrf.mxu0  ;;  %v3430_v47 = vpop.f32.mrf.mxu1 }
0x112c   :  { %3437 = vst [vmem:[#allocation2 + $0x20] sm:$0xff] %v3386_v17  ;;  %3439 = vst [vmem:[#allocation2 + $0x30] sm:$0xff] %v3429_v46  ;;  %v3388_v15 = vadd.f32 %v3387_v51, %v3168_v55  ;;  %v3431_v53 = vadd.f32 %v3430_v47, %v3176_v21  ;;  %v5098_v17 = vld [vmem:[%s7520_s2 + $0x4] sm:$0x3] }
0x112e   :  { %3438 = vst [vmem:[#allocation2 + $0x28] sm:$0xff] %v3388_v15  ;;  %3440 = vst [vmem:[#allocation2 + $0x38] sm:$0xff] %v3431_v53 }
0x112f   :  { %v3446_v48 = vld [vmem:[#allocation2] sm:$0x3]  ;;  %v3448_v55 = vld [vmem:[#allocation2 + $0x10] sm:$0x3] }
0x1131   :  { %v3447_v58 = vld [vmem:[#allocation2 + $0x8] sm:$0x3]  ;;  %v3449_v39 = vld [vmem:[#allocation2 + $0x18] sm:$0x3] }
0x1145   :  { %v3644_v49 = vpop.f32.mrf.mxu0  ;;  %v3685_v56 = vpop.f32.mrf.mxu1 }
0x1146   :  { %v3692_v57 = vadd.f32 %v3644_v49, %v3446_v48  ;;  %v3694_v21 = vadd.f32 %v3685_v56, %v3448_v55 }
0x1147   :  { %v3646_v59 = vpop.f32.mrf.mxu0  ;;  %v3687_v60 = vpop.f32.mrf.mxu1 }
0x1148   :  { %v5131_v37 = vmul.f32 -1.442695, %v3692_v57  ;;  %v3693_v20 = vadd.f32 %v3646_v59, %v3447_v58  ;;  %v5133_v31 = vmul.f32 -1.442695, %v3694_v21  ;;  %v3695_v63 = vadd.f32 %v3687_v60, %v3449_v39 }
0x1149   :  { %v3648_v43 = vpop.f32.mrf.mxu0  ;;  %v3689_v30 = vpop.f32.mrf.mxu1 }
0x114a   :  { %5732 = vpow2.f32 %v5131_v37  ;;  %v5132_v34 = vmul.f32 -1.442695, %v3693_v20  ;;  %v3723_v20 = vld [vmem:[#allocation2] sm:$0xc] }
0x114b   :  { %v3649_v26 = vpop.f32.mrf.mxu0  ;;  %v3690_v54 = vpop.f32.mrf.mxu1 }
0x114c   :  { %5734 = vpow2.f32 %v5132_v34  ;;  %v3724_v54 = vld [vmem:[#allocation2 + $0x8] sm:$0xc] }
0x114d   :  { %5736 = vpow2.f32 %v5133_v31 }
0x1157   :  { %v5733_v40 = vpop.eup %5732 }
0x1158   :  { %v3705_v42 = vadd.f32 1.0, %v5733_v40 }
0x1159   :  { %v5735_v24 = vpop.eup %5734 }
0x115a   :  { %5738 = vrcp.f32 %v3705_v42  ;;  %v3706_v27 = vadd.f32 1.0, %v5735_v24  ;;  %v5737_v16 = vpop.eup %5736 }
0x115b   :  { %5740 = vtanh.f32 %v3695_v63  ;;  %v3707_v47 = vadd.f32 1.0, %v5737_v16 }
0x115c   :  { %5742 = vrcp.f32 %v3706_v27  ;;  %v3725_v27 = vld [vmem:[#allocation2 + $0x10] sm:$0xc] }
0x115d   :  { %5744 = vrcp.f32 %v3707_v47 }
0x1167   :  { %v5739_v13 = vpop.eup %5738 }
0x1168   :  { %v5741_v46 = vpop.eup %5740 }
0x1169   :  { %v5743_v51 = vpop.eup %5742  ;;  %v3716_v53 = vmul.f32 %v5741_v46, %v5739_v13  ;;  %v3726_v46 = vld [vmem:[#allocation2 + $0x18] sm:$0xc] }
0x116a   :  { %v3715_v15 = vmul.f32 %v5743_v51, %v5098_v17  ;;  %v5745_v49 = vpop.eup %5744 }
0x116c   :  { %v7232_v48 = vadd.f32 %v3716_v53, %v3715_v15 }
0x116e   :  { %5746 = vtanh.f32 %v7232_v48 }
0x117b   :  { %v5747_v56 = vpop.eup %5746 }
0x117c   :  { %v3719_v57 = vmul.f32 %v5747_v56, %v5745_v49 }
0x117e   :  { %v3720_v58 = vpack.c.bf16 %v3719_v57, %v3719_v57  ;;  %3721 = vst [vmem:[#allocation4] sm:$0x1] %v3719_v57  ;;  %3722 = vst [vmem:[#allocation4 + $0x7] sm:$0x2] %v3719_v57 }
0x1180   :  { %3760 = vmatmul.mubr.bf16.vlgmr.msra.gmra.mxu0 %v3720_v58  ;;  %3801 = vmatmul.mubr.bf16.vlgmr.msra.gmra.mxu1 %v3720_v58 }
0x1181   :  { %3863 = vmatpush1.bf16.msra.mxu0 %v7087_v61  ;;  %3904 = vmatpush1.bf16.msra.mxu1 %v7089_v3 }
0x1182   :  { %3864 = vmatprep.subr.bf16.mxu0 %v7091_v0  ;;  %3905 = vmatprep.subr.bf16.mxu1 %v7093_v4 }
0x1183   :  { %3894 = vmatprep.mubr.bf16.mxu0 %v6106_v2  ;;  %3935 = vmatprep.mubr.bf16.mxu1 %v6106_v2 }
0x1185   :  { %3865 = vmatpush1.bf16.msra.mxu0 %v7097_v5  ;;  %3906 = vmatpush1.bf16.msra.mxu1 %v7099_v6 }
0x1186   :  { %3866 = vmatprep.subr.bf16.mxu0 %v7103_v9  ;;  %3907 = vmatprep.subr.bf16.mxu1 %v7105_v10 }
0x1189   :  { %3867 = vmatpush1.bf16.msra.mxu0 %v7111_v11  ;;  %3908 = vmatpush1.bf16.msra.mxu1 %v7113_v25 }
0x118a   :  { %3868 = vmatprep.subr.bf16.mxu0 %v7117_v12  ;;  %3909 = vmatprep.subr.bf16.mxu1 %v7119_v50 }
0x118d   :  { %3869 = vmatpush1.bf16.msra.mxu0 %v7123_v32  ;;  %3910 = vmatpush1.bf16.msra.mxu1 %v7125_v33 }
0x118e   :  { %3870 = vmatprep.subr.bf16.mxu0 %v7129_v35  ;;  %3911 = vmatprep.subr.bf16.mxu1 %v7131_v44 }
0x1191   :  { %3871 = vmatpush1.bf16.msra.mxu0 %v7135_v45  ;;  %3912 = vmatpush1.bf16.msra.mxu1 %v7137_v62 }
0x1192   :  { %3872 = vmatprep.subr.bf16.mxu0 %v7141_v1  ;;  %3913 = vmatprep.subr.bf16.mxu1 %v7143_v52 }
0x1195   :  { %3873 = vmatpush1.bf16.msra.mxu0 %v7147_v28  ;;  %3914 = vmatpush1.bf16.msra.mxu1 %v7149_v29 }
0x1196   :  { %3874 = vmatprep.subr.bf16.mxu0 %v7153_v7  ;;  %3915 = vmatprep.subr.bf16.mxu1 %v7155_v8 }
0x1199   :  { %3875 = vmatpush1.bf16.msra.mxu0 %v7159_v41  ;;  %3916 = vmatpush1.bf16.msra.mxu1 %v7161_v18 }
0x119a   :  { %3876 = vmatprep.subr.bf16.mxu0 %v7165_v19  ;;  %3917 = vmatprep.subr.bf16.mxu1 %v7167_v14 }
0x119d   :  { %3877 = vmatpush1.bf16.msra.mxu0 %v7171_v22  ;;  %3918 = vmatpush1.bf16.msra.mxu1 %v7173_v23 }
0x119e   :  { %3997 = vmatprep.subr.bf16.mxu0 %v7080_v36  ;;  %4038 = vmatprep.subr.bf16.mxu1 %v7082_v38 }
0x1240   :  { %v3761_v59 = vpop.f32.mrf.mxu0  ;;  %v3802_v60 = vpop.f32.mrf.mxu1 }
0x1241   :  { %v3813_v37 = vrot.slane %v3761_v59, 6  ;;  %v3815_v24 = vrot.slane %v3802_v60, 6  ;;  %v3845_v59 = vrot.slane %v7232_v48, 6 }
0x1242   :  { %v3763_v43 = vpop.f32.mrf.mxu0  ;;  %v3804_v30 = vpop.f32.mrf.mxu1 }
0x1243   :  { %v3821_v34 = vadd.f32 %v3813_v37, %v3723_v20  ;;  %v3814_v26 = vrot.slane %v3763_v43, 6  ;;  %v3823_v16 = vadd.f32 %v3815_v24, %v3725_v27  ;;  %v3816_v13 = vrot.slane %v3804_v30, 6 }
0x1244   :  { %v3765_v55 = vpop.f32.mrf.mxu0  ;;  %v3806_v21 = vpop.f32.mrf.mxu1 }
0x1245   :  { %v5134_v31 = vmul.f32 -1.442695, %v3821_v34  ;;  %v3822_v39 = vadd.f32 %v3814_v26, %v3724_v54  ;;  %v5136_v17 = vmul.f32 -1.442695, %v3823_v16  ;;  %v3824_v47 = vadd.f32 %v3816_v13, %v3726_v46  ;;  %v3856_v16 = vld [vmem:[#allocation2 + $0x8] sm:$0x30] }
0x1246   :  { %v3766_v40 = vpop.f32.mrf.mxu0  ;;  %v3807_v63 = vpop.f32.mrf.mxu1 }
0x1247   :  { %5748 = vpow2.f32 %v5134_v31  ;;  %v5135_v42 = vmul.f32 -1.442695, %v3822_v39  ;;  %v3855_v40 = vld [vmem:[#allocation2] sm:$0x30] }
0x1249   :  { %5750 = vpow2.f32 %v5135_v42 }
0x124a   :  { %5752 = vpow2.f32 %v5136_v17 }
0x1254   :  { %v5749_v51 = vpop.eup %5748 }
0x1255   :  { %v3834_v15 = vadd.f32 1.0, %v5749_v51 }
0x1256   :  { %v5751_v53 = vpop.eup %5750 }
0x1257   :  { %5754 = vrcp.f32 %v3834_v15  ;;  %v3835_v49 = vadd.f32 1.0, %v5751_v53  ;;  %v5753_v56 = vpop.eup %5752 }
0x1258   :  { %5756 = vtanh.f32 %v3824_v47  ;;  %v3836_v37 = vadd.f32 1.0, %v5753_v56  ;;  %v3857_v56 = vld [vmem:[#allocation2 + $0x10] sm:$0x30] }
0x1259   :  { %5758 = vrcp.f32 %v3835_v49 }
0x125a   :  { %5760 = vrcp.f32 %v3836_v37 }
0x1264   :  { %v5755_v57 = vpop.eup %5754 }
0x1265   :  { %v5757_v58 = vpop.eup %5756 }
0x1266   :  { %v5759_v60 = vpop.eup %5758  ;;  %v3848_v43 = vmul.f32 %v5757_v58, %v5755_v57 }
0x1267   :  { %v3847_v20 = vmul.f32 %v5759_v60, %v3845_v59  ;;  %v5761_v34 = vpop.eup %5760  ;;  %v3858_v60 = vld [vmem:[#allocation2 + $0x18] sm:$0x30] }
0x1269   :  { %v7270_v30 = vadd.f32 %v3848_v43, %v3847_v20 }
0x126b   :  { %5762 = vtanh.f32 %v7270_v30 }
0x1278   :  { %v5763_v26 = vpop.eup %5762 }
0x1279   :  { %v3851_v54 = vmul.f32 %v5763_v26, %v5761_v34 }
0x127b   :  { %v3852_v55 = vpack.c.bf16 %v3851_v54, %v3851_v54  ;;  %3853 = vst [vmem:[#allocation4 - $0x1] sm:$0x4] %v3851_v54  ;;  %3854 = vst [vmem:[#allocation4 + $0x6] sm:$0x8] %v3851_v54 }
0x127d   :  { %v3860_v21 = vrot.slane %v3852_v55, 1 }
0x127f   :  { %3895 = vmatmul.mubr.bf16.vlgmr.msra.gmra.mxu0 %v3860_v21  ;;  %3936 = vmatmul.mubr.bf16.vlgmr.msra.gmra.mxu1 %v3860_v21 }
0x1280   :  { %3998 = vmatpush1.bf16.msra.mxu0 %v7087_v61  ;;  %4039 = vmatpush1.bf16.msra.mxu1 %v7089_v3 }
0x1281   :  { %3999 = vmatprep.subr.bf16.mxu0 %v7091_v0  ;;  %4040 = vmatprep.subr.bf16.mxu1 %v7093_v4 }
0x1282   :  { %4029 = vmatprep.mubr.bf16.mxu0 %v6106_v2  ;;  %4070 = vmatprep.mubr.bf16.mxu1 %v6106_v2 }
0x1284   :  { %4000 = vmatpush1.bf16.msra.mxu0 %v7097_v5  ;;  %4041 = vmatpush1.bf16.msra.mxu1 %v7099_v6 }
0x1285   :  { %4001 = vmatprep.subr.bf16.mxu0 %v7103_v9  ;;  %4042 = vmatprep.subr.bf16.mxu1 %v7105_v10 }
0x1288   :  { %4002 = vmatpush1.bf16.msra.mxu0 %v7111_v11  ;;  %4043 = vmatpush1.bf16.msra.mxu1 %v7113_v25 }
0x1289   :  { %4003 = vmatprep.subr.bf16.mxu0 %v7117_v12  ;;  %4044 = vmatprep.subr.bf16.mxu1 %v7119_v50 }
0x128c   :  { %4004 = vmatpush1.bf16.msra.mxu0 %v7123_v32  ;;  %4045 = vmatpush1.bf16.msra.mxu1 %v7125_v33 }
0x128d   :  { %4005 = vmatprep.subr.bf16.mxu0 %v7129_v35  ;;  %4046 = vmatprep.subr.bf16.mxu1 %v7131_v44 }
0x1290   :  { %4006 = vmatpush1.bf16.msra.mxu0 %v7135_v45  ;;  %4047 = vmatpush1.bf16.msra.mxu1 %v7137_v62 }
0x1291   :  { %4007 = vmatprep.subr.bf16.mxu0 %v7141_v1  ;;  %4048 = vmatprep.subr.bf16.mxu1 %v7143_v52 }
0x1294   :  { %4008 = vmatpush1.bf16.msra.mxu0 %v7147_v28  ;;  %4049 = vmatpush1.bf16.msra.mxu1 %v7149_v29 }
0x1295   :  { %4009 = vmatprep.subr.bf16.mxu0 %v7153_v7  ;;  %4050 = vmatprep.subr.bf16.mxu1 %v7155_v8 }
0x1298   :  { %4010 = vmatpush1.bf16.msra.mxu0 %v7159_v41  ;;  %4051 = vmatpush1.bf16.msra.mxu1 %v7161_v18 }
0x1299   :  { %4011 = vmatprep.subr.bf16.mxu0 %v7165_v19  ;;  %4052 = vmatprep.subr.bf16.mxu1 %v7167_v14 }
0x129c   :  { %4012 = vmatpush1.bf16.msra.mxu0 %v7171_v22  ;;  %4053 = vmatpush1.bf16.msra.mxu1 %v7173_v23 }
0x129d   :  { %4132 = vmatprep.subr.bf16.mxu0 %v7080_v36  ;;  %4173 = vmatprep.subr.bf16.mxu1 %v7082_v38 }
0x133f   :  { %v3896_v48 = vpop.f32.mrf.mxu0  ;;  %v3937_v31 = vpop.f32.mrf.mxu1 }
0x1340   :  { %v3948_v39 = vrot.slane %v3896_v48, 4  ;;  %v3950_v49 = vrot.slane %v3937_v31, 4  ;;  %v3980_v48 = vrot.slane %v7270_v30, 6 }
0x1341   :  { %v3898_v63 = vpop.f32.mrf.mxu0  ;;  %v3939_v42 = vpop.f32.mrf.mxu1 }
0x1342   :  { %v3956_v24 = vadd.f32 %v3948_v39, %v3855_v40  ;;  %v3949_v27 = vrot.slane %v3898_v63, 4  ;;  %v3958_v57 = vadd.f32 %v3950_v49, %v3857_v56  ;;  %v3951_v58 = vrot.slane %v3939_v42, 4 }
0x1343   :  { %v3900_v13 = vpop.f32.mrf.mxu0  ;;  %v3941_v17 = vpop.f32.mrf.mxu1 }
0x1344   :  { %v5137_v46 = vmul.f32 -1.442695, %v3956_v24  ;;  %v3957_v51 = vadd.f32 %v3949_v27, %v3856_v16  ;;  %v5139_v59 = vmul.f32 -1.442695, %v3958_v57  ;;  %v3959_v20 = vadd.f32 %v3951_v58, %v3858_v60  ;;  %v3991_v57 = vld [vmem:[#allocation2 + $0x8] sm:$0xc0] }
0x1345   :  { %v3901_v47 = vpop.f32.mrf.mxu0  ;;  %v3942_v15 = vpop.f32.mrf.mxu1 }
0x1346   :  { %5764 = vpow2.f32 %v5137_v46  ;;  %v5138_v53 = vmul.f32 -1.442695, %v3957_v51  ;;  %v3990_v47 = vld [vmem:[#allocation2] sm:$0xc0] }
0x1348   :  { %5766 = vpow2.f32 %v5138_v53 }
0x1349   :  { %5768 = vpow2.f32 %v5139_v59 }
0x1353   :  { %v5765_v37 = vpop.eup %5764 }
0x1354   :  { %v3969_v43 = vadd.f32 1.0, %v5765_v37 }
0x1355   :  { %v5767_v34 = vpop.eup %5766 }
0x1356   :  { %5770 = vrcp.f32 %v3969_v43  ;;  %v3970_v26 = vadd.f32 1.0, %v5767_v34  ;;  %v5769_v54 = vpop.eup %5768 }
0x1357   :  { %5772 = vtanh.f32 %v3959_v20  ;;  %v3971_v39 = vadd.f32 1.0, %v5769_v54 }
0x1358   :  { %5774 = vrcp.f32 %v3970_v26 }
0x1359   :  { %5776 = vrcp.f32 %v3971_v39 }
0x1363   :  { %v5771_v55 = vpop.eup %5770 }
0x1364   :  { %v5773_v21 = vpop.eup %5772 }
0x1365   :  { %v5775_v31 = vpop.eup %5774  ;;  %v3983_v63 = vmul.f32 %v5773_v21, %v5771_v55  ;;  %v3993_v21 = vld [vmem:[#allocation2 + $0x18] sm:$0xc0] }
0x1366   :  { %v3982_v40 = vmul.f32 %v5775_v31, %v3980_v48  ;;  %v5777_v24 = vpop.eup %5776 }
0x1368   :  { %v7308_v42 = vadd.f32 %v3983_v63, %v3982_v40 }
0x136a   :  { %5778 = vtanh.f32 %v7308_v42 }
0x1377   :  { %v5779_v27 = vpop.eup %5778 }
0x1378   :  { %v3986_v16 = vmul.f32 %v5779_v27, %v5777_v24 }
0x137a   :  { %v3987_v13 = vpack.c.bf16 %v3986_v16, %v3986_v16  ;;  %3988 = vst [vmem:[#allocation4 - $0x2] sm:$0x10] %v3986_v16  ;;  %3989 = vst [vmem:[#allocation4 + $0x5] sm:$0x20] %v3986_v16 }
0x137c   :  { %v3995_v17 = vrot.slane %v3987_v13, 2  ;;  %v4115_v13 = vrot.slane %v7308_v42, 6 }
0x137e   :  { %4030 = vmatmul.mubr.bf16.vlgmr.msra.gmra.mxu0 %v3995_v17  ;;  %4071 = vmatmul.mubr.bf16.vlgmr.msra.gmra.mxu1 %v3995_v17 }
0x137f   :  { %4133 = vmatpush1.bf16.msra.mxu0 %v7087_v61  ;;  %4174 = vmatpush1.bf16.msra.mxu1 %v7089_v3 }
0x1380   :  { %4134 = vmatprep.subr.bf16.mxu0 %v7091_v0  ;;  %4175 = vmatprep.subr.bf16.mxu1 %v7093_v4 }
0x1381   :  { %4164 = vmatprep.mubr.bf16.mxu0 %v6106_v2  ;;  %4205 = vmatprep.mubr.bf16.mxu1 %v6106_v2 }
0x1383   :  { %4135 = vmatpush1.bf16.msra.mxu0 %v7097_v5  ;;  %4176 = vmatpush1.bf16.msra.mxu1 %v7099_v6 }
0x1384   :  { %4136 = vmatprep.subr.bf16.mxu0 %v7103_v9  ;;  %4177 = vmatprep.subr.bf16.mxu1 %v7105_v10 }
0x1387   :  { %4137 = vmatpush1.bf16.msra.mxu0 %v7111_v11  ;;  %4178 = vmatpush1.bf16.msra.mxu1 %v7113_v25 }
0x1388   :  { %4138 = vmatprep.subr.bf16.mxu0 %v7117_v12  ;;  %4179 = vmatprep.subr.bf16.mxu1 %v7119_v50 }
0x138b   :  { %4139 = vmatpush1.bf16.msra.mxu0 %v7123_v32  ;;  %4180 = vmatpush1.bf16.msra.mxu1 %v7125_v33 }
0x138c   :  { %4140 = vmatprep.subr.bf16.mxu0 %v7129_v35  ;;  %4181 = vmatprep.subr.bf16.mxu1 %v7131_v44 }
0x138f   :  { %4141 = vmatpush1.bf16.msra.mxu0 %v7135_v45  ;;  %4182 = vmatpush1.bf16.msra.mxu1 %v7137_v62 }
0x1390   :  { %4142 = vmatprep.subr.bf16.mxu0 %v7141_v1  ;;  %4183 = vmatprep.subr.bf16.mxu1 %v7143_v52 }
0x1393   :  { %4143 = vmatpush1.bf16.msra.mxu0 %v7147_v28  ;;  %4184 = vmatpush1.bf16.msra.mxu1 %v7149_v29 }
0x1394   :  { %4144 = vmatprep.subr.bf16.mxu0 %v7153_v7  ;;  %4185 = vmatprep.subr.bf16.mxu1 %v7155_v8 }
0x1397   :  { %4145 = vmatpush1.bf16.msra.mxu0 %v7159_v41  ;;  %4186 = vmatpush1.bf16.msra.mxu1 %v7161_v18 }
0x1398   :  { %4146 = vmatprep.subr.bf16.mxu0 %v7165_v19  ;;  %4187 = vmatprep.subr.bf16.mxu1 %v7167_v14 }
0x139b   :  { %4147 = vmatpush1.bf16.msra.mxu0 %v7171_v22  ;;  %4188 = vmatpush1.bf16.msra.mxu1 %v7173_v23 }
0x139c   :  { %4252 = vmatprep.subr.bf16.mxu0 %v7080_v36  ;;  %4293 = vmatprep.subr.bf16.mxu1 %v7082_v38  ;;  %v3992_v38 = vld [vmem:[#allocation2 + $0x10] sm:$0xc0] }
0x143e   :  { %v4031_v30 = vpop.f32.mrf.mxu0  ;;  %v4072_v46 = vpop.f32.mrf.mxu1 }
0x143f   :  { %v4083_v51 = vrot.slane %v4031_v30, 2  ;;  %v4085_v36 = vrot.slane %v4072_v46, 2 }
0x1440   :  { %v4033_v15 = vpop.f32.mrf.mxu0  ;;  %v4074_v53 = vpop.f32.mrf.mxu1 }
0x1441   :  { %v4091_v49 = vadd.f32 %v4083_v51, %v3990_v47  ;;  %v4084_v56 = vrot.slane %v4033_v15, 2  ;;  %v4093_v26 = vadd.f32 %v4085_v36, %v3992_v38  ;;  %v4086_v54 = vrot.slane %v4074_v53, 2 }
0x1442   :  { %v4035_v58 = vpop.f32.mrf.mxu0  ;;  %v4076_v59 = vpop.f32.mrf.mxu1 }
0x1443   :  { %v5140_v60 = vmul.f32 -1.442695, %v4091_v49  ;;  %v4092_v37 = vadd.f32 %v4084_v56, %v3991_v57  ;;  %v5142_v55 = vmul.f32 -1.442695, %v4093_v26  ;;  %v4094_v31 = vadd.f32 %v4086_v54, %v3993_v21  ;;  %v4127_v59 = vld [vmem:[#allocation2 + $0x30] sm:$0x3] }
0x1444   :  { %v4036_v20 = vpop.f32.mrf.mxu0  ;;  %v4077_v43 = vpop.f32.mrf.mxu1 }
0x1445   :  { %5780 = vpow2.f32 %v5140_v60  ;;  %v5141_v34 = vmul.f32 -1.442695, %v4092_v37  ;;  %v4128_v20 = vld [vmem:[#allocation2 + $0x38] sm:$0x3] }
0x1447   :  { %5782 = vpow2.f32 %v5141_v34 }
0x1448   :  { %5784 = vpow2.f32 %v5142_v55 }
0x1452   :  { %v5781_v48 = vpop.eup %5780 }
0x1453   :  { %v4104_v39 = vadd.f32 1.0, %v5781_v48 }
0x1454   :  { %v5783_v40 = vpop.eup %5782 }
0x1455   :  { %5786 = vrcp.f32 %v4104_v39  ;;  %v4105_v63 = vadd.f32 1.0, %v5783_v40  ;;  %v5785_v24 = vpop.eup %5784 }
0x1456   :  { %5788 = vtanh.f32 %v4094_v31  ;;  %v4106_v30 = vadd.f32 1.0, %v5785_v24 }
0x1457   :  { %5790 = vrcp.f32 %v4105_v63 }
0x1458   :  { %5792 = vrcp.f32 %v4106_v30  ;;  %v7391_v30 = vld [vmem:[#allocation12 + $0x2e0] ss:$16 sps:$4 sm:$0xff]  }
0x1462   :  { %v5787_v27 = vpop.eup %5786 }
0x1463   :  { %v5789_v16 = vpop.eup %5788 }
0x1464   :  { %v5791_v17 = vpop.eup %5790  ;;  %v4118_v51 = vmul.f32 %v5789_v16, %v5787_v27 }
0x1465   :  { %v4117_v46 = vmul.f32 %v5791_v17, %v4115_v13  ;;  %v5793_v15 = vpop.eup %5792 }
0x1467   :  { %v7346_v47 = vadd.f32 %v4118_v51, %v4117_v46  ;;  %v7394_v46 = vld [vmem:[#allocation12 + $0x2e8] ss:$16 sps:$4 sm:$0xff]   ;;  %v7397_v51 = vld [vmem:[#allocation12 + $0x2c4] ss:$16 sps:$4 sm:$0xff]  }
0x1469   :  { %5794 = vtanh.f32 %v7346_v47  ;;  %v4238_v48 = vrot.slane %v7346_v47, 6  ;;  %v7400_v47 = vld [vmem:[#allocation12 + $0x2cc] ss:$16 sps:$4 sm:$0xff]  }
0x1476   :  { %v5795_v53 = vpop.eup %5794 }
0x1477   :  { %v4121_v49 = vmul.f32 %v5795_v53, %v5793_v15  ;;  %v7405_v15 = vld [vmem:[#allocation12 + $0x2c0] ss:$16 sps:$4 sm:$0xff]   ;;  %v7408_v53 = vld [vmem:[#allocation12 + $0x2c8] ss:$16 sps:$4 sm:$0xff]  }
0x1479   :  { %v4122_v56 = vpack.c.bf16 %v4121_v49, %v4121_v49  ;;  %4123 = vst [vmem:[#allocation4 - $0x3] sm:$0x40] %v4121_v49  ;;  %4124 = vst [vmem:[#allocation4 + $0x4] sm:$0x80] %v4121_v49  ;;  %v7411_v49 = vld [vmem:[#allocation12 + $0x2a4] ss:$16 sps:$4 sm:$0xff]  }
0x147b   :  { %v4130_v57 = vrot.slane %v4122_v56, 3  ;;  %v7414_v56 = vld [vmem:[#allocation12 + $0x2ac] ss:$16 sps:$4 sm:$0xff]  }
0x147d   :  { %4165 = vmatmul.mubr.bf16.vlgmr.msra.gmra.mxu0 %v4130_v57  ;;  %4206 = vmatmul.mubr.bf16.vlgmr.msra.gmra.mxu1 %v4130_v57  ;;  %v7417_v57 = vld [vmem:[#allocation12 + $0x2a0] ss:$16 sps:$4 sm:$0xff]  }
0x147e   :  { %4253 = vmatpush1.bf16.msra.mxu0 %v7087_v61  ;;  %4294 = vmatpush1.bf16.msra.mxu1 %v7089_v3  ;;  %v7381_v61 = vld [vmem:[#allocation12 + $0x2e4] ss:$16 sps:$4 sm:$0xff]   ;;  %v7384_v3 = vld [vmem:[#allocation12 + $0x2ec] ss:$16 sps:$4 sm:$0xff]  }
0x147f   :  { %4254 = vmatprep.subr.bf16.mxu0 %v7091_v0  ;;  %4295 = vmatprep.subr.bf16.mxu1 %v7093_v4  ;;  %v4125_v0 = vld [vmem:[#allocation2 + $0x20] sm:$0x3] }
0x1480   :  { %4284 = vmatprep.mubr.bf16.mxu0 %v6106_v2  ;;  %4325 = vmatprep.mubr.bf16.mxu1 %v6106_v2 }
0x1482   :  { %4255 = vmatpush1.bf16.msra.mxu0 %v7097_v5  ;;  %4296 = vmatpush1.bf16.msra.mxu1 %v7099_v6 }
0x1483   :  { %4256 = vmatprep.subr.bf16.mxu0 %v7103_v9  ;;  %4297 = vmatprep.subr.bf16.mxu1 %v7105_v10  ;;  %v4126_v9 = vld [vmem:[#allocation2 + $0x28] sm:$0x3] }
0x1486   :  { %4257 = vmatpush1.bf16.msra.mxu0 %v7111_v11  ;;  %4298 = vmatpush1.bf16.msra.mxu1 %v7113_v25 }
0x1487   :  { %4258 = vmatprep.subr.bf16.mxu0 %v7117_v12  ;;  %4299 = vmatprep.subr.bf16.mxu1 %v7119_v50 }
0x148a   :  { %4259 = vmatpush1.bf16.msra.mxu0 %v7123_v32  ;;  %4300 = vmatpush1.bf16.msra.mxu1 %v7125_v33 }
0x148b   :  { %4260 = vmatprep.subr.bf16.mxu0 %v7129_v35  ;;  %4301 = vmatprep.subr.bf16.mxu1 %v7131_v44 }
0x148e   :  { %4261 = vmatpush1.bf16.msra.mxu0 %v7135_v45  ;;  %4302 = vmatpush1.bf16.msra.mxu1 %v7137_v62 }
0x148f   :  { %4262 = vmatprep.subr.bf16.mxu0 %v7141_v1  ;;  %4303 = vmatprep.subr.bf16.mxu1 %v7143_v52 }
0x1492   :  { %4263 = vmatpush1.bf16.msra.mxu0 %v7147_v28  ;;  %4304 = vmatpush1.bf16.msra.mxu1 %v7149_v29 }
0x1493   :  { %4264 = vmatprep.subr.bf16.mxu0 %v7153_v7  ;;  %4305 = vmatprep.subr.bf16.mxu1 %v7155_v8 }
0x1496   :  { %4265 = vmatpush1.bf16.msra.mxu0 %v7159_v41  ;;  %4306 = vmatpush1.bf16.msra.mxu1 %v7161_v18 }
0x1497   :  { %4266 = vmatprep.subr.bf16.mxu0 %v7165_v19  ;;  %4307 = vmatprep.subr.bf16.mxu1 %v7167_v14 }
0x149a   :  { %4267 = vmatpush1.bf16.msra.mxu0 %v7171_v22  ;;  %4308 = vmatpush1.bf16.msra.mxu1 %v7173_v23 }
0x149b   :  { %4387 = vmatprep.subr.bf16.mxu0 %v7381_v61  ;;  %4428 = vmatprep.subr.bf16.mxu1 %v7384_v3 }
0x153d   :  { %v4166_v4 = vpop.f32.mrf.mxu0  ;;  %v4207_v5 = vpop.f32.mrf.mxu1 }
0x153e   :  { %v4214_v6 = vadd.f32 %v4166_v4, %v4125_v0  ;;  %v4216_v60 = vadd.f32 %v4207_v5, %v4127_v59  ;;  %v7420_v0 = vld [vmem:[#allocation12 + $0x2a8] ss:$16 sps:$4 sm:$0xff]   ;;  %v7423_v4 = vld [vmem:[#allocation12 + $0x284] ss:$16 sps:$4 sm:$0xff]   ;;  %v7426_v5 = vld [vmem:[#allocation12 + $0x28c] ss:$16 sps:$4 sm:$0xff]  }
0x153f   :  { %v4168_v10 = vpop.f32.mrf.mxu0  ;;  %v4209_v11 = vpop.f32.mrf.mxu1 }
0x1540   :  { %v5143_v25 = vmul.f32 -1.442695, %v4214_v6  ;;  %v4215_v12 = vadd.f32 %v4168_v10, %v4126_v9  ;;  %v5145_v37 = vmul.f32 -1.442695, %v4216_v60  ;;  %v4217_v34 = vadd.f32 %v4209_v11, %v4128_v20  ;;  %v7429_v6 = vld [vmem:[#allocation12 + $0x280] ss:$16 sps:$4 sm:$0xff]  }
0x1541   :  { %v4170_v50 = vpop.f32.mrf.mxu0  ;;  %v4211_v32 = vpop.f32.mrf.mxu1  ;;  %v7432_v9 = vld [vmem:[#allocation12 + $0x288] ss:$16 sps:$4 sm:$0xff]  }
0x1542   :  { %5796 = vpow2.f32 %v5143_v25  ;;  %v5144_v33 = vmul.f32 -1.442695, %v4215_v12  ;;  %v4251_v12 = vld [vmem:[#allocation2 + $0x38] sm:$0xc] }
0x1543   :  { %v4171_v42 = vpop.f32.mrf.mxu0  ;;  %v4212_v58 = vpop.f32.mrf.mxu1 }
0x1544   :  { %5798 = vpow2.f32 %v5144_v33 }
0x1545   :  { %5800 = vpow2.f32 %v5145_v37 }
0x154f   :  { %v5797_v43 = vpop.eup %5796 }
0x1550   :  { %v4227_v36 = vadd.f32 1.0, %v5797_v43 }
0x1551   :  { %v5799_v38 = vpop.eup %5798 }
0x1552   :  { %5802 = vrcp.f32 %v4227_v36  ;;  %v4228_v26 = vadd.f32 1.0, %v5799_v38  ;;  %v5801_v54 = vpop.eup %5800 }
0x1553   :  { %5804 = vtanh.f32 %v4217_v34  ;;  %v4229_v39 = vadd.f32 1.0, %v5801_v54 }
0x1554   :  { %5806 = vrcp.f32 %v4228_v26 }
0x1555   :  { %5808 = vrcp.f32 %v4229_v39  ;;  %v5941_v39 = vld [vmem:[#allocation12 + $0x26c] ss:$16 sps:$4 sm:$0xff]  }
0x155f   :  { %v5803_v55 = vpop.eup %5802 }
0x1560   :  { %v5805_v21 = vpop.eup %5804 }
0x1561   :  { %v5807_v31 = vpop.eup %5806  ;;  %v4241_v63 = vmul.f32 %v5805_v21, %v5803_v55 }
0x1562   :  { %v4240_v40 = vmul.f32 %v5807_v31, %v4238_v48  ;;  %v5809_v27 = vpop.eup %5808 }
0x1564   :  { %v7388_v24 = vadd.f32 %v4241_v63, %v4240_v40  ;;  %v5942_v40 = vld [vmem:[#allocation12 + $0x260] ss:$16 sps:$4 sm:$0xff]   ;;  %v5943_v63 = vld [vmem:[#allocation12 + $0x268] ss:$16 sps:$4 sm:$0xff]  }
0x1566   :  { %5810 = vtanh.f32 %v7388_v24  ;;  %v4370_v20 = vrot.slane %v7388_v24, 6  ;;  %v5944_v24 = vld [vmem:[#allocation12 + $0x244] ss:$16 sps:$4 sm:$0xff]  }
0x1573   :  { %v5811_v16 = vpop.eup %5810 }
0x1574   :  { %v4244_v13 = vmul.f32 %v5811_v16, %v5809_v27  ;;  %v5945_v27 = vld [vmem:[#allocation12 + $0x24c] ss:$16 sps:$4 sm:$0xff]   ;;  %v5946_v16 = vld [vmem:[#allocation12 + $0x240] ss:$16 sps:$4 sm:$0xff]  }
0x1576   :  { %v4245_v17 = vpack.c.bf16 %v4244_v13, %v4244_v13  ;;  %4246 = vst [vmem:[#allocation4 + $0x4] sm:$0x1] %v4244_v13  ;;  %4247 = vst [vmem:[#allocation4 + $0xb] sm:$0x2] %v4244_v13  ;;  %v5947_v13 = vld [vmem:[#allocation12 + $0x248] ss:$16 sps:$4 sm:$0xff]  }
0x1578   :  { %4285 = vmatmul.mubr.bf16.vlgmr.msra.gmra.mxu0 %v4245_v17  ;;  %4326 = vmatmul.mubr.bf16.vlgmr.msra.gmra.mxu1 %v4245_v17  ;;  %v5948_v17 = vld [vmem:[#allocation12 + $0x224] ss:$16 sps:$4 sm:$0xff]  }
0x1579   :  { %4388 = vmatpush1.bf16.msra.mxu0 %v7391_v30  ;;  %4429 = vmatpush1.bf16.msra.mxu1 %v7394_v46 }
0x157a   :  { %4389 = vmatprep.subr.bf16.mxu0 %v7397_v51  ;;  %4430 = vmatprep.subr.bf16.mxu1 %v7400_v47 }
0x157b   :  { %4419 = vmatprep.mubr.bf16.mxu0 %v6106_v2  ;;  %4460 = vmatprep.mubr.bf16.mxu1 %v6106_v2 }
0x157d   :  { %4390 = vmatpush1.bf16.msra.mxu0 %v7405_v15  ;;  %4431 = vmatpush1.bf16.msra.mxu1 %v7408_v53 }
0x157e   :  { %4391 = vmatprep.subr.bf16.mxu0 %v7411_v49  ;;  %4432 = vmatprep.subr.bf16.mxu1 %v7414_v56 }
0x1581   :  { %4392 = vmatpush1.bf16.msra.mxu0 %v7417_v57  ;;  %4433 = vmatpush1.bf16.msra.mxu1 %v7420_v0 }
0x1582   :  { %4393 = vmatprep.subr.bf16.mxu0 %v7423_v4  ;;  %4434 = vmatprep.subr.bf16.mxu1 %v7426_v5 }
0x1585   :  { %4394 = vmatpush1.bf16.msra.mxu0 %v7429_v6  ;;  %4435 = vmatpush1.bf16.msra.mxu1 %v7432_v9 }
0x1586   :  { %4395 = vmatprep.subr.bf16.mxu0 %v7129_v35  ;;  %4436 = vmatprep.subr.bf16.mxu1 %v7131_v44 }
0x1589   :  { %4396 = vmatpush1.bf16.msra.mxu0 %v7135_v45  ;;  %4437 = vmatpush1.bf16.msra.mxu1 %v7137_v62  ;;  %v4248_v62 = vld [vmem:[#allocation2 + $0x20] sm:$0xc] }
0x158a   :  { %4397 = vmatprep.subr.bf16.mxu0 %v7141_v1  ;;  %4438 = vmatprep.subr.bf16.mxu1 %v7143_v52 }
0x158d   :  { %4398 = vmatpush1.bf16.msra.mxu0 %v7147_v28  ;;  %4439 = vmatpush1.bf16.msra.mxu1 %v7149_v29 }
0x158e   :  { %4399 = vmatprep.subr.bf16.mxu0 %v7153_v7  ;;  %4440 = vmatprep.subr.bf16.mxu1 %v7155_v8  ;;  %v4249_v7 = vld [vmem:[#allocation2 + $0x28] sm:$0xc] }
0x1591   :  { %4400 = vmatpush1.bf16.msra.mxu0 %v7159_v41  ;;  %4441 = vmatpush1.bf16.msra.mxu1 %v7161_v18 }
0x1592   :  { %4401 = vmatprep.subr.bf16.mxu0 %v7165_v19  ;;  %4442 = vmatprep.subr.bf16.mxu1 %v7167_v14 }
0x1595   :  { %4402 = vmatpush1.bf16.msra.mxu0 %v7171_v22  ;;  %4443 = vmatpush1.bf16.msra.mxu1 %v7173_v23 }
0x1596   :  { %4522 = vmatprep.subr.bf16.mxu0 %v7381_v61  ;;  %4563 = vmatprep.subr.bf16.mxu1 %v7384_v3  ;;  %v4250_v3 = vld [vmem:[#allocation2 + $0x30] sm:$0xc] }
0x1638   :  { %v4286_v35 = vpop.f32.mrf.mxu0  ;;  %v4327_v44 = vpop.f32.mrf.mxu1 }
0x1639   :  { %v4338_v45 = vrot.slane %v4286_v35, 6  ;;  %v4340_v61 = vrot.slane %v4327_v44, 6  ;;  %v4381_v44 = vld [vmem:[#allocation2 + $0x28] sm:$0x30] }
0x163a   :  { %v4288_v1 = vpop.f32.mrf.mxu0  ;;  %v4329_v52 = vpop.f32.mrf.mxu1 }
0x163b   :  { %v4346_v28 = vadd.f32 %v4338_v45, %v4248_v62  ;;  %v4339_v29 = vrot.slane %v4288_v1, 6  ;;  %v4348_v10 = vadd.f32 %v4340_v61, %v4250_v3  ;;  %v4341_v11 = vrot.slane %v4329_v52, 6 }
0x163c   :  { %v4290_v8 = vpop.f32.mrf.mxu0  ;;  %v4331_v41 = vpop.f32.mrf.mxu1 }
0x163d   :  { %v5146_v18 = vmul.f32 -1.442695, %v4346_v28  ;;  %v4347_v19 = vadd.f32 %v4339_v29, %v4249_v7  ;;  %v5148_v25 = vmul.f32 -1.442695, %v4348_v10  ;;  %v4349_v32 = vadd.f32 %v4341_v11, %v4251_v12  ;;  %v4382_v41 = vld [vmem:[#allocation2 + $0x30] sm:$0x30] }
0x163e   :  { %v4291_v14 = vpop.f32.mrf.mxu0  ;;  %v4332_v22 = vpop.f32.mrf.mxu1 }
0x163f   :  { %5812 = vpow2.f32 %v5146_v18  ;;  %v5147_v23 = vmul.f32 -1.442695, %v4347_v19  ;;  %v4383_v22 = vld [vmem:[#allocation2 + $0x38] sm:$0x30] }
0x1641   :  { %5814 = vpow2.f32 %v5147_v23 }
0x1642   :  { %5816 = vpow2.f32 %v5148_v25 }
0x164c   :  { %v5813_v50 = vpop.eup %5812 }
0x164d   :  { %v4359_v33 = vadd.f32 1.0, %v5813_v50 }
0x164e   :  { %v5815_v42 = vpop.eup %5814 }
0x164f   :  { %5818 = vrcp.f32 %v4359_v33  ;;  %v4360_v58 = vadd.f32 1.0, %v5815_v42  ;;  %v5817_v59 = vpop.eup %5816 }
0x1650   :  { %5820 = vtanh.f32 %v4349_v32  ;;  %v4361_v34 = vadd.f32 1.0, %v5817_v59 }
0x1651   :  { %5822 = vrcp.f32 %v4360_v58 }
0x1652   :  { %5824 = vrcp.f32 %v4361_v34 }
0x165c   :  { %v5819_v60 = vpop.eup %5818 }
0x165d   :  { %v5821_v37 = vpop.eup %5820 }
0x165e   :  { %v5823_v43 = vpop.eup %5822  ;;  %v4373_v38 = vmul.f32 %v5821_v37, %v5819_v60 }
0x165f   :  { %v4372_v36 = vmul.f32 %v5823_v43, %v4370_v20  ;;  %v5825_v54 = vpop.eup %5824 }
0x1661   :  { %v7454_v26 = vadd.f32 %v4373_v38, %v4372_v36  ;;  %v5468_v38 = vld [vmem:[%s7525_s7 + $0x38] sm:$0xff]  }
0x1663   :  { %5826 = vtanh.f32 %v7454_v26  ;;  %v4505_v32 = vrot.slane %v7454_v26, 6  ;;  %v6107_v26 = vmov 0.0  }
0x1670   :  { %v5827_v55 = vpop.eup %5826 }
0x1671   :  { %v4376_v21 = vmul.f32 %v5827_v55, %v5825_v54  ;;  %v5469_v54 = vld [vmem:[%s7525_s7 + $0x30] sm:$0xff]   ;;  %v5470_v55 = vld [vmem:[%s7525_s7 + $0x28] sm:$0xff]  }
0x1673   :  { %v4377_v48 = vpack.c.bf16 %v4376_v21, %v4376_v21  ;;  %4378 = vst [vmem:[#allocation4 + $0x3] sm:$0x4] %v4376_v21  ;;  %4379 = vst [vmem:[#allocation4 + $0xa] sm:$0x8] %v4376_v21  ;;  %v5471_v21 = vld [vmem:[%s7525_s7 + $0x20] sm:$0xff]  }
0x1675   :  { %v4385_v31 = vrot.slane %v4377_v48, 1  ;;  %v5472_v48 = vld [vmem:[%s7525_s7 + $0x18] sm:$0xff]  }
0x1677   :  { %4420 = vmatmul.mubr.bf16.vlgmr.msra.gmra.mxu0 %v4385_v31  ;;  %4461 = vmatmul.mubr.bf16.vlgmr.msra.gmra.mxu1 %v4385_v31  ;;  %v5473_v31 = vld [vmem:[%s7525_s7 + $0x10] sm:$0xff]  }
0x1678   :  { %4523 = vmatpush1.bf16.msra.mxu0 %v7391_v30  ;;  %4564 = vmatpush1.bf16.msra.mxu1 %v7394_v46  ;;  %v5949_v30 = vld [vmem:[#allocation12 + $0x22c] ss:$16 sps:$4 sm:$0xff]   ;;  %v5950_v46 = vld [vmem:[#allocation12 + $0x220] ss:$16 sps:$4 sm:$0xff]  }
0x1679   :  { %4524 = vmatprep.subr.bf16.mxu0 %v7397_v51  ;;  %4565 = vmatprep.subr.bf16.mxu1 %v7400_v47  ;;  %v5951_v51 = vld [vmem:[#allocation12 + $0x228] ss:$16 sps:$4 sm:$0xff]   ;;  %v5952_v47 = vld [vmem:[#allocation12 + $0x204] ss:$16 sps:$4 sm:$0xff]  }
0x167a   :  { %4554 = vmatprep.mubr.bf16.mxu0 %v6106_v2  ;;  %4595 = vmatprep.mubr.bf16.mxu1 %v6106_v2  ;;  %v5940_v2 = vld [vmem:[#allocation12 + $0x264] ss:$16 sps:$4 sm:$0xff]  }
0x167c   :  { %4525 = vmatpush1.bf16.msra.mxu0 %v7405_v15  ;;  %4566 = vmatpush1.bf16.msra.mxu1 %v7408_v53  ;;  %v5953_v15 = vld [vmem:[#allocation12 + $0x20c] ss:$16 sps:$4 sm:$0xff]   ;;  %v5954_v53 = vld [vmem:[#allocation12 + $0x200] ss:$16 sps:$4 sm:$0xff]  }
0x167d   :  { %4526 = vmatprep.subr.bf16.mxu0 %v7411_v49  ;;  %4567 = vmatprep.subr.bf16.mxu1 %v7414_v56  ;;  %v5955_v49 = vld [vmem:[#allocation12 + $0x208] ss:$16 sps:$4 sm:$0xff]  }
0x1680   :  { %4527 = vmatpush1.bf16.msra.mxu0 %v7417_v57  ;;  %4568 = vmatpush1.bf16.msra.mxu1 %v7420_v0 }
0x1681   :  { %4528 = vmatprep.subr.bf16.mxu0 %v7423_v4  ;;  %4569 = vmatprep.subr.bf16.mxu1 %v7426_v5  ;;  %v4380_v4 = vld [vmem:[#allocation2 + $0x20] sm:$0x30] }
0x1684   :  { %4529 = vmatpush1.bf16.msra.mxu0 %v7429_v6  ;;  %4570 = vmatpush1.bf16.msra.mxu1 %v7432_v9 }
0x1685   :  { %4530 = vmatprep.subr.bf16.mxu0 %v5940_v2  ;;  %4571 = vmatprep.subr.bf16.mxu1 %v5941_v39  ;;  %v5474_v2 = vld [vmem:[%s7525_s7 + $0x8] sm:$0xff]   ;;  %v5475_v39 = vld [vmem:[%s7525_s7] sm:$0xff]   ;;  %s6109_s7 = smov [#allocation14]  }
0x1686   :  { %s4788_s13 = sshll.u32 %s6109_s7, 4  ;;  %s4789_s13 = int_to_ptr.vmem [resolvable:$true] %s4788_s13 }
0x1687   :  { %s6028_s14 = scalar_lea.vmem %s4789_s13, 96  ;;  %p6033_p7 = scmp.lt.s32.totalorder %s4789_s13, %s4789_s13 }
0x1688   :  { %4531 = vmatpush1.bf16.msra.mxu0 %v5942_v40  ;;  %4572 = vmatpush1.bf16.msra.mxu1 %v5943_v63  ;;  %p6029_p6 = scmp.ne.s32.totalorder %s4789_s13, %s6028_s14  ;;  %p6034_p8 = scmp.lt.s32.totalorder %s6028_s14, %s6028_s14 }
0x1689   :  { %4532 = vmatprep.subr.bf16.mxu0 %v5944_v24  ;;  %4573 = vmatprep.subr.bf16.mxu1 %v5945_v27  ;;  %v4515_v27 = vld [vmem:[#allocation2 + $0x20] sm:$0xc0] }
0x168a   :  { %p6035_p9 = por %p6034_p8, %p6033_p7 }
0x168c   :  { %4533 = vmatpush1.bf16.msra.mxu0 %v5946_v16  ;;  %4574 = vmatpush1.bf16.msra.mxu1 %v5947_v13  ;;  %p6036_p10 = pnand %p6035_p9, %p6029_p6 }
0x168d   :  { %4534 = vmatprep.subr.bf16.mxu0 %v5948_v17  ;;  %4575 = vmatprep.subr.bf16.mxu1 %v5949_v30 }
0x1690   :  { %4535 = vmatpush1.bf16.msra.mxu0 %v5950_v46  ;;  %4576 = vmatpush1.bf16.msra.mxu1 %v5951_v51  ;;  %v4516_v46 = vld [vmem:[#allocation2 + $0x28] sm:$0xc0] }
0x1691   :  { %4536 = vmatprep.subr.bf16.mxu0 %v5952_v47  ;;  %4577 = vmatprep.subr.bf16.mxu1 %v5953_v15 }
0x1694   :  { %4537 = vmatpush1.bf16.msra.mxu0 %v5954_v53  ;;  %4578 = vmatpush1.bf16.msra.mxu1 %v5955_v49 }
0x1695   :  { %5189 = vmatprep.subr.bf16.mxu0 %v6107_v26 }
0x1737   :  { %v4421_v56 = vpop.f32.mrf.mxu0  ;;  %v4462_v57 = vpop.f32.mrf.mxu1 }
0x1738   :  { %v4473_v0 = vrot.slane %v4421_v56, 4  ;;  %v4475_v8 = vrot.slane %v4462_v57, 4 }
0x1739   :  { %v4423_v5 = vpop.f32.mrf.mxu0  ;;  %v4464_v6 = vpop.f32.mrf.mxu1 }
0x173a   :  { %v4481_v9 = vadd.f32 %v4473_v0, %v4380_v4  ;;  %v4474_v35 = vrot.slane %v4423_v5, 4  ;;  %v4483_v18 = vadd.f32 %v4475_v8, %v4382_v41  ;;  %v4476_v19 = vrot.slane %v4464_v6, 4  ;;  %v4517_v4 = vld [vmem:[#allocation2 + $0x30] sm:$0xc0] }
0x173b   :  { %v4425_v45 = vpop.f32.mrf.mxu0  ;;  %v4466_v62 = vpop.f32.mrf.mxu1 }
0x173c   :  { %v5149_v1 = vmul.f32 -1.442695, %v4481_v9  ;;  %v4482_v52 = vadd.f32 %v4474_v35, %v4381_v44  ;;  %v5151_v14 = vmul.f32 -1.442695, %v4483_v18  ;;  %v4484_v61 = vadd.f32 %v4476_v19, %v4383_v22  ;;  %v4518_v35 = vld [vmem:[#allocation2 + $0x38] sm:$0xc0] }
0x173d   :  { %v4426_v28 = vpop.f32.mrf.mxu0  ;;  %v4467_v29 = vpop.f32.mrf.mxu1 }
0x173e   :  { %5828 = vpow2.f32 %v5149_v1  ;;  %v5150_v7 = vmul.f32 -1.442695, %v4482_v52 }
0x1740   :  { %5830 = vpow2.f32 %v5150_v7 }
0x1741   :  { %5832 = vpow2.f32 %v5151_v14 }
0x174b   :  { %v5829_v23 = vpop.eup %5828 }
0x174c   :  { %v4494_v3 = vadd.f32 1.0, %v5829_v23 }
0x174d   :  { %v5831_v10 = vpop.eup %5830 }
0x174e   :  { %5834 = vrcp.f32 %v4494_v3  ;;  %v4495_v11 = vadd.f32 1.0, %v5831_v10  ;;  %v5833_v25 = vpop.eup %5832 }
0x174f   :  { %5836 = vtanh.f32 %v4484_v61  ;;  %v4496_v42 = vadd.f32 1.0, %v5833_v25 }
0x1750   :  { %5838 = vrcp.f32 %v4495_v11 }
0x1751   :  { %5840 = vrcp.f32 %v4496_v42 }
0x175b   :  { %v5835_v12 = vpop.eup %5834 }
0x175c   :  { %v5837_v50 = vpop.eup %5836 }
0x175d   :  { %v5839_v33 = vpop.eup %5838  ;;  %v4508_v59 = vmul.f32 %v5837_v50, %v5835_v12 }
0x175e   :  { %v4507_v58 = vmul.f32 %v5839_v33, %v4505_v32  ;;  %v5841_v37 = vpop.eup %5840 }
0x1760   :  { %v7474_v60 = vadd.f32 %v4508_v59, %v4507_v58 }
0x1762   :  { %5842 = vtanh.f32 %v7474_v60  ;;  %v4640_v8 = vrot.slane %v7474_v60, 6 }
0x176f   :  { %v5843_v20 = vpop.eup %5842 }
0x1770   :  { %v4511_v43 = vmul.f32 %v5843_v20, %v5841_v37 }
0x1772   :  { %v4512_v34 = vpack.c.bf16 %v4511_v43, %v4511_v43  ;;  %4513 = vst [vmem:[#allocation4 + $0x2] sm:$0x10] %v4511_v43  ;;  %4514 = vst [vmem:[#allocation4 + $0x9] sm:$0x20] %v4511_v43 }
0x1774   :  { %v4520_v36 = vrot.slane %v4512_v34, 2 }
0x1776   :  { %4555 = vmatmul.mubr.bf16.vlgmr.msra.gmra.mxu0 %v4520_v36  ;;  %4596 = vmatmul.mubr.bf16.vlgmr.msra.gmra.mxu1 %v4520_v36 }
0x1777   :  { %5190 = vmatpush3.bf16.msra.mxu0 %v5468_v38  ;;  %5205 = vmatprep.mubr.msk.bf16.mxu0 %vm6108_vm1, %v6107_v26 }
0x1778   :  { %5191 = vmatprep.subr.bf16.mxu0 %v6107_v26 }
0x177b   :  { %5192 = vmatpush3.bf16.msra.mxu0 %v5469_v54 }
0x177c   :  { %5193 = vmatprep.subr.bf16.mxu0 %v6107_v26 }
0x177f   :  { %5194 = vmatpush3.bf16.msra.mxu0 %v5470_v55 }
0x1780   :  { %5195 = vmatprep.subr.bf16.mxu0 %v6107_v26 }
0x1783   :  { %5196 = vmatpush3.bf16.msra.mxu0 %v5471_v21 }
0x1784   :  { %5197 = vmatprep.subr.bf16.mxu0 %v6107_v26 }
0x1787   :  { %5198 = vmatpush3.bf16.msra.mxu0 %v5472_v48 }
0x1788   :  { %5199 = vmatprep.subr.bf16.mxu0 %v6107_v26 }
0x178b   :  { %5200 = vmatpush3.bf16.msra.mxu0 %v5473_v31 }
0x178c   :  { %5201 = vmatprep.subr.bf16.mxu0 %v6107_v26 }
0x178f   :  { %5202 = vmatpush3.bf16.msra.mxu0 %v5474_v2 }
0x1790   :  { %5203 = vmatprep.subr.bf16.mxu0 %v6107_v26 }
0x1793   :  { %5204 = vmatpush3.bf16.msra.mxu0 %v5475_v39 }
0x1836   :  { %v4556_v40 = vpop.f32.mrf.mxu0  ;;  %v4597_v63 = vpop.f32.mrf.mxu1 }
0x1837   :  { %v4608_v24 = vrot.slane %v4556_v40, 2  ;;  %v4610_v0 = vrot.slane %v4597_v63, 2 }
0x1838   :  { %v4558_v16 = vpop.f32.mrf.mxu0  ;;  %v4599_v13 = vpop.f32.mrf.mxu1 }
0x1839   :  { %v4616_v17 = vadd.f32 %v4608_v24, %v4515_v27  ;;  %v4609_v30 = vrot.slane %v4558_v16, 2  ;;  %v4618_v5 = vadd.f32 %v4610_v0, %v4517_v4  ;;  %v4611_v6 = vrot.slane %v4599_v13, 2 }
0x183a   :  { %v4560_v51 = vpop.f32.mrf.mxu0  ;;  %v4601_v47 = vpop.f32.mrf.mxu1 }
0x183b   :  { %v5152_v15 = vmul.f32 -1.442695, %v4616_v17  ;;  %v4617_v53 = vadd.f32 %v4609_v30, %v4516_v46  ;;  %v5154_v9 = vmul.f32 -1.442695, %v4618_v5  ;;  %v4619_v45 = vadd.f32 %v4611_v6, %v4518_v35 }
0x183c   :  { %v4561_v49 = vpop.f32.mrf.mxu0  ;;  %v4602_v56 = vpop.f32.mrf.mxu1 }
0x183d   :  { %5844 = vpow2.f32 %v5152_v15  ;;  %v5153_v57 = vmul.f32 -1.442695, %v4617_v53 }
0x183f   :  { %5846 = vpow2.f32 %v5153_v57 }
0x1840   :  { %5848 = vpow2.f32 %v5154_v9 }
0x184a   :  { %v5845_v44 = vpop.eup %5844 }
0x184b   :  { %v4629_v62 = vadd.f32 1.0, %v5845_v44 }
0x184c   :  { %v5847_v1 = vpop.eup %5846 }
0x184d   :  { %5850 = vrcp.f32 %v4629_v62  ;;  %v4630_v52 = vadd.f32 1.0, %v5847_v1  ;;  %v5849_v28 = vpop.eup %5848 }
0x184e   :  { %5852 = vtanh.f32 %v4619_v45  ;;  %v4631_v18 = vadd.f32 1.0, %v5849_v28 }
0x184f   :  { %5854 = vrcp.f32 %v4630_v52 }
0x1850   :  { %5856 = vrcp.f32 %v4631_v18 }
0x185a   :  { %v5851_v29 = vpop.eup %5850 }
0x185b   :  { %v5853_v7 = vpop.eup %5852 }
0x185c   :  { %v5855_v41 = vpop.eup %5854  ;;  %v4643_v14 = vmul.f32 %v5853_v7, %v5851_v29 }
0x185d   :  { %v4642_v19 = vmul.f32 %v5855_v41, %v4640_v8  ;;  %v5857_v23 = vpop.eup %5856 }
0x185f   :  { %v4644_v22 = vadd.f32 %v4643_v14, %v4642_v19 }
0x1861   :  { %5858 = vtanh.f32 %v4644_v22  ;;  %4652 = vst [vmem:[#allocation16 - $0x2] sm:$0xc0] %v4644_v22 }
0x186e   :  { %v5859_v61 = vpop.eup %5858 }
0x186f   :  { %v4646_v3 = vmul.f32 %v5859_v61, %v5857_v23 }
0x1871   :  { %4647 = vst [vmem:[#allocation4 + $0x1] sm:$0x40] %v4646_v3  ;;  %4648 = vst [vmem:[#allocation4 + $0x8] sm:$0x80] %v4646_v3 }
0x1872   :  { %4650 = vst [vmem:[#allocation14 - $0x2] sm:$0xc0] %v4646_v3 }
0x1878   :  { %v4653_v10 = vld [vmem:[#allocation4] sm:$0xff]  ;;  %v4654_v11 = vld [vmem:[#allocation4 + $0x8] sm:$0xff] }
0x1879   :  { %v4655_v25 = vpack.c.bf16 %v4654_v11, %v4653_v10 }
0x187b   :  { %5206 = vmatmul.mubr.bf16.vlgmr.msra.gmra.mxu0 %v4655_v25 }
0x187c   :  { %6039 = shalt.err (!%p6036_p10)
}
0x187d   :  { %s6110_s15 = smov 2   ;;  %s6111_s1 = smov [#allocation16]  }
0x187e   :  { %4794 = dma.vmem_to_hbm [thread:$0]  %s4789_s13, 96, %s7528_s10, [#allocation15], %s6104_s12, %s6104_s12, %s6110_s15  }
0x187f   :  { %s4800_s18 = sshll.u32 %s6111_s1, 4  ;;  %s4801_s18 = int_to_ptr.vmem [resolvable:$true] %s4800_s18 }
0x1880   :  { %s6048_s6 = scalar_lea.vmem %s4801_s18, 96  ;;  %p6053_p12 = scmp.lt.s32.totalorder %s4801_s18, %s4801_s18 }
0x1881   :  { %p6049_p11 = scmp.ne.s32.totalorder %s4801_s18, %s6048_s6  ;;  %p6054_p13 = scmp.lt.s32.totalorder %s6048_s6, %s6048_s6 }
0x1883   :  { %p6055_p0 = por %p6054_p13, %p6053_p12 }
0x1885   :  { %p6056_p1 = pnand %p6055_p0, %p6049_p11 }
0x1887   :  { %6059 = shalt.err (!%p6056_p1)
}
0x1888   :  { %4806 = dma.vmem_to_hbm [thread:$0]  %s4801_s18, 96, %s7529_s11, [#allocation15], %s6104_s12, %s6104_s12, %s6110_s15   ;;  %vm4768_vm2 = vcmask 261120  }
0x1889   :  { %v5155_v12 = vld [vmem:[%s7526_s8] ss:$0 sm:$0xff]  ;;  %s6112_s10 = smov [#allocation13]  }
0x188a   :  { %s4776_s20 = sshll.u32 %s6112_s10, 4  ;;  %s4777_s20 = int_to_ptr.vmem [resolvable:$true] %s4776_s20 }
0x188b   :  { %s6068_s21 = scalar_lea.vmem %s4777_s20, 256  ;;  %p6073_p3 = scmp.lt.s32.totalorder %s4777_s20, %s4777_s20 }
0x188c   :  { %p6069_p2 = scmp.ne.s32.totalorder %s4777_s20, %s6068_s21  ;;  %p6074_p4 = scmp.lt.s32.totalorder %s6068_s21, %s6068_s21 }
0x188e   :  { %p6075_p5 = por %p6074_p4, %p6073_p3 }
0x1890   :  { %p6076_p6 = pnand %p6075_p5, %p6069_p2 }
0x193b   :  { %v4761_v50 = vpop.f32.mrf.mxu0 }
0x193c   :  { %v4762_v32 = vadd.f32 %v5155_v12, %v4761_v50 }
0x193d   :  { %v5207_v33 = vpop.f32.mrf.mxu0 }
0x193e   :  { %4769 = vst.msk [vmem:[#allocation13] sm:$0xff] %vm4768_vm2, %v4762_v32 }
0x193f   :  { %v4764_v42 = vpop.f32.mrf.mxu0 }
0x1940   :  { %v4765_v58 = vadd.f32 %v5155_v12, %v4764_v42 }
0x1941   :  { %v5208_v59 = vpop.f32.mrf.mxu0 }
0x1942   :  { %4770 = vst.msk [vmem:[#allocation13 + $0x8] sm:$0xff] %vm4768_vm2, %v4765_v58 }
0x1943   :  { %6079 = shalt.err (!%p6076_p6)
}
0x1944   :  { %s6113_s8 = smov 128   ;;  %s6114_s11 = smov 8  }
0x1945   :  { %4782 = dma.vmem_to_hbm [thread:$0]  %s4777_s20, 256, %s7527_s9, [#allocation7], %s6113_s8, %s6113_s8, %s6114_s11  }
0x1946   :  { %6094 = dma.done.wait [#allocation7], 256  }
0x1947   :  { %6095 = vsyncadd [#allocation7], 4294967040 }
0x1948   :  { %6096 = dma.done.wait [#allocation15], 192  }
0x1949   :  { %6097 = vsyncadd [#allocation15], 4294967104 }
0x194a   :  { %4816 = vsyncpa [#allocation6], 1 }
0x194b   :  { %4817 = vsyncpa [#allocation11], 1 }
0x194c   :  { %4818 = vsyncpa [#allocation7], 1 }
0x194d   :  { %4819 = vsyncpa [#allocation15], 1 }
0x194e   :  { %4820 = vsyncpa [#allocation8], 1 }

</bundles_post_ra>
